<compile_context>
chip_gen: v7x
topology: tpu7x:2x2x1
jax: 0.10.0
libtpu: 0.0.40
codegen_flags: <defaults>
</compile_context>

<pallas_src>
import functools

import jax
import jax.numpy as jnp
from jax.experimental import pallas as pl
from jax.experimental.pallas import tpu as pltpu


_PAD = 128  # lane margin on each side of the packed spatial axis in the slab


def _cdiv(a, b):
    return -(-a // b)


def _round_up(a, b):
    return _cdiv(a, b) * b


# ------------------------------ Pallas kernel -------------------------------

def _encoder_kernel(x_ref, m_ref, pool_ref,
                    w1_ref, b1_ref, w2_ref, b2_ref,
                    w3_ref, b3_ref, w4_ref, b4_ref,
                    o_ref, pad_ref, stack_ref, *, W, N):
    # Zero only the slab MARGINS.  Done every grid step (not under
    # pl.when(program_id==0)): with "parallel" grid semantics each TensorCore
    # has a private scratch, so only one core would ever see step 0 and the
    # other core's margins would be stale (possibly-NaN) VMEM.
    # Do NOT change the interior-write bounds below without revisiting this.
    zeros_margin = jnp.zeros((pad_ref.shape[0], _PAD), pad_ref.dtype)
    pad_ref[:, 0:_PAD] = zeros_margin
    pad_ref[:, _PAD + N:_PAD + N + _PAD] = zeros_margin

    def conv3x3_bn_relu(x_bf16, w_ref, b_ref, residual=None):
        """3x3 / stride-1 / pad-1 conv as ONE MXU matmul over the 9 stacked
        (shifted, masked) taps + folded-BN shift (+ residual) + ReLU.
        x_bf16: (Cin, N) bf16 -> (Cout, N) f32."""
        cin = x_bf16.shape[0]
        # Only rows [0, cin) of the interior are rewritten; rows above may hold
        # stale data but are never read for this conv.
        pad_ref[0:cin, _PAD:_PAD + N] = x_bf16
        for t in range(9):
            di, dj = t // 3, t % 3
            s = (di - 1) * W + (dj - 1)              # flat spatial shift
            v = pad_ref[0:cin, _PAD + s:_PAD + s + N]
            if t != 4:                               # centre tap needs no mask
                v = v * m_ref[t:t + 1, :]            # hoisted 0/1 bf16 mask
            stack_ref[t * cin:(t + 1) * cin, :] = v
        y = jnp.dot(w_ref[...], stack_ref[0:9 * cin, :],
                    preferred_element_type=jnp.float32)   # (Cout, N) f32
        y = y + b_ref[...]                           # BN shift (scale in w)
        if residual is not None:
            y = y + residual
        return jnp.maximum(y, jnp.float32(0.0))

    x0 = x_ref[0]                                               # (Cin, N) bf16
    y1 = conv3x3_bn_relu(x0, w1_ref, b1_ref)                    # stem
    h1 = conv3x3_bn_relu(y1.astype(jnp.bfloat16), w2_ref, b2_ref)
    y2 = conv3x3_bn_relu(h1.astype(jnp.bfloat16), w3_ref, b3_ref, residual=y1)
    # TODO(synk): stride-2 conv evaluated at full resolution; the GAP matrix
    # below keeps exactly the even-(h, w) columns (exact, just not min-FLOP).
    z = conv3x3_bn_relu(y2.astype(jnp.bfloat16), w4_ref, b4_ref)

    # Fused global-average pool over the stride-2 output positions, one row per
    # packed image: (Bblk, N) x (Cout, N)^T -> lane-dense (Bblk, Cout).
    gap = jax.lax.dot_general(pool_ref[...], z, (((1,), (1,)), ((), ())),
                              preferred_element_type=jnp.float32)
    o_ref[0] = gap


# ------------------------------- host helpers --------------------------------

def _fold_bn(gamma, beta, running_mean, running_var, eps=1e-5):
    scale = gamma / jnp.sqrt(running_var + eps)
    shift = beta - running_mean * scale
    return scale, shift


def _prep_conv(w_oihw, scale, shift, cin_pad=None):
    """Fold BN scale into the conv weight and lay it out for tap stacking:
    (Cout, Cin, 3, 3) -> (Cout, 9*Cin) bf16 with K ordered [tap, cin];
    shift -> (Cout, 1) f32."""
    w = w_oihw.astype(jnp.float32) * scale.astype(jnp.float32)[:, None, None, None]
    cout, cin = w.shape[0], w.shape[1]
    if cin_pad is not None and cin_pad > cin:
        w = jnp.pad(w, ((0, 0), (0, cin_pad - cin), (0, 0), (0, 0)))
        cin = cin_pad
    wk = jnp.transpose(w, (0, 2, 3, 1)).reshape(cout, 9 * cin)  # k=(3di+dj)*cin+c
    return wk.astype(jnp.bfloat16), shift.reshape(cout, 1).astype(jnp.float32)


def _tap_masks(H, W, bblk):
    """(9, bblk*H*W) bf16 0/1 masks: output columns whose tap crosses an image
    border (this also covers cross-image bleed in the packed lane layout)."""
    P = H * W
    pos = jnp.arange(bblk * P, dtype=jnp.int32) % P
    hh, ww = pos // W, pos % W
    rows = []
    for t in range(9):
        di, dj = t // 3, t % 3
        ok = jnp.ones((bblk * P,), bool)
        if di == 0:
            ok = ok & (hh >= 1)
        if di == 2:
            ok = ok & (hh <= H - 2)
        if dj == 0:
            ok = ok & (ww >= 1)
        if dj == 2:
            ok = ok & (ww <= W - 2)
        rows.append(ok)
    return jnp.stack(rows).astype(jnp.bfloat16)


def _pool_matrix(H, W, bblk):
    """(bblk, bblk*H*W) f32: row b averages the even-(h, w) positions of packed
    image b — i.e. the GAP of the stride-2 conv output."""
    P = H * W
    n_pool = ((H + 1) // 2) * ((W + 1) // 2)
    idx = jnp.arange(bblk * P, dtype=jnp.int32)
    img, pos = idx // P, idx % P
    hh, ww = pos // W, pos % W
    keep = ((hh % 2) == 0) & ((ww % 2) == 0)
    sel = (img[None, :] == jnp.arange(bblk, dtype=jnp.int32)[:, None]) & keep[None, :]
    return jnp.where(sel, 1.0 / n_pool, 0.0).astype(jnp.float32)


def _choose_batch_block(B, max_bblk=8):
    bblk = min(B, max_bblk)
    # keep >=2 parallel grid steps when the batch allows it (v7x has 2 TCs)
    if B > 1 and _cdiv(B, bblk) < 2:
        bblk = _cdiv(B, 2)
    return bblk


# ------------------------------- JAX wrapper ----------------------------------

def ccqnet1_forward(params, x_nchw, *, max_batch_block=8):
    """CCQNet1.forward(data) -> feat1 of shape (B, 128)."""
    B, cin, H, W = x_nchw.shape
    P = H * W
    cin_p = _round_up(cin, 8)                  # sublane-align the stem channels
    bblk = _choose_batch_block(B, max_batch_block)
    steps = _cdiv(B, bblk)
    b_pad = steps * bblk
    N = bblk * P

    # Pack Bblk images side by side on the lane axis: (steps, Cin, Bblk*P) bf16.
    x = x_nchw.astype(jnp.float32)
    x = jnp.pad(x, ((0, b_pad - B), (0, cin_p - cin), (0, 0), (0, 0)))
    x = x.reshape(steps, bblk, cin_p, P).transpose(0, 2, 1, 3).reshape(steps, cin_p, N)
    x = x.astype(jnp.bfloat16)

    w1, b1 = _prep_conv(params["conv1_w"], *params["bn1"], cin_pad=cin_p)
    w2, b2 = _prep_conv(params["blk_w1"], *params["bn_b1"])
    w3, b3 = _prep_conv(params["blk_w2"], *params["bn_b2"])
    w4, b4 = _prep_conv(params["conv2_w"], *params["bn2"])
    c_mid = w1.shape[0]
    c_out = w4.shape[0]
    c_slab = max(cin_p, c_mid)

    masks = _tap_masks(H, W, bblk)             # (9, N) bf16, fetched once
    pool = _pool_matrix(H, W, bblk)            # (bblk, N) f32, fetched once

    def full(a):
        nd = a.ndim
        return pl.BlockSpec(a.shape, lambda i, _nd=nd: (0,) * _nd)

    flops = 2 * b_pad * P * 9 * (c_mid * cin_p + 2 * c_mid * c_mid + c_out * c_mid)
    flops += 2 * b_pad * P * c_out             # fused GAP mat-vec
    bytes_accessed = (x.size * 2 + masks.size * 2 + pool.size * 4 +
                      sum(w.size * 2 + b.size * 4 for w, b in
                          ((w1, b1), (w2, b2), (w3, b3), (w4, b4))) +
                      b_pad * c_out * 4)

    out = pl.pallas_call(
        functools.partial(_encoder_kernel, W=W, N=N),
        out_shape=jax.ShapeDtypeStruct((steps, bblk, c_out), jnp.float32),
        grid=(steps,),
        in_specs=[pl.BlockSpec((1, cin_p, N), lambda i: (i, 0, 0)),
                  full(masks), full(pool),
                  full(w1), full(b1), full(w2), full(b2),
                  full(w3), full(b3), full(w4), full(b4)],
        out_specs=pl.BlockSpec((1, bblk, c_out), lambda i: (i, 0, 0)),
        scratch_shapes=[pltpu.VMEM((c_slab, N + 2 * _PAD), jnp.bfloat16),
                        pltpu.VMEM((9 * c_slab, N), jnp.bfloat16)],
        compiler_params=pltpu.CompilerParams(
            dimension_semantics=("parallel",),
            vmem_limit_bytes=32 * 1024 * 1024),
        cost_estimate=pl.CostEstimate(flops=int(flops), transcendentals=0,
                                      bytes_accessed=int(bytes_accessed)),
    )(x, masks, pool, w1, b1, w2, b2, w3, b3, w4, b4)
    return out.reshape(b_pad, c_out)[:B]


# ----------------------------- parameter setup --------------------------------

def init_params(key, c_in=4, c_mid=32, dim_in=128):
    ks = jax.random.split(key, 8)

    def conv_w(k, cout, cin_, kh=3, kw=3):
        fan_in = cin_ * kh * kw
        return jax.random.normal(k, (cout, cin_, kh, kw), jnp.float32) * (
            (2.0 / fan_in) ** 0.5)

    def bn(k, c):
        kg, kb, km = jax.random.split(k, 3)
        gamma = 1.0 + 0.1 * jax.random.normal(kg, (c,), jnp.float32)
        beta = 0.1 * jax.random.normal(kb, (c,), jnp.float32)
        rmean = 0.1 * jax.random.normal(km, (c,), jnp.float32)
        rvar = jnp.ones((c,), jnp.float32)
        return _fold_bn(gamma, beta, rmean, rvar)

    return {
        "conv1_w": conv_w(ks[0], c_mid, c_in),   "bn1": bn(ks[1], c_mid),
        "blk_w1": conv_w(ks[2], c_mid, c_mid),   "bn_b1": bn(ks[3], c_mid),
        "blk_w2": conv_w(ks[4], c_mid, c_mid),   "bn_b2": bn(ks[5], c_mid),
        "conv2_w": conv_w(ks[6], dim_in, c_mid), "bn2": bn(ks[7], dim_in),
    }


# ----------------------- pure-JAX reference (self-check) ----------------------

def _reference_forward(params, x_nchw):
    """Pure-JAX f32 reference of the same encoder (XLA convs)."""
    x = jnp.transpose(x_nchw, (0, 2, 3, 1)).astype(jnp.float32)  # NHWC

    def conv_bn_relu(h, w_oihw, scale, shift, stride, residual=None):
        w = jnp.transpose(w_oihw, (2, 3, 1, 0))                  # HWIO
        y = jax.lax.conv_general_dilated(
            h, w, (stride, stride), ((1, 1), (1, 1)),
            dimension_numbers=("NHWC", "HWIO", "NHWC"))
        y = y * scale + shift
        if residual is not None:
            y = y + residual
        return jnp.maximum(y, 0.0)

    s, b = params["bn1"]
    y = conv_bn_relu(x, params["conv1_w"], s, b, 1)
    s, b = params["bn_b1"]
    h = conv_bn_relu(y, params["blk_w1"], s, b, 1)
    s, b = params["bn_b2"]
    y = conv_bn_relu(h, params["blk_w2"], s, b, 1, residual=y)
    s, b = params["bn2"]
    z = conv_bn_relu(y, params["conv2_w"], s, b, 2)
    return jnp.mean(z, axis=(1, 2))


# ---------------------------------- main ---------------------------------------

if __name__ == "__main__":
    key = jax.random.PRNGKey(0)
    k_param, k_data = jax.random.split(key)

    params = init_params(k_param, c_in=4, c_mid=32, dim_in=128)
    x = jax.random.normal(k_data, (2, 4, 16, 16), jnp.float32)   # NCHW like torch

    fwd = jax.jit(ccqnet1_forward)
    feat1 = jax.block_until_ready(fwd(params, x))

    assert feat1.shape == (2, 128), feat1.shape
    assert feat1.dtype == jnp.float32
    assert bool(jnp.all(jnp.isfinite(feat1)))

    # Loose numerical self-check against a pure-JAX f32 reference (the kernel's
    # matmuls run with bf16 operands / f32 accumulation).
    ref = jax.block_until_ready(jax.jit(_reference_forward)(params, x))
    max_err = float(jnp.max(jnp.abs(feat1 - ref)))
    tol = 5e-2 * float(jnp.max(jnp.abs(ref))) + 5e-2
    assert max_err <= tol, (max_err, tol)

    # Also exercise the batch-packed path (Bblk > 1, two parallel grid steps).
    x8 = jax.random.normal(jax.random.PRNGKey(1), (8, 4, 16, 16), jnp.float32)
    feat8 = jax.block_until_ready(fwd(params, x8))
    ref8 = jax.block_until_ready(jax.jit(_reference_forward)(params, x8))
    err8 = float(jnp.max(jnp.abs(feat8 - ref8)))
    tol8 = 5e-2 * float(jnp.max(jnp.abs(ref8))) + 5e-2
    assert feat8.shape == (8, 128), feat8.shape
    assert err8 <= tol8, (err8, tol8)

    print("KERNEL_OK")
</pallas_src>

<mosaic_0001>
module attributes {stable_mosaic.version = 11 : i64} {
  func.func @_encoder_kernel(%arg0: i32, %arg1: memref<1x8x256xbf16, #tpu.memory_space<vmem>>, %arg2: memref<9x256xbf16, #tpu.memory_space<vmem>>, %arg3: memref<1x256xf32, #tpu.memory_space<vmem>>, %arg4: memref<32x72xbf16, #tpu.memory_space<vmem>>, %arg5: memref<32x1xf32, #tpu.memory_space<vmem>>, %arg6: memref<32x288xbf16, #tpu.memory_space<vmem>>, %arg7: memref<32x1xf32, #tpu.memory_space<vmem>>, %arg8: memref<32x288xbf16, #tpu.memory_space<vmem>>, %arg9: memref<32x1xf32, #tpu.memory_space<vmem>>, %arg10: memref<128x288xbf16, #tpu.memory_space<vmem>>, %arg11: memref<128x1xf32, #tpu.memory_space<vmem>>, %arg12: memref<1x1x128xf32, #tpu.memory_space<vmem>>, %arg13: memref<32x512xbf16, #tpu.memory_space<vmem>>, %arg14: memref<288x256xbf16, #tpu.memory_space<vmem>>) attributes {dimension_semantics = [#tpu.dimension_semantics<parallel>], iteration_bounds = array<i64: 2>, scalar_prefetch = 0 : i64, scratch_operands = 2 : i64, tpu.core_type = #tpu.core_type<tc>, window_params = [{transform_indices = @transform_0, window_bounds = array<i64: 1, 8, 256>}, {pipeline_mode = #tpu.pipeline_mode<synchronous>, transform_indices = @transform_1, window_bounds = array<i64: 9, 256>}, {pipeline_mode = #tpu.pipeline_mode<synchronous>, transform_indices = @transform_2, window_bounds = array<i64: 1, 256>}, {pipeline_mode = #tpu.pipeline_mode<synchronous>, transform_indices = @transform_3, window_bounds = array<i64: 32, 72>}, {pipeline_mode = #tpu.pipeline_mode<synchronous>, transform_indices = @transform_4, window_bounds = array<i64: 32, 1>}, {pipeline_mode = #tpu.pipeline_mode<synchronous>, transform_indices = @transform_5, window_bounds = array<i64: 32, 288>}, {pipeline_mode = #tpu.pipeline_mode<synchronous>, transform_indices = @transform_6, window_bounds = array<i64: 32, 1>}, {pipeline_mode = #tpu.pipeline_mode<synchronous>, transform_indices = @transform_7, window_bounds = array<i64: 32, 288>}, {pipeline_mode = #tpu.pipeline_mode<synchronous>, transform_indices = @transform_8, window_bounds = array<i64: 32, 1>}, {pipeline_mode = #tpu.pipeline_mode<synchronous>, transform_indices = @transform_9, window_bounds = array<i64: 128, 288>}, {pipeline_mode = #tpu.pipeline_mode<synchronous>, transform_indices = @transform_10, window_bounds = array<i64: 128, 1>}, {transform_indices = @transform_11, window_bounds = array<i64: 1, 1, 128>}]} {
    %cst = arith.constant 0.000000e+00 : bf16
    %0 = vector.broadcast %cst : bf16 to vector<32x128xbf16>
    %c0 = arith.constant 0 : index
    %c0_0 = arith.constant 0 : index
    %1 = vector.load %arg13[%c0, %c0_0] : memref<32x512xbf16, #tpu.memory_space<vmem>>, vector<32x128xbf16>
    tpu.vector_store %arg13[%c0, %c0_0], %0 {strides = array<i32>} : memref<32x512xbf16, #tpu.memory_space<vmem>>, vector<32x128xbf16>,
    %c0_1 = arith.constant 0 : index
    %c384 = arith.constant 384 : index
    %2 = vector.load %arg13[%c0_1, %c384] : memref<32x512xbf16, #tpu.memory_space<vmem>>, vector<32x128xbf16>
    tpu.vector_store %arg13[%c0_1, %c384], %0 {strides = array<i32>} : memref<32x512xbf16, #tpu.memory_space<vmem>>, vector<32x128xbf16>,
    %c0_2 = arith.constant 0 : index
    %c0_3 = arith.constant 0 : index
    %c0_4 = arith.constant 0 : index
    %3 = vector.load %arg1[%c0_2, %c0_3, %c0_4] : memref<1x8x256xbf16, #tpu.memory_space<vmem>>, vector<1x8x256xbf16>
    %4 = vector.shape_cast %3 : vector<1x8x256xbf16> to vector<8x256xbf16>
    %c0_5 = arith.constant 0 : index
    %c128 = arith.constant 128 : index
    %5 = vector.load %arg13[%c0_5, %c128] : memref<32x512xbf16, #tpu.memory_space<vmem>>, vector<8x256xbf16>
    tpu.vector_store %arg13[%c0_5, %c128], %4 {strides = array<i32>} : memref<32x512xbf16, #tpu.memory_space<vmem>>, vector<8x256xbf16>,
    %c0_6 = arith.constant 0 : index
    %c111 = arith.constant 111 : index
    %6 = vector.load %arg13[%c0_6, %c111] : memref<32x512xbf16, #tpu.memory_space<vmem>>, vector<8x256xbf16>
    %c0_7 = arith.constant 0 : index
    %c0_8 = arith.constant 0 : index
    %7 = vector.load %arg2[%c0_7, %c0_8] : memref<9x256xbf16, #tpu.memory_space<vmem>>, vector<1x256xbf16>
    %8 = vector.broadcast %7 : vector<1x256xbf16> to vector<8x256xbf16>
    %9 = arith.mulf %6, %8 : vector<8x256xbf16>
    %c0_9 = arith.constant 0 : index
    %c0_10 = arith.constant 0 : index
    %10 = vector.load %arg14[%c0_9, %c0_10] : memref<288x256xbf16, #tpu.memory_space<vmem>>, vector<8x256xbf16>
    tpu.vector_store %arg14[%c0_9, %c0_10], %9 {strides = array<i32>} : memref<288x256xbf16, #tpu.memory_space<vmem>>, vector<8x256xbf16>,
    %c0_11 = arith.constant 0 : index
    %c112 = arith.constant 112 : index
    %11 = vector.load %arg13[%c0_11, %c112] : memref<32x512xbf16, #tpu.memory_space<vmem>>, vector<8x256xbf16>
    %c1 = arith.constant 1 : index
    %c0_12 = arith.constant 0 : index
    %12 = vector.load %arg2[%c1, %c0_12] : memref<9x256xbf16, #tpu.memory_space<vmem>>, vector<1x256xbf16>
    %13 = vector.broadcast %12 : vector<1x256xbf16> to vector<8x256xbf16>
    %14 = arith.mulf %11, %13 : vector<8x256xbf16>
    %c8 = arith.constant 8 : index
    %c0_13 = arith.constant 0 : index
    %15 = vector.load %arg14[%c8, %c0_13] : memref<288x256xbf16, #tpu.memory_space<vmem>>, vector<8x256xbf16>
    tpu.vector_store %arg14[%c8, %c0_13], %14 {strides = array<i32>} : memref<288x256xbf16, #tpu.memory_space<vmem>>, vector<8x256xbf16>,
    %c0_14 = arith.constant 0 : index
    %c113 = arith.constant 113 : index
    %16 = vector.load %arg13[%c0_14, %c113] : memref<32x512xbf16, #tpu.memory_space<vmem>>, vector<8x256xbf16>
    %c2 = arith.constant 2 : index
    %c0_15 = arith.constant 0 : index
    %17 = vector.load %arg2[%c2, %c0_15] : memref<9x256xbf16, #tpu.memory_space<vmem>>, vector<1x256xbf16>
    %18 = vector.broadcast %17 : vector<1x256xbf16> to vector<8x256xbf16>
    %19 = arith.mulf %16, %18 : vector<8x256xbf16>
    %c16 = arith.constant 16 : index
    %c0_16 = arith.constant 0 : index
    %20 = vector.load %arg14[%c16, %c0_16] : memref<288x256xbf16, #tpu.memory_space<vmem>>, vector<8x256xbf16>
    tpu.vector_store %arg14[%c16, %c0_16], %19 {strides = array<i32>} : memref<288x256xbf16, #tpu.memory_space<vmem>>, vector<8x256xbf16>,
    %c0_17 = arith.constant 0 : index
    %c127 = arith.constant 127 : index
    %21 = vector.load %arg13[%c0_17, %c127] : memref<32x512xbf16, #tpu.memory_space<vmem>>, vector<8x256xbf16>
    %c3 = arith.constant 3 : index
    %c0_18 = arith.constant 0 : index
    %22 = vector.load %arg2[%c3, %c0_18] : memref<9x256xbf16, #tpu.memory_space<vmem>>, vector<1x256xbf16>
    %23 = vector.broadcast %22 : vector<1x256xbf16> to vector<8x256xbf16>
    %24 = arith.mulf %21, %23 : vector<8x256xbf16>
    %c24 = arith.constant 24 : index
    %c0_19 = arith.constant 0 : index
    %25 = vector.load %arg14[%c24, %c0_19] : memref<288x256xbf16, #tpu.memory_space<vmem>>, vector<8x256xbf16>
    tpu.vector_store %arg14[%c24, %c0_19], %24 {strides = array<i32>} : memref<288x256xbf16, #tpu.memory_space<vmem>>, vector<8x256xbf16>,
    %c0_20 = arith.constant 0 : index
    %c128_21 = arith.constant 128 : index
    %26 = vector.load %arg13[%c0_20, %c128_21] : memref<32x512xbf16, #tpu.memory_space<vmem>>, vector<8x256xbf16>
    %c32 = arith.constant 32 : index
    %c0_22 = arith.constant 0 : index
    %27 = vector.load %arg14[%c32, %c0_22] : memref<288x256xbf16, #tpu.memory_space<vmem>>, vector<8x256xbf16>
    tpu.vector_store %arg14[%c32, %c0_22], %26 {strides = array<i32>} : memref<288x256xbf16, #tpu.memory_space<vmem>>, vector<8x256xbf16>,
    %c0_23 = arith.constant 0 : index
    %c129 = arith.constant 129 : index
    %28 = vector.load %arg13[%c0_23, %c129] : memref<32x512xbf16, #tpu.memory_space<vmem>>, vector<8x256xbf16>
    %c5 = arith.constant 5 : index
    %c0_24 = arith.constant 0 : index
    %29 = vector.load %arg2[%c5, %c0_24] : memref<9x256xbf16, #tpu.memory_space<vmem>>, vector<1x256xbf16>
    %30 = vector.broadcast %29 : vector<1x256xbf16> to vector<8x256xbf16>
    %31 = arith.mulf %28, %30 : vector<8x256xbf16>
    %c40 = arith.constant 40 : index
    %c0_25 = arith.constant 0 : index
    %32 = vector.load %arg14[%c40, %c0_25] : memref<288x256xbf16, #tpu.memory_space<vmem>>, vector<8x256xbf16>
    tpu.vector_store %arg14[%c40, %c0_25], %31 {strides = array<i32>} : memref<288x256xbf16, #tpu.memory_space<vmem>>, vector<8x256xbf16>,
    %c0_26 = arith.constant 0 : index
    %c143 = arith.constant 143 : index
    %33 = vector.load %arg13[%c0_26, %c143] : memref<32x512xbf16, #tpu.memory_space<vmem>>, vector<8x256xbf16>
    %c6 = arith.constant 6 : index
    %c0_27 = arith.constant 0 : index
    %34 = vector.load %arg2[%c6, %c0_27] : memref<9x256xbf16, #tpu.memory_space<vmem>>, vector<1x256xbf16>
    %35 = vector.broadcast %34 : vector<1x256xbf16> to vector<8x256xbf16>
    %36 = arith.mulf %33, %35 : vector<8x256xbf16>
    %c48 = arith.constant 48 : index
    %c0_28 = arith.constant 0 : index
    %37 = vector.load %arg14[%c48, %c0_28] : memref<288x256xbf16, #tpu.memory_space<vmem>>, vector<8x256xbf16>
    tpu.vector_store %arg14[%c48, %c0_28], %36 {strides = array<i32>} : memref<288x256xbf16, #tpu.memory_space<vmem>>, vector<8x256xbf16>,
    %c0_29 = arith.constant 0 : index
    %c144 = arith.constant 144 : index
    %38 = vector.load %arg13[%c0_29, %c144] : memref<32x512xbf16, #tpu.memory_space<vmem>>, vector<8x256xbf16>
    %c7 = arith.constant 7 : index
    %c0_30 = arith.constant 0 : index
    %39 = vector.load %arg2[%c7, %c0_30] : memref<9x256xbf16, #tpu.memory_space<vmem>>, vector<1x256xbf16>
    %40 = vector.broadcast %39 : vector<1x256xbf16> to vector<8x256xbf16>
    %41 = arith.mulf %38, %40 : vector<8x256xbf16>
    %c56 = arith.constant 56 : index
    %c0_31 = arith.constant 0 : index
    %42 = vector.load %arg14[%c56, %c0_31] : memref<288x256xbf16, #tpu.memory_space<vmem>>, vector<8x256xbf16>
    tpu.vector_store %arg14[%c56, %c0_31], %41 {strides = array<i32>} : memref<288x256xbf16, #tpu.memory_space<vmem>>, vector<8x256xbf16>,
    %c0_32 = arith.constant 0 : index
    %c145 = arith.constant 145 : index
    %43 = vector.load %arg13[%c0_32, %c145] : memref<32x512xbf16, #tpu.memory_space<vmem>>, vector<8x256xbf16>
    %c8_33 = arith.constant 8 : index
    %c0_34 = arith.constant 0 : index
    %44 = vector.load %arg2[%c8_33, %c0_34] : memref<9x256xbf16, #tpu.memory_space<vmem>>, vector<1x256xbf16>
    %45 = vector.broadcast %44 : vector<1x256xbf16> to vector<8x256xbf16>
    %46 = arith.mulf %43, %45 : vector<8x256xbf16>
    %c64 = arith.constant 64 : index
    %c0_35 = arith.constant 0 : index
    %47 = vector.load %arg14[%c64, %c0_35] : memref<288x256xbf16, #tpu.memory_space<vmem>>, vector<8x256xbf16>
    tpu.vector_store %arg14[%c64, %c0_35], %46 {strides = array<i32>} : memref<288x256xbf16, #tpu.memory_space<vmem>>, vector<8x256xbf16>,
    %c0_36 = arith.constant 0 : index
    %c0_37 = arith.constant 0 : index
    %48 = vector.load %arg4[%c0_36, %c0_37] : memref<32x72xbf16, #tpu.memory_space<vmem>>, vector<32x72xbf16>
    %c0_38 = arith.constant 0 : index
    %c0_39 = arith.constant 0 : index
    %49 = vector.load %arg14[%c0_38, %c0_39] : memref<288x256xbf16, #tpu.memory_space<vmem>>, vector<72x256xbf16>
    %cst_40 = arith.constant dense<0.000000e+00> : vector<32x256xf32>
    %50 = tpu.matmul %48, %49, %cst_40 {dimension_numbers = #tpu.dot_dimension_numbers<[1], [0], [0], [1], [0, 0, 1, 1], [], []>} : vector<32x72xbf16>, vector<72x256xbf16>, vector<32x256xf32> -> vector<32x256xf32>
    %c0_41 = arith.constant 0 : index
    %c0_42 = arith.constant 0 : index
    %51 = vector.load %arg5[%c0_41, %c0_42] : memref<32x1xf32, #tpu.memory_space<vmem>>, vector<32x1xf32>
    %52 = vector.broadcast %51 : vector<32x1xf32> to vector<32x256xf32>
    %53 = arith.addf %50, %52 : vector<32x256xf32>
    %cst_43 = arith.constant 0.000000e+00 : f32
    %54 = vector.broadcast %cst_43 : f32 to vector<32x256xf32>
    %55 = arith.maximumf %53, %54 : vector<32x256xf32>
    %56 = arith.truncf %55 : vector<32x256xf32> to vector<32x256xbf16>
    %c0_44 = arith.constant 0 : index
    %c128_45 = arith.constant 128 : index
    %57 = vector.load %arg13[%c0_44, %c128_45] : memref<32x512xbf16, #tpu.memory_space<vmem>>, vector<32x256xbf16>
    tpu.vector_store %arg13[%c0_44, %c128_45], %56 {strides = array<i32>} : memref<32x512xbf16, #tpu.memory_space<vmem>>, vector<32x256xbf16>,
    %c0_46 = arith.constant 0 : index
    %c111_47 = arith.constant 111 : index
    %58 = vector.load %arg13[%c0_46, %c111_47] : memref<32x512xbf16, #tpu.memory_space<vmem>>, vector<32x256xbf16>
    %c0_48 = arith.constant 0 : index
    %c0_49 = arith.constant 0 : index
    %59 = vector.load %arg2[%c0_48, %c0_49] : memref<9x256xbf16, #tpu.memory_space<vmem>>, vector<1x256xbf16>
    %60 = vector.broadcast %59 : vector<1x256xbf16> to vector<32x256xbf16>
    %61 = arith.mulf %58, %60 : vector<32x256xbf16>
    %c0_50 = arith.constant 0 : index
    %c0_51 = arith.constant 0 : index
    %62 = vector.load %arg14[%c0_50, %c0_51] : memref<288x256xbf16, #tpu.memory_space<vmem>>, vector<32x256xbf16>
    tpu.vector_store %arg14[%c0_50, %c0_51], %61 {strides = array<i32>} : memref<288x256xbf16, #tpu.memory_space<vmem>>, vector<32x256xbf16>,
    %c0_52 = arith.constant 0 : index
    %c112_53 = arith.constant 112 : index
    %63 = vector.load %arg13[%c0_52, %c112_53] : memref<32x512xbf16, #tpu.memory_space<vmem>>, vector<32x256xbf16>
    %c1_54 = arith.constant 1 : index
    %c0_55 = arith.constant 0 : index
    %64 = vector.load %arg2[%c1_54, %c0_55] : memref<9x256xbf16, #tpu.memory_space<vmem>>, vector<1x256xbf16>
    %65 = vector.broadcast %64 : vector<1x256xbf16> to vector<32x256xbf16>
    %66 = arith.mulf %63, %65 : vector<32x256xbf16>
    %c32_56 = arith.constant 32 : index
    %c0_57 = arith.constant 0 : index
    %67 = vector.load %arg14[%c32_56, %c0_57] : memref<288x256xbf16, #tpu.memory_space<vmem>>, vector<32x256xbf16>
    tpu.vector_store %arg14[%c32_56, %c0_57], %66 {strides = array<i32>} : memref<288x256xbf16, #tpu.memory_space<vmem>>, vector<32x256xbf16>,
    %c0_58 = arith.constant 0 : index
    %c113_59 = arith.constant 113 : index
    %68 = vector.load %arg13[%c0_58, %c113_59] : memref<32x512xbf16, #tpu.memory_space<vmem>>, vector<32x256xbf16>
    %c2_60 = arith.constant 2 : index
    %c0_61 = arith.constant 0 : index
    %69 = vector.load %arg2[%c2_60, %c0_61] : memref<9x256xbf16, #tpu.memory_space<vmem>>, vector<1x256xbf16>
    %70 = vector.broadcast %69 : vector<1x256xbf16> to vector<32x256xbf16>
    %71 = arith.mulf %68, %70 : vector<32x256xbf16>
    %c64_62 = arith.constant 64 : index
    %c0_63 = arith.constant 0 : index
    %72 = vector.load %arg14[%c64_62, %c0_63] : memref<288x256xbf16, #tpu.memory_space<vmem>>, vector<32x256xbf16>
    tpu.vector_store %arg14[%c64_62, %c0_63], %71 {strides = array<i32>} : memref<288x256xbf16, #tpu.memory_space<vmem>>, vector<32x256xbf16>,
    %c0_64 = arith.constant 0 : index
    %c127_65 = arith.constant 127 : index
    %73 = vector.load %arg13[%c0_64, %c127_65] : memref<32x512xbf16, #tpu.memory_space<vmem>>, vector<32x256xbf16>
    %c3_66 = arith.constant 3 : index
    %c0_67 = arith.constant 0 : index
    %74 = vector.load %arg2[%c3_66, %c0_67] : memref<9x256xbf16, #tpu.memory_space<vmem>>, vector<1x256xbf16>
    %75 = vector.broadcast %74 : vector<1x256xbf16> to vector<32x256xbf16>
    %76 = arith.mulf %73, %75 : vector<32x256xbf16>
    %c96 = arith.constant 96 : index
    %c0_68 = arith.constant 0 : index
    %77 = vector.load %arg14[%c96, %c0_68] : memref<288x256xbf16, #tpu.memory_space<vmem>>, vector<32x256xbf16>
    tpu.vector_store %arg14[%c96, %c0_68], %76 {strides = array<i32>} : memref<288x256xbf16, #tpu.memory_space<vmem>>, vector<32x256xbf16>,
    %c0_69 = arith.constant 0 : index
    %c128_70 = arith.constant 128 : index
    %78 = vector.load %arg13[%c0_69, %c128_70] : memref<32x512xbf16, #tpu.memory_space<vmem>>, vector<32x256xbf16>
    %c128_71 = arith.constant 128 : index
    %c0_72 = arith.constant 0 : index
    %79 = vector.load %arg14[%c128_71, %c0_72] : memref<288x256xbf16, #tpu.memory_space<vmem>>, vector<32x256xbf16>
    tpu.vector_store %arg14[%c128_71, %c0_72], %78 {strides = array<i32>} : memref<288x256xbf16, #tpu.memory_space<vmem>>, vector<32x256xbf16>,
    %c0_73 = arith.constant 0 : index
    %c129_74 = arith.constant 129 : index
    %80 = vector.load %arg13[%c0_73, %c129_74] : memref<32x512xbf16, #tpu.memory_space<vmem>>, vector<32x256xbf16>
    %c5_75 = arith.constant 5 : index
    %c0_76 = arith.constant 0 : index
    %81 = vector.load %arg2[%c5_75, %c0_76] : memref<9x256xbf16, #tpu.memory_space<vmem>>, vector<1x256xbf16>
    %82 = vector.broadcast %81 : vector<1x256xbf16> to vector<32x256xbf16>
    %83 = arith.mulf %80, %82 : vector<32x256xbf16>
    %c160 = arith.constant 160 : index
    %c0_77 = arith.constant 0 : index
    %84 = vector.load %arg14[%c160, %c0_77] : memref<288x256xbf16, #tpu.memory_space<vmem>>, vector<32x256xbf16>
    tpu.vector_store %arg14[%c160, %c0_77], %83 {strides = array<i32>} : memref<288x256xbf16, #tpu.memory_space<vmem>>, vector<32x256xbf16>,
    %c0_78 = arith.constant 0 : index
    %c143_79 = arith.constant 143 : index
    %85 = vector.load %arg13[%c0_78, %c143_79] : memref<32x512xbf16, #tpu.memory_space<vmem>>, vector<32x256xbf16>
    %c6_80 = arith.constant 6 : index
    %c0_81 = arith.constant 0 : index
    %86 = vector.load %arg2[%c6_80, %c0_81] : memref<9x256xbf16, #tpu.memory_space<vmem>>, vector<1x256xbf16>
    %87 = vector.broadcast %86 : vector<1x256xbf16> to vector<32x256xbf16>
    %88 = arith.mulf %85, %87 : vector<32x256xbf16>
    %c192 = arith.constant 192 : index
    %c0_82 = arith.constant 0 : index
    %89 = vector.load %arg14[%c192, %c0_82] : memref<288x256xbf16, #tpu.memory_space<vmem>>, vector<32x256xbf16>
    tpu.vector_store %arg14[%c192, %c0_82], %88 {strides = array<i32>} : memref<288x256xbf16, #tpu.memory_space<vmem>>, vector<32x256xbf16>,
    %c0_83 = arith.constant 0 : index
    %c144_84 = arith.constant 144 : index
    %90 = vector.load %arg13[%c0_83, %c144_84] : memref<32x512xbf16, #tpu.memory_space<vmem>>, vector<32x256xbf16>
    %c7_85 = arith.constant 7 : index
    %c0_86 = arith.constant 0 : index
    %91 = vector.load %arg2[%c7_85, %c0_86] : memref<9x256xbf16, #tpu.memory_space<vmem>>, vector<1x256xbf16>
    %92 = vector.broadcast %91 : vector<1x256xbf16> to vector<32x256xbf16>
    %93 = arith.mulf %90, %92 : vector<32x256xbf16>
    %c224 = arith.constant 224 : index
    %c0_87 = arith.constant 0 : index
    %94 = vector.load %arg14[%c224, %c0_87] : memref<288x256xbf16, #tpu.memory_space<vmem>>, vector<32x256xbf16>
    tpu.vector_store %arg14[%c224, %c0_87], %93 {strides = array<i32>} : memref<288x256xbf16, #tpu.memory_space<vmem>>, vector<32x256xbf16>,
    %c0_88 = arith.constant 0 : index
    %c145_89 = arith.constant 145 : index
    %95 = vector.load %arg13[%c0_88, %c145_89] : memref<32x512xbf16, #tpu.memory_space<vmem>>, vector<32x256xbf16>
    %c8_90 = arith.constant 8 : index
    %c0_91 = arith.constant 0 : index
    %96 = vector.load %arg2[%c8_90, %c0_91] : memref<9x256xbf16, #tpu.memory_space<vmem>>, vector<1x256xbf16>
    %97 = vector.broadcast %96 : vector<1x256xbf16> to vector<32x256xbf16>
    %98 = arith.mulf %95, %97 : vector<32x256xbf16>
    %c256 = arith.constant 256 : index
    %c0_92 = arith.constant 0 : index
    %99 = vector.load %arg14[%c256, %c0_92] : memref<288x256xbf16, #tpu.memory_space<vmem>>, vector<32x256xbf16>
    tpu.vector_store %arg14[%c256, %c0_92], %98 {strides = array<i32>} : memref<288x256xbf16, #tpu.memory_space<vmem>>, vector<32x256xbf16>,
    %c0_93 = arith.constant 0 : index
    %c0_94 = arith.constant 0 : index
    %100 = vector.load %arg6[%c0_93, %c0_94] : memref<32x288xbf16, #tpu.memory_space<vmem>>, vector<32x288xbf16>
    %c0_95 = arith.constant 0 : index
    %c0_96 = arith.constant 0 : index
    %101 = vector.load %arg14[%c0_95, %c0_96] : memref<288x256xbf16, #tpu.memory_space<vmem>>, vector<288x256xbf16>
    %cst_97 = arith.constant dense<0.000000e+00> : vector<32x256xf32>
    %102 = tpu.matmul %100, %101, %cst_97 {dimension_numbers = #tpu.dot_dimension_numbers<[1], [0], [0], [1], [0, 0, 1, 1], [], []>} : vector<32x288xbf16>, vector<288x256xbf16>, vector<32x256xf32> -> vector<32x256xf32>
    %c0_98 = arith.constant 0 : index
    %c0_99 = arith.constant 0 : index
    %103 = vector.load %arg7[%c0_98, %c0_99] : memref<32x1xf32, #tpu.memory_space<vmem>>, vector<32x1xf32>
    %104 = vector.broadcast %103 : vector<32x1xf32> to vector<32x256xf32>
    %105 = arith.addf %102, %104 : vector<32x256xf32>
    %cst_100 = arith.constant 0.000000e+00 : f32
    %106 = vector.broadcast %cst_100 : f32 to vector<32x256xf32>
    %107 = arith.maximumf %105, %106 : vector<32x256xf32>
    %108 = arith.truncf %107 : vector<32x256xf32> to vector<32x256xbf16>
    %c0_101 = arith.constant 0 : index
    %c128_102 = arith.constant 128 : index
    %109 = vector.load %arg13[%c0_101, %c128_102] : memref<32x512xbf16, #tpu.memory_space<vmem>>, vector<32x256xbf16>
    tpu.vector_store %arg13[%c0_101, %c128_102], %108 {strides = array<i32>} : memref<32x512xbf16, #tpu.memory_space<vmem>>, vector<32x256xbf16>,
    %c0_103 = arith.constant 0 : index
    %c111_104 = arith.constant 111 : index
    %110 = vector.load %arg13[%c0_103, %c111_104] : memref<32x512xbf16, #tpu.memory_space<vmem>>, vector<32x256xbf16>
    %c0_105 = arith.constant 0 : index
    %c0_106 = arith.constant 0 : index
    %111 = vector.load %arg2[%c0_105, %c0_106] : memref<9x256xbf16, #tpu.memory_space<vmem>>, vector<1x256xbf16>
    %112 = vector.broadcast %111 : vector<1x256xbf16> to vector<32x256xbf16>
    %113 = arith.mulf %110, %112 : vector<32x256xbf16>
    %c0_107 = arith.constant 0 : index
    %c0_108 = arith.constant 0 : index
    %114 = vector.load %arg14[%c0_107, %c0_108] : memref<288x256xbf16, #tpu.memory_space<vmem>>, vector<32x256xbf16>
    tpu.vector_store %arg14[%c0_107, %c0_108], %113 {strides = array<i32>} : memref<288x256xbf16, #tpu.memory_space<vmem>>, vector<32x256xbf16>,
    %c0_109 = arith.constant 0 : index
    %c112_110 = arith.constant 112 : index
    %115 = vector.load %arg13[%c0_109, %c112_110] : memref<32x512xbf16, #tpu.memory_space<vmem>>, vector<32x256xbf16>
    %c1_111 = arith.constant 1 : index
    %c0_112 = arith.constant 0 : index
    %116 = vector.load %arg2[%c1_111, %c0_112] : memref<9x256xbf16, #tpu.memory_space<vmem>>, vector<1x256xbf16>
    %117 = vector.broadcast %116 : vector<1x256xbf16> to vector<32x256xbf16>
    %118 = arith.mulf %115, %117 : vector<32x256xbf16>
    %c32_113 = arith.constant 32 : index
    %c0_114 = arith.constant 0 : index
    %119 = vector.load %arg14[%c32_113, %c0_114] : memref<288x256xbf16, #tpu.memory_space<vmem>>, vector<32x256xbf16>
    tpu.vector_store %arg14[%c32_113, %c0_114], %118 {strides = array<i32>} : memref<288x256xbf16, #tpu.memory_space<vmem>>, vector<32x256xbf16>,
    %c0_115 = arith.constant 0 : index
    %c113_116 = arith.constant 113 : index
    %120 = vector.load %arg13[%c0_115, %c113_116] : memref<32x512xbf16, #tpu.memory_space<vmem>>, vector<32x256xbf16>
    %c2_117 = arith.constant 2 : index
    %c0_118 = arith.constant 0 : index
    %121 = vector.load %arg2[%c2_117, %c0_118] : memref<9x256xbf16, #tpu.memory_space<vmem>>, vector<1x256xbf16>
    %122 = vector.broadcast %121 : vector<1x256xbf16> to vector<32x256xbf16>
    %123 = arith.mulf %120, %122 : vector<32x256xbf16>
    %c64_119 = arith.constant 64 : index
    %c0_120 = arith.constant 0 : index
    %124 = vector.load %arg14[%c64_119, %c0_120] : memref<288x256xbf16, #tpu.memory_space<vmem>>, vector<32x256xbf16>
    tpu.vector_store %arg14[%c64_119, %c0_120], %123 {strides = array<i32>} : memref<288x256xbf16, #tpu.memory_space<vmem>>, vector<32x256xbf16>,
    %c0_121 = arith.constant 0 : index
    %c127_122 = arith.constant 127 : index
    %125 = vector.load %arg13[%c0_121, %c127_122] : memref<32x512xbf16, #tpu.memory_space<vmem>>, vector<32x256xbf16>
    %c3_123 = arith.constant 3 : index
    %c0_124 = arith.constant 0 : index
    %126 = vector.load %arg2[%c3_123, %c0_124] : memref<9x256xbf16, #tpu.memory_space<vmem>>, vector<1x256xbf16>
    %127 = vector.broadcast %126 : vector<1x256xbf16> to vector<32x256xbf16>
    %128 = arith.mulf %125, %127 : vector<32x256xbf16>
    %c96_125 = arith.constant 96 : index
    %c0_126 = arith.constant 0 : index
    %129 = vector.load %arg14[%c96_125, %c0_126] : memref<288x256xbf16, #tpu.memory_space<vmem>>, vector<32x256xbf16>
    tpu.vector_store %arg14[%c96_125, %c0_126], %128 {strides = array<i32>} : memref<288x256xbf16, #tpu.memory_space<vmem>>, vector<32x256xbf16>,
    %c0_127 = arith.constant 0 : index
    %c128_128 = arith.constant 128 : index
    %130 = vector.load %arg13[%c0_127, %c128_128] : memref<32x512xbf16, #tpu.memory_space<vmem>>, vector<32x256xbf16>
    %c128_129 = arith.constant 128 : index
    %c0_130 = arith.constant 0 : index
    %131 = vector.load %arg14[%c128_129, %c0_130] : memref<288x256xbf16, #tpu.memory_space<vmem>>, vector<32x256xbf16>
    tpu.vector_store %arg14[%c128_129, %c0_130], %130 {strides = array<i32>} : memref<288x256xbf16, #tpu.memory_space<vmem>>, vector<32x256xbf16>,
    %c0_131 = arith.constant 0 : index
    %c129_132 = arith.constant 129 : index
    %132 = vector.load %arg13[%c0_131, %c129_132] : memref<32x512xbf16, #tpu.memory_space<vmem>>, vector<32x256xbf16>
    %c5_133 = arith.constant 5 : index
    %c0_134 = arith.constant 0 : index
    %133 = vector.load %arg2[%c5_133, %c0_134] : memref<9x256xbf16, #tpu.memory_space<vmem>>, vector<1x256xbf16>
    %134 = vector.broadcast %133 : vector<1x256xbf16> to vector<32x256xbf16>
    %135 = arith.mulf %132, %134 : vector<32x256xbf16>
    %c160_135 = arith.constant 160 : index
    %c0_136 = arith.constant 0 : index
    %136 = vector.load %arg14[%c160_135, %c0_136] : memref<288x256xbf16, #tpu.memory_space<vmem>>, vector<32x256xbf16>
    tpu.vector_store %arg14[%c160_135, %c0_136], %135 {strides = array<i32>} : memref<288x256xbf16, #tpu.memory_space<vmem>>, vector<32x256xbf16>,
    %c0_137 = arith.constant 0 : index
    %c143_138 = arith.constant 143 : index
    %137 = vector.load %arg13[%c0_137, %c143_138] : memref<32x512xbf16, #tpu.memory_space<vmem>>, vector<32x256xbf16>
    %c6_139 = arith.constant 6 : index
    %c0_140 = arith.constant 0 : index
    %138 = vector.load %arg2[%c6_139, %c0_140] : memref<9x256xbf16, #tpu.memory_space<vmem>>, vector<1x256xbf16>
    %139 = vector.broadcast %138 : vector<1x256xbf16> to vector<32x256xbf16>
    %140 = arith.mulf %137, %139 : vector<32x256xbf16>
    %c192_141 = arith.constant 192 : index
    %c0_142 = arith.constant 0 : index
    %141 = vector.load %arg14[%c192_141, %c0_142] : memref<288x256xbf16, #tpu.memory_space<vmem>>, vector<32x256xbf16>
    tpu.vector_store %arg14[%c192_141, %c0_142], %140 {strides = array<i32>} : memref<288x256xbf16, #tpu.memory_space<vmem>>, vector<32x256xbf16>,
    %c0_143 = arith.constant 0 : index
    %c144_144 = arith.constant 144 : index
    %142 = vector.load %arg13[%c0_143, %c144_144] : memref<32x512xbf16, #tpu.memory_space<vmem>>, vector<32x256xbf16>
    %c7_145 = arith.constant 7 : index
    %c0_146 = arith.constant 0 : index
    %143 = vector.load %arg2[%c7_145, %c0_146] : memref<9x256xbf16, #tpu.memory_space<vmem>>, vector<1x256xbf16>
    %144 = vector.broadcast %143 : vector<1x256xbf16> to vector<32x256xbf16>
    %145 = arith.mulf %142, %144 : vector<32x256xbf16>
    %c224_147 = arith.constant 224 : index
    %c0_148 = arith.constant 0 : index
    %146 = vector.load %arg14[%c224_147, %c0_148] : memref<288x256xbf16, #tpu.memory_space<vmem>>, vector<32x256xbf16>
    tpu.vector_store %arg14[%c224_147, %c0_148], %145 {strides = array<i32>} : memref<288x256xbf16, #tpu.memory_space<vmem>>, vector<32x256xbf16>,
    %c0_149 = arith.constant 0 : index
    %c145_150 = arith.constant 145 : index
    %147 = vector.load %arg13[%c0_149, %c145_150] : memref<32x512xbf16, #tpu.memory_space<vmem>>, vector<32x256xbf16>
    %c8_151 = arith.constant 8 : index
    %c0_152 = arith.constant 0 : index
    %148 = vector.load %arg2[%c8_151, %c0_152] : memref<9x256xbf16, #tpu.memory_space<vmem>>, vector<1x256xbf16>
    %149 = vector.broadcast %148 : vector<1x256xbf16> to vector<32x256xbf16>
    %150 = arith.mulf %147, %149 : vector<32x256xbf16>
    %c256_153 = arith.constant 256 : index
    %c0_154 = arith.constant 0 : index
    %151 = vector.load %arg14[%c256_153, %c0_154] : memref<288x256xbf16, #tpu.memory_space<vmem>>, vector<32x256xbf16>
    tpu.vector_store %arg14[%c256_153, %c0_154], %150 {strides = array<i32>} : memref<288x256xbf16, #tpu.memory_space<vmem>>, vector<32x256xbf16>,
    %c0_155 = arith.constant 0 : index
    %c0_156 = arith.constant 0 : index
    %152 = vector.load %arg8[%c0_155, %c0_156] : memref<32x288xbf16, #tpu.memory_space<vmem>>, vector<32x288xbf16>
    %c0_157 = arith.constant 0 : index
    %c0_158 = arith.constant 0 : index
    %153 = vector.load %arg14[%c0_157, %c0_158] : memref<288x256xbf16, #tpu.memory_space<vmem>>, vector<288x256xbf16>
    %cst_159 = arith.constant dense<0.000000e+00> : vector<32x256xf32>
    %154 = tpu.matmul %152, %153, %cst_159 {dimension_numbers = #tpu.dot_dimension_numbers<[1], [0], [0], [1], [0, 0, 1, 1], [], []>} : vector<32x288xbf16>, vector<288x256xbf16>, vector<32x256xf32> -> vector<32x256xf32>
    %c0_160 = arith.constant 0 : index
    %c0_161 = arith.constant 0 : index
    %155 = vector.load %arg9[%c0_160, %c0_161] : memref<32x1xf32, #tpu.memory_space<vmem>>, vector<32x1xf32>
    %156 = vector.broadcast %155 : vector<32x1xf32> to vector<32x256xf32>
    %157 = arith.addf %154, %156 : vector<32x256xf32>
    %158 = arith.addf %157, %55 : vector<32x256xf32>
    %cst_162 = arith.constant 0.000000e+00 : f32
    %159 = vector.broadcast %cst_162 : f32 to vector<32x256xf32>
    %160 = arith.maximumf %158, %159 : vector<32x256xf32>
    %161 = arith.truncf %160 : vector<32x256xf32> to vector<32x256xbf16>
    %c0_163 = arith.constant 0 : index
    %c128_164 = arith.constant 128 : index
    %162 = vector.load %arg13[%c0_163, %c128_164] : memref<32x512xbf16, #tpu.memory_space<vmem>>, vector<32x256xbf16>
    tpu.vector_store %arg13[%c0_163, %c128_164], %161 {strides = array<i32>} : memref<32x512xbf16, #tpu.memory_space<vmem>>, vector<32x256xbf16>,
    %c0_165 = arith.constant 0 : index
    %c111_166 = arith.constant 111 : index
    %163 = vector.load %arg13[%c0_165, %c111_166] : memref<32x512xbf16, #tpu.memory_space<vmem>>, vector<32x256xbf16>
    %c0_167 = arith.constant 0 : index
    %c0_168 = arith.constant 0 : index
    %164 = vector.load %arg2[%c0_167, %c0_168] : memref<9x256xbf16, #tpu.memory_space<vmem>>, vector<1x256xbf16>
    %165 = vector.broadcast %164 : vector<1x256xbf16> to vector<32x256xbf16>
    %166 = arith.mulf %163, %165 : vector<32x256xbf16>
    %c0_169 = arith.constant 0 : index
    %c0_170 = arith.constant 0 : index
    %167 = vector.load %arg14[%c0_169, %c0_170] : memref<288x256xbf16, #tpu.memory_space<vmem>>, vector<32x256xbf16>
    tpu.vector_store %arg14[%c0_169, %c0_170], %166 {strides = array<i32>} : memref<288x256xbf16, #tpu.memory_space<vmem>>, vector<32x256xbf16>,
    %c0_171 = arith.constant 0 : index
    %c112_172 = arith.constant 112 : index
    %168 = vector.load %arg13[%c0_171, %c112_172] : memref<32x512xbf16, #tpu.memory_space<vmem>>, vector<32x256xbf16>
    %c1_173 = arith.constant 1 : index
    %c0_174 = arith.constant 0 : index
    %169 = vector.load %arg2[%c1_173, %c0_174] : memref<9x256xbf16, #tpu.memory_space<vmem>>, vector<1x256xbf16>
    %170 = vector.broadcast %169 : vector<1x256xbf16> to vector<32x256xbf16>
    %171 = arith.mulf %168, %170 : vector<32x256xbf16>
    %c32_175 = arith.constant 32 : index
    %c0_176 = arith.constant 0 : index
    %172 = vector.load %arg14[%c32_175, %c0_176] : memref<288x256xbf16, #tpu.memory_space<vmem>>, vector<32x256xbf16>
    tpu.vector_store %arg14[%c32_175, %c0_176], %171 {strides = array<i32>} : memref<288x256xbf16, #tpu.memory_space<vmem>>, vector<32x256xbf16>,
    %c0_177 = arith.constant 0 : index
    %c113_178 = arith.constant 113 : index
    %173 = vector.load %arg13[%c0_177, %c113_178] : memref<32x512xbf16, #tpu.memory_space<vmem>>, vector<32x256xbf16>
    %c2_179 = arith.constant 2 : index
    %c0_180 = arith.constant 0 : index
    %174 = vector.load %arg2[%c2_179, %c0_180] : memref<9x256xbf16, #tpu.memory_space<vmem>>, vector<1x256xbf16>
    %175 = vector.broadcast %174 : vector<1x256xbf16> to vector<32x256xbf16>
    %176 = arith.mulf %173, %175 : vector<32x256xbf16>
    %c64_181 = arith.constant 64 : index
    %c0_182 = arith.constant 0 : index
    %177 = vector.load %arg14[%c64_181, %c0_182] : memref<288x256xbf16, #tpu.memory_space<vmem>>, vector<32x256xbf16>
    tpu.vector_store %arg14[%c64_181, %c0_182], %176 {strides = array<i32>} : memref<288x256xbf16, #tpu.memory_space<vmem>>, vector<32x256xbf16>,
    %c0_183 = arith.constant 0 : index
    %c127_184 = arith.constant 127 : index
    %178 = vector.load %arg13[%c0_183, %c127_184] : memref<32x512xbf16, #tpu.memory_space<vmem>>, vector<32x256xbf16>
    %c3_185 = arith.constant 3 : index
    %c0_186 = arith.constant 0 : index
    %179 = vector.load %arg2[%c3_185, %c0_186] : memref<9x256xbf16, #tpu.memory_space<vmem>>, vector<1x256xbf16>
    %180 = vector.broadcast %179 : vector<1x256xbf16> to vector<32x256xbf16>
    %181 = arith.mulf %178, %180 : vector<32x256xbf16>
    %c96_187 = arith.constant 96 : index
    %c0_188 = arith.constant 0 : index
    %182 = vector.load %arg14[%c96_187, %c0_188] : memref<288x256xbf16, #tpu.memory_space<vmem>>, vector<32x256xbf16>
    tpu.vector_store %arg14[%c96_187, %c0_188], %181 {strides = array<i32>} : memref<288x256xbf16, #tpu.memory_space<vmem>>, vector<32x256xbf16>,
    %c0_189 = arith.constant 0 : index
    %c128_190 = arith.constant 128 : index
    %183 = vector.load %arg13[%c0_189, %c128_190] : memref<32x512xbf16, #tpu.memory_space<vmem>>, vector<32x256xbf16>
    %c128_191 = arith.constant 128 : index
    %c0_192 = arith.constant 0 : index
    %184 = vector.load %arg14[%c128_191, %c0_192] : memref<288x256xbf16, #tpu.memory_space<vmem>>, vector<32x256xbf16>
    tpu.vector_store %arg14[%c128_191, %c0_192], %183 {strides = array<i32>} : memref<288x256xbf16, #tpu.memory_space<vmem>>, vector<32x256xbf16>,
    %c0_193 = arith.constant 0 : index
    %c129_194 = arith.constant 129 : index
    %185 = vector.load %arg13[%c0_193, %c129_194] : memref<32x512xbf16, #tpu.memory_space<vmem>>, vector<32x256xbf16>
    %c5_195 = arith.constant 5 : index
    %c0_196 = arith.constant 0 : index
    %186 = vector.load %arg2[%c5_195, %c0_196] : memref<9x256xbf16, #tpu.memory_space<vmem>>, vector<1x256xbf16>
    %187 = vector.broadcast %186 : vector<1x256xbf16> to vector<32x256xbf16>
    %188 = arith.mulf %185, %187 : vector<32x256xbf16>
    %c160_197 = arith.constant 160 : index
    %c0_198 = arith.constant 0 : index
    %189 = vector.load %arg14[%c160_197, %c0_198] : memref<288x256xbf16, #tpu.memory_space<vmem>>, vector<32x256xbf16>
    tpu.vector_store %arg14[%c160_197, %c0_198], %188 {strides = array<i32>} : memref<288x256xbf16, #tpu.memory_space<vmem>>, vector<32x256xbf16>,
    %c0_199 = arith.constant 0 : index
    %c143_200 = arith.constant 143 : index
    %190 = vector.load %arg13[%c0_199, %c143_200] : memref<32x512xbf16, #tpu.memory_space<vmem>>, vector<32x256xbf16>
    %c6_201 = arith.constant 6 : index
    %c0_202 = arith.constant 0 : index
    %191 = vector.load %arg2[%c6_201, %c0_202] : memref<9x256xbf16, #tpu.memory_space<vmem>>, vector<1x256xbf16>
    %192 = vector.broadcast %191 : vector<1x256xbf16> to vector<32x256xbf16>
    %193 = arith.mulf %190, %192 : vector<32x256xbf16>
    %c192_203 = arith.constant 192 : index
    %c0_204 = arith.constant 0 : index
    %194 = vector.load %arg14[%c192_203, %c0_204] : memref<288x256xbf16, #tpu.memory_space<vmem>>, vector<32x256xbf16>
    tpu.vector_store %arg14[%c192_203, %c0_204], %193 {strides = array<i32>} : memref<288x256xbf16, #tpu.memory_space<vmem>>, vector<32x256xbf16>,
    %c0_205 = arith.constant 0 : index
    %c144_206 = arith.constant 144 : index
    %195 = vector.load %arg13[%c0_205, %c144_206] : memref<32x512xbf16, #tpu.memory_space<vmem>>, vector<32x256xbf16>
    %c7_207 = arith.constant 7 : index
    %c0_208 = arith.constant 0 : index
    %196 = vector.load %arg2[%c7_207, %c0_208] : memref<9x256xbf16, #tpu.memory_space<vmem>>, vector<1x256xbf16>
    %197 = vector.broadcast %196 : vector<1x256xbf16> to vector<32x256xbf16>
    %198 = arith.mulf %195, %197 : vector<32x256xbf16>
    %c224_209 = arith.constant 224 : index
    %c0_210 = arith.constant 0 : index
    %199 = vector.load %arg14[%c224_209, %c0_210] : memref<288x256xbf16, #tpu.memory_space<vmem>>, vector<32x256xbf16>
    tpu.vector_store %arg14[%c224_209, %c0_210], %198 {strides = array<i32>} : memref<288x256xbf16, #tpu.memory_space<vmem>>, vector<32x256xbf16>,
    %c0_211 = arith.constant 0 : index
    %c145_212 = arith.constant 145 : index
    %200 = vector.load %arg13[%c0_211, %c145_212] : memref<32x512xbf16, #tpu.memory_space<vmem>>, vector<32x256xbf16>
    %c8_213 = arith.constant 8 : index
    %c0_214 = arith.constant 0 : index
    %201 = vector.load %arg2[%c8_213, %c0_214] : memref<9x256xbf16, #tpu.memory_space<vmem>>, vector<1x256xbf16>
    %202 = vector.broadcast %201 : vector<1x256xbf16> to vector<32x256xbf16>
    %203 = arith.mulf %200, %202 : vector<32x256xbf16>
    %c256_215 = arith.constant 256 : index
    %c0_216 = arith.constant 0 : index
    %204 = vector.load %arg14[%c256_215, %c0_216] : memref<288x256xbf16, #tpu.memory_space<vmem>>, vector<32x256xbf16>
    tpu.vector_store %arg14[%c256_215, %c0_216], %203 {strides = array<i32>} : memref<288x256xbf16, #tpu.memory_space<vmem>>, vector<32x256xbf16>,
    %c0_217 = arith.constant 0 : index
    %c0_218 = arith.constant 0 : index
    %205 = vector.load %arg10[%c0_217, %c0_218] : memref<128x288xbf16, #tpu.memory_space<vmem>>, vector<128x288xbf16>
    %c0_219 = arith.constant 0 : index
    %c0_220 = arith.constant 0 : index
    %206 = vector.load %arg14[%c0_219, %c0_220] : memref<288x256xbf16, #tpu.memory_space<vmem>>, vector<288x256xbf16>
    %cst_221 = arith.constant dense<0.000000e+00> : vector<128x256xf32>
    %207 = tpu.matmul %205, %206, %cst_221 {dimension_numbers = #tpu.dot_dimension_numbers<[1], [0], [0], [1], [0, 0, 1, 1], [], []>} : vector<128x288xbf16>, vector<288x256xbf16>, vector<128x256xf32> -> vector<128x256xf32>
    %c0_222 = arith.constant 0 : index
    %c0_223 = arith.constant 0 : index
    %208 = vector.load %arg11[%c0_222, %c0_223] : memref<128x1xf32, #tpu.memory_space<vmem>>, vector<128x1xf32>
    %209 = vector.broadcast %208 : vector<128x1xf32> to vector<128x256xf32>
    %210 = arith.addf %207, %209 : vector<128x256xf32>
    %cst_224 = arith.constant 0.000000e+00 : f32
    %211 = vector.broadcast %cst_224 : f32 to vector<128x256xf32>
    %212 = arith.maximumf %210, %211 : vector<128x256xf32>
    %c0_225 = arith.constant 0 : index
    %c0_226 = arith.constant 0 : index
    %213 = vector.load %arg3[%c0_225, %c0_226] : memref<1x256xf32, #tpu.memory_space<vmem>>, vector<1x256xf32>
    %cst_227 = arith.constant dense<0.000000e+00> : vector<1x128xf32>
    %214 = tpu.matmul %213, %212, %cst_227 {dimension_numbers = #tpu.dot_dimension_numbers<[1], [1], [0], [0], [0, 0, 1, 0], [], []>} : vector<1x256xf32>, vector<128x256xf32>, vector<1x128xf32> -> vector<1x128xf32>
    %c0_228 = arith.constant 0 : index
    %c0_229 = arith.constant 0 : index
    %c0_230 = arith.constant 0 : index
    %215 = vector.load %arg12[%c0_228, %c0_229, %c0_230] : memref<1x1x128xf32, #tpu.memory_space<vmem>>, vector<1x1x128xf32>
    %216 = vector.shape_cast %215 : vector<1x1x128xf32> to vector<1x128xf32>
    %217 = vector.shape_cast %214 : vector<1x128xf32> to vector<1x1x128xf32>
    tpu.vector_store %arg12[%c0_228, %c0_229, %c0_230], %217 {strides = array<i32>} : memref<1x1x128xf32, #tpu.memory_space<vmem>>, vector<1x1x128xf32>,
    return
  }
  func.func @transform_0(%arg0: i32) -> (i32, i32, i32) {
    %c0_i32 = arith.constant 0 : i32
    %c0_i32_0 = arith.constant 0 : i32
    %c0_i32_1 = arith.constant 0 : i32
    return %arg0, %c0_i32, %c0_i32_0 : i32, i32, i32
  }
  func.func @transform_1(%arg0: i32) -> (i32, i32) {
    %c0_i32 = arith.constant 0 : i32
    %c0_i32_0 = arith.constant 0 : i32
    %c0_i32_1 = arith.constant 0 : i32
    return %c0_i32, %c0_i32_0 : i32, i32
  }
  func.func @transform_2(%arg0: i32) -> (i32, i32) {
    %c0_i32 = arith.constant 0 : i32
    %c0_i32_0 = arith.constant 0 : i32
    %c0_i32_1 = arith.constant 0 : i32
    return %c0_i32, %c0_i32_0 : i32, i32
  }
  func.func @transform_3(%arg0: i32) -> (i32, i32) {
    %c0_i32 = arith.constant 0 : i32
    %c0_i32_0 = arith.constant 0 : i32
    %c0_i32_1 = arith.constant 0 : i32
    return %c0_i32, %c0_i32_0 : i32, i32
  }
  func.func @transform_4(%arg0: i32) -> (i32, i32) {
    %c0_i32 = arith.constant 0 : i32
    %c0_i32_0 = arith.constant 0 : i32
    %c0_i32_1 = arith.constant 0 : i32
    return %c0_i32, %c0_i32_0 : i32, i32
  }
  func.func @transform_5(%arg0: i32) -> (i32, i32) {
    %c0_i32 = arith.constant 0 : i32
    %c0_i32_0 = arith.constant 0 : i32
    %c0_i32_1 = arith.constant 0 : i32
    return %c0_i32, %c0_i32_0 : i32, i32
  }
  func.func @transform_6(%arg0: i32) -> (i32, i32) {
    %c0_i32 = arith.constant 0 : i32
    %c0_i32_0 = arith.constant 0 : i32
    %c0_i32_1 = arith.constant 0 : i32
    return %c0_i32, %c0_i32_0 : i32, i32
  }
  func.func @transform_7(%arg0: i32) -> (i32, i32) {
    %c0_i32 = arith.constant 0 : i32
    %c0_i32_0 = arith.constant 0 : i32
    %c0_i32_1 = arith.constant 0 : i32
    return %c0_i32, %c0_i32_0 : i32, i32
  }
  func.func @transform_8(%arg0: i32) -> (i32, i32) {
    %c0_i32 = arith.constant 0 : i32
    %c0_i32_0 = arith.constant 0 : i32
    %c0_i32_1 = arith.constant 0 : i32
    return %c0_i32, %c0_i32_0 : i32, i32
  }
  func.func @transform_9(%arg0: i32) -> (i32, i32) {
    %c0_i32 = arith.constant 0 : i32
    %c0_i32_0 = arith.constant 0 : i32
    %c0_i32_1 = arith.constant 0 : i32
    return %c0_i32, %c0_i32_0 : i32, i32
  }
  func.func @transform_10(%arg0: i32) -> (i32, i32) {
    %c0_i32 = arith.constant 0 : i32
    %c0_i32_0 = arith.constant 0 : i32
    %c0_i32_1 = arith.constant 0 : i32
    return %c0_i32, %c0_i32_0 : i32, i32
  }
  func.func @transform_11(%arg0: i32) -> (i32, i32, i32) {
    %c0_i32 = arith.constant 0 : i32
    %c0_i32_0 = arith.constant 0 : i32
    %c0_i32_1 = arith.constant 0 : i32
    return %arg0, %c0_i32, %c0_i32_0 : i32, i32, i32
  }
}

</mosaic_0001>

<bundles_post_ra>
// kernel: ccqnet1_forward.1
= control target key start
LH: loop header
LB: loop body
LE: loop exit
PB: predicated region body
PF: predicated region fallthrough
CT: control target
= control target key end

     0   :  { %s5624_s0 = inlined_call_operand.vmem [shape: bf16[2,8,256], index: 0, kind: input, shape index: {}]   ;;  %s5625_s1 = inlined_call_operand.vmem [shape: bf16[9,256], index: 1, kind: input, shape index: {}]   ;;  %s5626_s2 = inlined_call_operand.vmem [shape: f32[1,256], index: 2, kind: input, shape index: {}]   ;;  %s5627_s3 = inlined_call_operand.vmem [shape: bf16[32,72], index: 3, kind: input, shape index: {}]   ;;  %s5628_s4 = inlined_call_operand.vmem [shape: f32[32,1], index: 4, kind: input, shape index: {}]   ;;  %s5629_s5 = inlined_call_operand.vmem [shape: bf16[32,288], index: 5, kind: input, shape index: {}]   ;;  %s5630_s6 = inlined_call_operand.vmem [shape: f32[32,1], index: 6, kind: input, shape index: {}]   ;;  %s5631_s7 = inlined_call_operand.vmem [shape: bf16[32,288], index: 7, kind: input, shape index: {}]   ;;  %s5632_s8 = inlined_call_operand.vmem [shape: f32[32,1], index: 8, kind: input, shape index: {}]   ;;  %s5633_s9 = inlined_call_operand.vmem [shape: bf16[128,288], index: 9, kind: input, shape index: {}]   ;;  %s5634_s10 = inlined_call_operand.vmem [shape: f32[128,1], index: 10, kind: input, shape index: {}]   ;;  %s5635_s11 = inlined_call_operand.hbm [shape: f32[2,1,128], index: 11, kind: output, shape index: {}]  }
   0x1   :  { %5655 = sst [smem:[#allocation10_spill]] %s5624_s0 }
   0x2   :  { %5656 = sst [smem:[#allocation11_spill]] %s5627_s3 }
   0x3   :  { %5657 = sst [smem:[#allocation12_spill]] %s5628_s4 }
   0x4   :  { %5658 = sst [smem:[#allocation13_spill]] %s5629_s5 }
   0x5   :  { %5659 = sst [smem:[#allocation14_spill]] %s5630_s6 }
   0x6   :  { %16 = vsyncpa [#allocation5], 0 }
   0x7   :  { %18 = vsyncpa [#allocation5 + $0x1], 0  ;;  %s4483_s17 = smov 0   ;;  %s4485_s18 = smov 0  }
   0x8   :  { %s4487_s19 = smov 0   ;;  %s4489_s20 = smov 0  }
   0x9 LB: > { %5660 = sst [smem:[#allocation7_spill]] %s4407_s19  ;;  %s4504_s21 = sadd.s32 4294967295, %s4411_s20   ;;  %s4411_s20 = sphi %s4489_s20, %s5678_s20   ;;  %s4407_s19 = sphi %s4487_s19, %s5680_s19   ;;  %s4403_s18 = sphi %s4485_s18, %s5682_s18   ;;  %s4399_s17 = sphi %s4483_s17, %s5681_s17  }
   0xa   : > { %s3924_s22 = sadd.s32 4294967294, %s4411_s20   ;;  %s4508_s23 = sadd.s32 1, %s4411_s20  }
   0xb   : > { %5661 = sst [smem:[#allocation8_spill]] %s4508_s23  ;;  %s267_s24 = sadd.s32 1, %s4407_s19 }
   0xc   : > { %s264_s25 = ssub.s32 %s4411_s20, %s4508_s23  ;;  %p277_p0 = scmp.ne.s32.totalorder %s4407_s19, %s4403_s18 }
   0xd   : > { %p265_p1 = scmp.eq.s32.totalorder %s264_s25, 0  ;;  %p278_p2 = scmp.eq.s32.totalorder %s4504_s21, 1 }
   0xe   : > { %p283_p3 = scmp.ne.s32.totalorder %s4403_s18, %s4399_s17  ;;  %p284_p4 = scmp.eq.s32.totalorder %s3924_s22, 1 }
   0xf   : > { %s4519_s26 = scalar_select %p265_p1, %s4407_s19, %s267_s24  }
  0x10   : > { %p4521_p5 = por %p278_p2, %p277_p0  ;;  %p4525_p6 = por %p284_p4, %p283_p3 }
  0x11   : > { %5662 = sst [smem:[#allocation9_spill]] %s4519_s26  ;;  %p3927_p7 = scmp.ge.s32.totalorder %s4411_s20, 1 }
  0x12   : > { %p340_p8 = scmp.lt.s32.totalorder %s4411_s20, 3 }
  0x14   : > { %p341_p9 = pnand %p3927_p7, %p340_p8 }
  0x15   : > { %v402_v0 = vld [vmem:[%s5625_s1] sm:$0x11] (!%p341_p9)  ;;  %v411_v1 = vlaneseq (!%p341_p9)  ;;  %v566_v7 = vld [vmem:[%s5625_s1] sm:$0x22] (!%p341_p9)  ;;  %v628_v18 = vld [vmem:[%s5625_s1] sm:$0x44] (!%p341_p9) }
  0x16   : > { %344 = sbr.rel (%p341_p9) target bundleno = 2115 (0x843), region = 64  ;;  %v455_v2 = vld [vmem:[%s5625_s1] sm:$0x11] (!%p341_p9)  ;;  %v3932_v3 = vcombine.low (!%p341_p9), %v402_v0, %v402_v0  ;;  %v3933_v4 = vcombine.high (!%p341_p9), %v402_v0, %v402_v0  ;;  %v3939_v9 = vcombine.high (!%p341_p9), %v566_v7, %v566_v7  ;;  %v3938_v10 = vcombine.low (!%p341_p9), %v566_v7, %v566_v7  ;;  %v513_v17 = vld [vmem:[%s5625_s1] sm:$0x22] (!%p341_p9)  ;;  %p379_p10 = scmp.lt.s32.totalorder (!%p341_p9), %s4504_s21, 1 }
  0x17   : > { %v3934_v5 = vcombine.low (!%p341_p9), %v455_v2, %v455_v2  ;;  %v3935_v6 = vcombine.high (!%p341_p9), %v455_v2, %v455_v2  ;;  %v4540_v8 = vshrl.u32 (!%p341_p9), %v411_v1, 7  ;;  %v3937_v24 = vcombine.high (!%p341_p9), %v513_v17, %v513_v17  ;;  %v735_v25 = vld [vmem:[%s5625_s1] sm:$0x88] (!%p341_p9)  ;;  %s5650_s13 = smov (!%p341_p9), 111   ;;  %s5648_s14 = smov (!%p341_p9), 112  }
  0x18   : > { %v409_v11 = vpack.i.b16 (!%p341_p9), %v3932_v3, %v3932_v3  ;;  %v416_v15 = vpack.i.b16 (!%p341_p9), %v3933_v4, %v3933_v4  ;;  %v581_v16 = vshrl.u32 (!%p341_p9), %v3939_v9, 16  ;;  %v573_v21 = vshrl.u32 (!%p341_p9), %v3938_v10, 16  ;;  %s5665_s0 = sld [smem:[#allocation10_spill]] (!%p341_p9)  ;;  %s5644_s25 = smov (!%p341_p9), 127   ;;  %v684_v51 = vld [vmem:[%s5625_s1] sm:$0x88] (!%p341_p9) }
  0x19   : > { %v462_v12 = vshrl.u32 (!%p341_p9), %v3934_v5, 16  ;;  %v470_v13 = vshrl.u32 (!%p341_p9), %v3935_v6, 16  ;;  %v4543_v14 = vsub.s32 (!%p341_p9), 0, %v4540_v8  ;;  %v4561_v27 = vsub.s32 (!%p341_p9), 1, %v4540_v8  ;;  %v791_v54 = vld [vmem:[%s5625_s1 + $0x8] sm:$0x11] (!%p341_p9) }
  0x1a   : > { %v582_v28 = vpack.i.b16 (!%p341_p9), %v581_v16, %v581_v16  ;;  %v3941_v29 = vcombine.high (!%p341_p9), %v628_v18, %v628_v18  ;;  %v574_v31 = vpack.i.b16 (!%p341_p9), %v573_v21, %v573_v21  ;;  %v3936_v32 = vcombine.low (!%p341_p9), %v513_v17, %v513_v17  ;;  %s5646_s16 = smov (!%p341_p9), 113   ;;  %s5642_s22 = smov (!%p341_p9), 1  }
  0x1b   : > { %v463_v19 = vpack.i.b16 (!%p341_p9), %v462_v12, %v462_v12  ;;  %v471_v20 = vpack.i.b16 (!%p341_p9), %v470_v13, %v470_v13  ;;  %v414_v22 = vrot.slane (!%p341_p9), %v409_v11, %v4543_v14  ;;  %v421_v26 = vrot.slane (!%p341_p9), %v416_v15, %v4543_v14  ;;  %s5640_s29 = smov (!%p341_p9), 15   ;;  %s5636_s30 = smov (!%p341_p9), 17  }
  0x1c   : > { %v3940_v33 = vcombine.low (!%p341_p9), %v628_v18, %v628_v18  ;;  %v527_v34 = vpack.i.b16 (!%p341_p9), %v3937_v24, %v3937_v24  ;;  %v587_v36 = vrot.slane (!%p341_p9), %v582_v28, %v4561_v27  ;;  %v643_v37 = vshrl.u32 (!%p341_p9), %v3941_v29, 16  ;;  %s5666_s4 = sld [smem:[#allocation12_spill]] (!%p341_p9)  ;;  %s5675_s3 = sld [smem:[#allocation11_spill]] (!%p341_p9) }
  0x1d   : > { %v468_v23 = vrot.slane %v463_v19, %v4543_v14  ;;  %s380_s12 = scalar_select %p379_p10, %s4504_s21, 1  ;;  %424 = vrot.lane.b32.xlu1 %v414_v22, %s5650_s13  ;;  %v476_v30 = vrot.slane %v471_v20, %v4543_v14  ;;  %v3945_v38 = vcombine.high %v735_v25, %v735_v25  ;;  %v579_v39 = vrot.slane %v574_v31, %v4561_v27 }
  0x1e   : > { %v520_v40 = vpack.i.b16 %v3936_v32, %v3936_v32  ;;  %v635_v41 = vshrl.u32 %v3940_v33, 16  ;;  %v3944_v42 = vcombine.low %v735_v25, %v735_v25  ;;  %v532_v43 = vrot.slane %v527_v34, %v4561_v27  ;;  %s5676_s5 = sld [smem:[#allocation13_spill]]  ;;  %s5677_s6 = sld [smem:[#allocation14_spill]] }
  0x1f   : > { %479 = vrot.lane.b32.xlu0 %v468_v23, %s5648_s14  ;;  %s4052_s15 = sshll.u32 %s380_s12, 3  ;;  %v4574_v44 = vsub.s32 2, %v4540_v8  ;;  %v644_v45 = vpack.i.b16 %v643_v37, %v643_v37  ;;  %v750_v46 = vshrl.u32 %v3945_v38, 16  ;;  %v4416_v52 = vmov 0   ;;  %s5671_s12 = smov 1  }
  0x20   : > { %s383_s24 = scalar_lea.vmem %s5665_s0, %s4052_s15  ;;  %v525_v48 = vrot.slane %v520_v40, %v4561_v27  ;;  %v636_v49 = vpack.i.b16 %v635_v41, %v635_v41  ;;  %v742_v50 = vshrl.u32 %v3944_v42, 16  ;;  %385 = vst [vmem:[#allocation2] sm:$0xff] %v4416_v52  ;;  %387 = vst [vmem:[#allocation2 + $0x18] sm:$0xff] %v4416_v52  ;;  %933 = vmatprep.mubr.bf16.mxu0 %v4416_v52  ;;  %4230 = vset.pattern.permute.xlu1 %v4416_v52  ;;  %vm428_vm0 = vcmask 908288   ;;  %s5672_s15 = smov 15  }
  0x21   : > { %v389_v35 = vld [vmem:[%s383_s24] sm:$0xff]  ;;  %426 = vrot.lane.b32.xlu1 %v421_v26, %s5650_s13  ;;  %4229 = vset.pattern.permute.xlu0 %v4416_v52  ;;  %v649_v55 = vrot.slane %v644_v45, %v4574_v44  ;;  %v4593_v56 = vsub.s32 3, %v4540_v8  ;;  %v751_v57 = vpack.i.b16 %v750_v46, %v750_v46  ;;  %v3943_v58 = vcombine.high %v684_v51, %v684_v51  ;;  %s5638_s24 = smov 16   ;;  %s4049_s23 = sshll.u32 %s4504_s21, 4 }
  0x22   : > { %v3931_v47 = vcombine.high %v389_v35, %v389_v35  ;;  %v3930_v53 = vcombine.low %v389_v35, %v389_v35  ;;  %v641_v59 = vrot.slane %v636_v49, %v4574_v44  ;;  %v743_v60 = vpack.i.b16 %v742_v50, %v742_v50  ;;  %s4422_s21 = smov [#allocation4]  }
  0x23   : > { %481 = vrot.lane.b32.xlu0 %v476_v30, %s5648_s14  ;;  %v3942_v61 = vcombine.low %v684_v51, %v684_v51  ;;  %v756_v62 = vrot.slane %v751_v57, %v4593_v56  ;;  %v698_v63 = vpack.i.b16 %v3943_v58, %v3943_v58  ;;  %v3947_v0 = vcombine.high %v791_v54, %v791_v54 }
  0x24   : > { %398 = vst [vmem:[#allocation2 + $0x10] sm:$0xf] %v3931_v47  ;;  %397 = vst [vmem:[#allocation2 + $0x8] sm:$0xf] %v3930_v53  ;;  %v748_v1 = vrot.slane %v743_v60, %v4593_v56  ;;  %v3946_v3 = vcombine.low %v791_v54, %v791_v54  ;;  %vm556_vm1 = vcmask 121856   ;;  %vm539_vm2 = vcmask 924672  }
  0x25   : > { %592 = vrot.lane.b32.xlu1 %v587_v36, %s5644_s25  ;;  %v691_v2 = vpack.i.b16 %v3942_v61, %v3942_v61  ;;  %v703_v4 = vrot.slane %v698_v63, %v4593_v56  ;;  %v805_v5 = vpack.i.b16 %v3947_v0, %v3947_v0  ;;  %vm483_vm3 = vcmask 916480  }
  0x26   : > { %v798_v7 = vpack.i.b16 %v3946_v3, %v3946_v3  ;;  %vm594_vm4 = vcmask 1039360   ;;  %vm614_vm5 = vcmask 7168   ;;  %vm503_vm6 = vcmask 130048  }
  0x27   : > { %590 = vrot.lane.b32.xlu0 %v579_v39, %s5644_s25  ;;  %v696_v6 = vrot.slane %v691_v2, %v4593_v56  ;;  %v810_v8 = vrot.slane %v805_v5, %v4543_v14  ;;  %v399_v10 = vld [vmem:[#allocation2] sm:$0xf]  ;;  %v683_v32 = vld [vmem:[#allocation2 + $0x18] sm:$0xf]  ;;  %vm445_vm7 = vcmask 138240   ;;  %vm894_vm8 = vcmask 1043456  }
  0x28   : > { %v803_v9 = vrot.slane %v798_v7, %v4543_v14  ;;  %v510_v22 = vld [vmem:[#allocation2] sm:$0xf]  ;;  %vm887_vm9 = vcmask 588800   ;;  %vm1660_vm10 = vcmask 261120  }
  0x29   : > { %537 = vrot.lane.b32.xlu1 %v532_v43, %s5646_s16  ;;  %v452_v50 = vld [vmem:[#allocation2] sm:$0xf] }
  0x2b   : > { %535 = vrot.lane.b32.xlu0 %v525_v48, %s5646_s16  ;;  %v401_v15 = vld [vmem:[#allocation2 + $0x10] sm:$0xf]  ;;  %v681_v33 = vld [vmem:[#allocation2 + $0x8] sm:$0xf] }
  0x2c   : > { %v512_v21 = vld [vmem:[#allocation2 + $0x10] sm:$0xf]  ;;  %v400_v39 = vld [vmem:[#allocation2 + $0x8] sm:$0xf] }
  0x2d   : > { %654 = vrot.lane.b32.xlu1 %v649_v55, %s5642_s22  ;;  %v454_v40 = vld [vmem:[#allocation2 + $0x10] sm:$0xf]  ;;  %v625_v47 = vld [vmem:[#allocation2 + $0x8] sm:$0xf]  ;;  %v734_v55 = vld [vmem:[#allocation2 + $0x18] sm:$0xf] }
  0x2e   : > { %v682_v42 = vld [vmem:[#allocation2 + $0x10] sm:$0xf]  ;;  %v511_v49 = vld [vmem:[#allocation2 + $0x8] sm:$0xf] }
  0x2f   : > { %652 = vrot.lane.b32.xlu0 %v641_v59, %s5642_s22  ;;  %v565_v58 = vld [vmem:[#allocation2 + $0x10] sm:$0xf]  ;;  %v453_v0 = vld [vmem:[#allocation2 + $0x8] sm:$0xf] }
  0x31   : > { %761 = vrot.lane.b32.xlu1 %v756_v62, %s5638_s24 }
  0x33   : > { %759 = vrot.lane.b32.xlu0 %v748_v1, %s5638_s24  ;;  %v563_v1 = vld [vmem:[#allocation2] sm:$0xf] }
  0x35   : > { %708 = vrot.lane.b32.xlu1 %v703_v4, %s5640_s29  ;;  %v564_v4 = vld [vmem:[#allocation2 + $0x8] sm:$0xf] }
  0x37   : > { %706 = vrot.lane.b32.xlu0 %v696_v6, %s5640_s29 }
  0x39   : > { %815 = vrot.lane.b32.xlu1 %v810_v8, %s5636_s30  ;;  %v622_v8 = vld [vmem:[#allocation2 + $0x10] sm:$0xf] }
  0x3a   : > { %624 = vst [vmem:[#allocation3 + $0x28] sm:$0xf] %v622_v8 }
  0x3b   : > { %813 = vrot.lane.b32.xlu0 %v803_v9, %s5636_s30  ;;  %v621_v9 = vld [vmem:[#allocation2 + $0x8] sm:$0xf] }
  0x3c   : > { %623 = vst [vmem:[#allocation3 + $0x20] sm:$0xf] %v621_v9 }
  0x8f   : > { %v425_v11 = vpop.permute.xlu1 %424 }
  0x90   : > { %v433_v12 = vmul.bf16 %v425_v11, %v399_v10  ;;  %v627_v10 = vld [vmem:[#allocation2 + $0x18] sm:$0xf] }
  0x91   : > { %v480_v13 = vpop.permute.xlu0 %479 }
  0x92   : > { %439 = vrot.lane.b32.xlu0 %v433_v12, %s5636_s30  ;;  %v488_v54 = vmul.bf16 %v480_v13, %v452_v50  ;;  %v1122_v50 = vld [vmem:[%s5625_s1] sm:$0x22] }
  0x93   : > { %v427_v16 = vpop.permute.xlu1 %426 }
  0x94   : > { %v435_v17 = vmul.bf16 %v427_v16, %v401_v15  ;;  %v429_v37 = vsel %vm428_vm0, %v425_v11, %v427_v16  ;;  %v494_v63 = vrot.slane %v488_v54, 4  ;;  %v3958_v54 = vcombine.high %v1122_v50, %v1122_v50 }
  0x95   : > { %v482_v18 = vpop.permute.xlu0 %481  ;;  %v434_v43 = vmul.bf16 %v429_v37, %v400_v39  ;;  %v789_v37 = vld [vmem:[#allocation2 + $0x10] sm:$0xf]  ;;  %v854_v39 = vld [vmem:[%s5666_s4 + $0x8] sm:$0xff] }
  0x96   : > { %443 = vrot.lane.b32.xlu1 %v435_v17, %s5636_s30  ;;  %v490_v45 = vmul.bf16 %v482_v18, %v454_v40  ;;  %v484_v61 = vsel %vm483_vm3, %v480_v13, %v482_v18  ;;  %v626_v17 = vld [vmem:[#allocation2 + $0x10] sm:$0xf]  ;;  %v853_v40 = vld [vmem:[%s5666_s4] sm:$0xff] }
  0x97   : > { %v4613_v19 = vpop.permute.xlu1 %592  ;;  %v489_v3 = vmul.bf16 %v484_v61, %v453_v0 }
  0x98   : > { %v496_v57 = vrot.slane %v490_v45, 4  ;;  %v601_v62 = vmul.bf16 %v4613_v19, %v565_v58  ;;  %v856_v45 = vld [vmem:[%s5666_s4 + $0x18] sm:$0xff] }
  0x99   : > { %v4615_v20 = vpop.permute.xlu0 %590  ;;  %v495_v11 = vrot.slane %v489_v3, 4 }
  0x9a   : > { %v595_v5 = vsel %vm594_vm4, %v4615_v20, %v4613_v19  ;;  %v599_v6 = vmul.bf16 %v4615_v20, %v563_v1  ;;  %v607_v7 = vrot.slane %v601_v62, 4  ;;  %v788_v20 = vld [vmem:[#allocation2 + $0x8] sm:$0xf] }
  0x9b   : > { %v538_v23 = vpop.permute.xlu1 %537  ;;  %v600_v12 = vmul.bf16 %v595_v5, %v564_v4 }
  0x9c   : > { %v546_v24 = vmul.bf16 %v538_v23, %v512_v21  ;;  %v605_v16 = vrot.slane %v599_v6, 4  ;;  %v1136_v6 = vpack.i.b16 %v3958_v54, %v3958_v54 }
  0x9d   : > { %v536_v25 = vpop.permute.xlu0 %535  ;;  %v606_v18 = vrot.slane %v600_v12, 4 }
  0x9e   : > { %v544_v26 = vmul.bf16 %v536_v25, %v510_v22  ;;  %554 = vrot.lane.b32.xlu1 %v546_v24, %s5640_s29  ;;  %v540_v46 = vsel %vm539_vm2, %v536_v25, %v538_v23  ;;  %v732_v22 = vld [vmem:[#allocation2 + $0x8] sm:$0xf]  ;;  %v733_v25 = vld [vmem:[#allocation2 + $0x10] sm:$0xf] }
  0x9f   : > { %v4618_v28 = vpop.permute.xlu1 %654  ;;  %v545_v53 = vmul.bf16 %v540_v46, %v511_v49 }
  0xa0   : > { %550 = vrot.lane.b32.xlu0 %v544_v26, %s5640_s29  ;;  %v662_v13 = vmul.bf16 %v4618_v28, %v627_v10 }
  0xa1   : > { %v4621_v29 = vpop.permute.xlu0 %652 }
  0xa2   : > { %v660_v51 = vmul.bf16 %v4621_v29, %v625_v47  ;;  %v656_v15 = vsel %vm614_vm5, %v4621_v29, %v4618_v28  ;;  %v668_v23 = vrot.slane %v662_v13, 4 }
  0xa3   : > { %v4623_v30 = vpop.permute.xlu1 %761  ;;  %v661_v21 = vmul.bf16 %v656_v15, %v626_v17  ;;  %v1141_v15 = vrot.slane %v1136_v6, %v4561_v27 }
  0xa4   : > { %v769_v59 = vmul.bf16 %v4623_v30, %v734_v55  ;;  %v666_v60 = vrot.slane %v660_v51, 4  ;;  %v1194_v51 = vld [vmem:[%s5625_s1] sm:$0x22] }
  0xa5   : > { %v4625_v31 = vpop.permute.xlu0 %759  ;;  %v667_v29 = vrot.slane %v661_v21, 4  ;;  %v3959_v55 = vcombine.low %v1194_v51, %v1194_v51 }
  0xa6   : > { %v775_v2 = vrot.slane %v769_v59, 4  ;;  %v763_v24 = vsel %vm503_vm6, %v4625_v31, %v4623_v30  ;;  %v767_v28 = vmul.bf16 %v4625_v31, %v732_v22 }
  0xa7   : > { %v709_v34 = vpop.permute.xlu1 %708  ;;  %v1201_v3 = vshrl.u32 %v3959_v55, 16 }
  0xa8   : > { %v716_v35 = vmul.bf16 %v709_v34, %v683_v32  ;;  %v768_v32 = vmul.bf16 %v763_v24, %v733_v25 }
  0xa9   : > { %v707_v36 = vpop.permute.xlu0 %706 }
  0xaa   : > { %v714_v38 = vmul.bf16 %v707_v36, %v681_v33  ;;  %v710_v41 = vsel %vm556_vm1, %v707_v36, %v709_v34  ;;  %724 = vrot.lane.b32.xlu0 %v716_v35, %s5646_s16  ;;  %v790_v34 = vld [vmem:[#allocation2 + $0x18] sm:$0xf]  ;;  %v773_v35 = vrot.slane %v767_v28, 4  ;;  %v774_v36 = vrot.slane %v768_v32, 4 }
  0xab   : > { %v715_v48 = vmul.bf16 %v710_v41, %v682_v42  ;;  %v816_v33 = vpop.permute.xlu1 %815  ;;  %v855_v41 = vld [vmem:[%s5666_s4 + $0x10] sm:$0xff]  ;;  %v976_v42 = vld [vmem:[%s5625_s1] sm:$0x11] }
  0xac   : > { %720 = vrot.lane.b32.xlu1 %v714_v38, %s5646_s16  ;;  %v823_v38 = vmul.bf16 %v816_v33, %v790_v34  ;;  %v3953_v46 = vcombine.low %v976_v42, %v976_v42  ;;  %v3954_v47 = vcombine.high %v976_v42, %v976_v42 }
  0xad   : > { %v814_v19 = vpop.permute.xlu0 %813 }
  0xae   : > { %441 = vrot.lane.b32.xlu0 %v434_v43, %s5636_s30  ;;  %v821_v26 = vmul.bf16 %v814_v19, %v788_v20  ;;  %v817_v30 = vsel %vm445_vm7, %v814_v19, %v816_v33  ;;  %v1048_v43 = vld [vmem:[%s5625_s1] sm:$0x11]  ;;  %v983_v58 = vpack.i.b16 %v3953_v46, %v3953_v46  ;;  %v990_v59 = vpack.i.b16 %v3954_v47, %v3954_v47  ;;  %v1422_v19 = vld [vmem:[%s5625_s1] sm:$0x88]  ;;  %s5674_s30 = smov 17  }
  0xaf   : > { %v822_v31 = vmul.bf16 %v817_v30, %v789_v37  ;;  %v3956_v49 = vcombine.high %v1048_v43, %v1048_v43  ;;  %v3965_v24 = vcombine.low %v1422_v19, %v1422_v19  ;;  %v3966_v28 = vcombine.high %v1422_v19, %v1422_v19 }
  0xb0   : > { %722 = vrot.lane.b32.xlu1 %v715_v48, %s5646_s16  ;;  %v3955_v48 = vcombine.low %v1048_v43, %v1048_v43  ;;  %v988_v62 = vrot.slane %v983_v58, %v4543_v14  ;;  %s5668_s16 = smov 112  }
  0xb1   : > { %v1063_v61 = vshrl.u32 %v3956_v49, 16  ;;  %v1437_v30 = vshrl.u32 %v3966_v28, 16 }
  0xb2   : > { %552 = vrot.lane.b32.xlu0 %v545_v53, %s5640_s29  ;;  %v3957_v53 = vcombine.low %v1122_v50, %v1122_v50  ;;  %s5670_s29 = smov 127  }
  0xb3   : > { %v1064_v1 = vpack.i.b16 %v1063_v61, %v1063_v61 }
  0xb4   : > { %501 = vrot.lane.b32.xlu1 %v496_v57, %s5638_s24  ;;  %v3960_v57 = vcombine.high %v1194_v51, %v1194_v51  ;;  %v1129_v5 = vpack.i.b16 %v3957_v53, %v3957_v53 }
  0xb5   : > { %v1069_v8 = vrot.slane %v1064_v1, %v4543_v14 }
  0xb6   : > { %669 = vrot.lane.b32.xlu0 %v666_v60, %s5644_s25  ;;  %v1055_v60 = vshrl.u32 %v3955_v48, 16  ;;  %v1134_v13 = vrot.slane %v1129_v5, %v4561_v27 }
  0xb8   : > { %497 = vrot.lane.b32.xlu1 %v494_v63, %s5638_s24  ;;  %v995_v63 = vrot.slane %v990_v59, %v4543_v14  ;;  %v1056_v0 = vpack.i.b16 %v1055_v60, %v1055_v60 }
  0xba   : > { %780 = vrot.lane.b32.xlu0 %v775_v2, %s5648_s14  ;;  %v1276_v2 = vld [vmem:[%s5625_s1] sm:$0x44]  ;;  %v1061_v4 = vrot.slane %v1056_v0, %v4543_v14 }
  0xbb   : > { %v3961_v9 = vcombine.low %v1276_v2, %v1276_v2  ;;  %v3962_v10 = vcombine.high %v1276_v2, %v1276_v2 }
  0xbc   : > { %612 = vrot.lane.b32.xlu1 %v607_v7, %s5642_s22  ;;  %v1209_v7 = vshrl.u32 %v3960_v57, 16 }
  0xbd   : > { %v1291_v17 = vshrl.u32 %v3962_v10, 16 }
  0xbe   : > { %499 = vrot.lane.b32.xlu0 %v495_v11, %s5638_s24  ;;  %v1202_v11 = vpack.i.b16 %v1201_v3, %v1201_v3  ;;  %v1210_v12 = vpack.i.b16 %v1209_v7, %v1209_v7  ;;  %s5673_s24 = smov 16  }
  0xc0   : > { %608 = vrot.lane.b32.xlu1 %v605_v16, %s5642_s22  ;;  %v1283_v16 = vshrl.u32 %v3961_v9, 16  ;;  %v1207_v20 = vrot.slane %v1202_v11, %v4561_v27  ;;  %v1215_v21 = vrot.slane %v1210_v12, %v4561_v27 }
  0xc2   : > { %610 = vrot.lane.b32.xlu0 %v606_v18, %s5642_s22  ;;  %v1350_v18 = vld [vmem:[%s5625_s1] sm:$0x88]  ;;  %s5669_s22 = smov 113   ;;  %v1284_v25 = vpack.i.b16 %v1283_v16, %v1283_v16 }
  0xc3   : > { %v3963_v22 = vcombine.low %v1350_v18, %v1350_v18 }
  0xc4   : > { %673 = vrot.lane.b32.xlu1 %v668_v23, %s5644_s25  ;;  %v3964_v23 = vcombine.high %v1350_v18, %v1350_v18  ;;  %v1289_v33 = vrot.slane %v1284_v25, %v4574_v44 }
  0xc6   : > { %671 = vrot.lane.b32.xlu0 %v667_v29, %s5644_s25  ;;  %s5667_s25 = smov 111   ;;  %v1357_v29 = vpack.i.b16 %v3963_v22, %v3963_v22  ;;  %v1364_v32 = vpack.i.b16 %v3964_v23, %v3964_v23 }
  0xc8   : > { %827 = vrot.lane.b32.xlu1 %v821_v26, %s5650_s13  ;;  %v1292_v26 = vpack.i.b16 %v1291_v17, %v1291_v17  ;;  %v1362_v37 = vrot.slane %v1357_v29, %v4593_v56 }
  0xca   : > { %776 = vrot.lane.b32.xlu0 %v773_v35, %s5648_s14  ;;  %v1297_v34 = vrot.slane %v1292_v26, %v4574_v44  ;;  %v1429_v35 = vshrl.u32 %v3965_v24, 16 }
  0xcc   : > { %778 = vrot.lane.b32.xlu1 %v774_v36, %s5648_s14  ;;  %v1496_v36 = vld [vmem:[%s5625_s1 + $0x8] sm:$0x11] }
  0xce   : > { %829 = vrot.lane.b32.xlu0 %v822_v31, %s5650_s13  ;;  %v3968_v31 = vcombine.high %v1496_v36, %v1496_v36 }
  0xd0   : > { %831 = vrot.lane.b32.xlu1 %v823_v38, %s5650_s13  ;;  %v3967_v38 = vcombine.low %v1496_v36, %v1496_v36  ;;  %v1510_v46 = vpack.i.b16 %v3968_v31, %v3968_v31  ;;  %s5584_s13 = scalar_lea.hbm %s5635_s11, %s4049_s23 }
  0xd2   : > { %859 = vperm.xlu0 %4229, %v853_v40   ;;  %v1430_v40 = vpack.i.b16 %v1429_v35, %v1429_v35  ;;  %v1503_v42 = vpack.i.b16 %v3967_v38, %v3967_v38  ;;  %v1515_v48 = vrot.slane %v1510_v46, %v4543_v14 }
  0xd4   : > { %864 = vperm.xlu1 %4230, %v854_v39   ;;  %v1369_v39 = vrot.slane %v1364_v32, %v4593_v56  ;;  %v1435_v43 = vrot.slane %v1430_v40, %v4593_v56  ;;  %v1508_v47 = vrot.slane %v1503_v42, %v4543_v14  ;;  %v4249_v40 = vld [vmem:[%s5675_s3] sm:$0xff]  }
  0xd6   : > { %874 = vperm.xlu0 %4229, %v856_v45  }
  0xd8   : > { %869 = vperm.xlu1 %4230, %v855_v41   ;;  %v1438_v41 = vpack.i.b16 %v1437_v30, %v1437_v30 }
  0xda   : > { %1000 = vrot.lane.b32.xlu0 %v995_v63, %s5667_s25  ;;  %v1443_v45 = vrot.slane %v1438_v41, %v4593_v56  ;;  %v4250_v41 = vld [vmem:[%s5675_s3 + $0x8] sm:$0xff]  }
  0xdc   : > { %998 = vrot.lane.b32.xlu1 %v988_v62, %s5667_s25 }
  0xde   : > { %1074 = vrot.lane.b32.xlu0 %v1069_v8, %s5668_s16 }
  0xe0   : > { %1072 = vrot.lane.b32.xlu1 %v1061_v4, %s5668_s16 }
  0xe2   : > { %1146 = vrot.lane.b32.xlu0 %v1141_v15, %s5669_s22 }
  0xe4   : > { %1144 = vrot.lane.b32.xlu1 %v1134_v13, %s5669_s22 }
  0xe6   : > { %1220 = vrot.lane.b32.xlu0 %v1215_v21, %s5670_s29 }
  0xe8   : > { %1218 = vrot.lane.b32.xlu1 %v1207_v20, %s5670_s29 }
  0xea   : > { %1302 = vrot.lane.b32.xlu0 %v1297_v34, %s5671_s12 }
  0xec   : > { %1300 = vrot.lane.b32.xlu1 %v1289_v33, %s5671_s12 }
  0xee   : > { %1374 = vrot.lane.b32.xlu0 %v1369_v39, %s5672_s15 }
  0xf0   : > { %1372 = vrot.lane.b32.xlu1 %v1362_v37, %s5672_s15 }
  0xf2   : > { %1448 = vrot.lane.b32.xlu0 %v1443_v45, %s5673_s24 }
  0xf4   : > { %1446 = vrot.lane.b32.xlu1 %v1435_v43, %s5673_s24 }
  0xf6   : > { %1520 = vrot.lane.b32.xlu0 %v1515_v48, %s5674_s30 }
  0xf8   : > { %1518 = vrot.lane.b32.xlu1 %v1508_v47, %s5674_s30 }
 0x104   : > { %v440_v49 = vpop.permute.xlu0 %439 }
 0x108   : > { %v444_v50 = vpop.permute.xlu1 %443 }
 0x110   : > { %v555_v53 = vpop.permute.xlu1 %554 }
 0x112   : > { %v551_v51 = vpop.permute.xlu0 %550 }
 0x11c   : > { %v725_v54 = vpop.permute.xlu0 %724 }
 0x11e   : > { %v721_v55 = vpop.permute.xlu1 %720 }
 0x120   : > { %v442_v57 = vpop.permute.xlu0 %441 }
 0x121   : > { %v446_v58 = vsel %vm445_vm7, %v440_v49, %v442_v57  ;;  %v447_v59 = vsel %vm445_vm7, %v442_v57, %v444_v50 }
 0x122   : > { %v723_v60 = vpop.permute.xlu1 %722  ;;  %450 = vst [vmem:[#allocation3] sm:$0xf] %v446_v58  ;;  %451 = vst [vmem:[#allocation3 + $0x8] sm:$0xf] %v447_v59 }
 0x123   : > { %v726_v61 = vsel %vm539_vm2, %v721_v55, %v723_v60  ;;  %v727_v62 = vsel %vm539_vm2, %v723_v60, %v725_v54 }
 0x124   : > { %730 = vst [vmem:[#allocation3 + $0x30] sm:$0xf] %v726_v61  ;;  %731 = vst [vmem:[#allocation3 + $0x38] sm:$0xf] %v727_v62  ;;  %v553_v63 = vpop.permute.xlu0 %552 }
 0x125   : > { %v557_v0 = vsel %vm556_vm1, %v551_v51, %v553_v63  ;;  %v558_v1 = vsel %vm556_vm1, %v553_v63, %v555_v53 }
 0x126   : > { %v502_v2 = vpop.permute.xlu1 %501  ;;  %561 = vst [vmem:[#allocation3 + $0x10] sm:$0xf] %v557_v0  ;;  %562 = vst [vmem:[#allocation3 + $0x18] sm:$0xf] %v558_v1 }
 0x128   : > { %v670_v3 = vpop.permute.xlu0 %669 }
 0x12a   : > { %v498_v4 = vpop.permute.xlu1 %497 }
 0x12c   : > { %v781_v5 = vpop.permute.xlu0 %780 }
 0x12e   : > { %v613_v6 = vpop.permute.xlu1 %612 }
 0x130   : > { %v500_v7 = vpop.permute.xlu0 %499 }
 0x131   : > { %v504_v8 = vsel %vm503_vm6, %v498_v4, %v500_v7  ;;  %v505_v9 = vsel %vm503_vm6, %v500_v7, %v502_v2 }
 0x132   : > { %v609_v10 = vpop.permute.xlu1 %608  ;;  %508 = vst [vmem:[#allocation3] sm:$0xf0] %v504_v8  ;;  %509 = vst [vmem:[#allocation3 + $0x8] sm:$0xf0] %v505_v9 }
 0x134   : > { %v611_v11 = vpop.permute.xlu0 %610 }
 0x135   : > { %v615_v12 = vsel %vm614_vm5, %v609_v10, %v611_v11  ;;  %v616_v13 = vsel %vm614_vm5, %v611_v11, %v613_v6 }
 0x136   : > { %v674_v15 = vpop.permute.xlu1 %673  ;;  %619 = vst [vmem:[#allocation3 + $0x10] sm:$0xf0] %v615_v12  ;;  %620 = vst [vmem:[#allocation3 + $0x18] sm:$0xf0] %v616_v13 }
 0x138   : > { %v672_v16 = vpop.permute.xlu0 %671 }
 0x139   : > { %v675_v17 = vsel %vm594_vm4, %v670_v3, %v672_v16  ;;  %v676_v18 = vsel %vm594_vm4, %v672_v16, %v674_v15  ;;  %v844_v20 = vld [vmem:[#allocation3 + $0x8] sm:$0xff]  ;;  %v843_v21 = vld [vmem:[#allocation3] sm:$0xff] }
 0x13a   : > { %v828_v19 = vpop.permute.xlu1 %827  ;;  %679 = vst [vmem:[#allocation3 + $0x20] sm:$0xf0] %v675_v17  ;;  %680 = vst [vmem:[#allocation3 + $0x28] sm:$0xf0] %v676_v18  ;;  %901 = vmatprep.subr.bf16.mxu0 %v844_v20 }
 0x13b   : > { %902 = vmatpush1.bf16.msra.mxu0 %v843_v21 }
 0x13c   : > { %v777_v22 = vpop.permute.xlu0 %776 }
 0x13d   : > { %v846_v24 = vld [vmem:[#allocation3 + $0x18] sm:$0xff]  ;;  %v845_v25 = vld [vmem:[#allocation3 + $0x10] sm:$0xff] }
 0x13e   : > { %v779_v23 = vpop.permute.xlu1 %778  ;;  %903 = vmatprep.subr.bf16.mxu0 %v846_v24 }
 0x13f   : > { %v782_v26 = vsel %vm483_vm3, %v777_v22, %v779_v23  ;;  %v783_v28 = vsel %vm483_vm3, %v779_v23, %v781_v5  ;;  %904 = vmatpush1.bf16.msra.mxu0 %v845_v25 }
 0x140   : > { %786 = vst [vmem:[#allocation3 + $0x30] sm:$0xf0] %v782_v26  ;;  %787 = vst [vmem:[#allocation3 + $0x38] sm:$0xf0] %v783_v28  ;;  %v830_v29 = vpop.permute.xlu0 %829 }
 0x141   : > { %v833_v32 = vsel %vm428_vm0, %v828_v19, %v830_v29  ;;  %v848_v34 = vld [vmem:[#allocation3 + $0x28] sm:$0xff]  ;;  %v847_v35 = vld [vmem:[#allocation3 + $0x20] sm:$0xff] }
 0x142   : > { %v832_v33 = vpop.permute.xlu1 %831  ;;  %837 = vst [vmem:[#allocation3 + $0x40] sm:$0xf] %v833_v32  ;;  %905 = vmatprep.subr.bf16.mxu0 %v848_v34 }
 0x143   : > { %v834_v30 = vsel %vm428_vm0, %v830_v29, %v832_v33  ;;  %906 = vmatpush1.bf16.msra.mxu0 %v847_v35 }
 0x144   : > { %838 = vst [vmem:[#allocation3 + $0x48] sm:$0xf] %v834_v30 }
 0x147   : > { %v850_v36 = vld [vmem:[#allocation3 + $0x38] sm:$0xff]  ;;  %v849_v37 = vld [vmem:[#allocation3 + $0x30] sm:$0xff] }
 0x148   : > { %907 = vmatprep.subr.bf16.mxu0 %v850_v36 }
 0x149   : > { %908 = vmatpush1.bf16.msra.mxu0 %v849_v37  ;;  %v851_v38 = vld [vmem:[#allocation3 + $0x40] sm:$0xf] }
 0x14a   : > { %v896_v39 = vsel %vm894_vm8, %v851_v38, 0 }
 0x14b   : > { %v852_v31 = vld [vmem:[#allocation3 + $0x48] sm:$0xf] }
 0x14c   : > { %3950 = vmatprep.subr.msk.bf16.mxu0 %vm894_vm8, %v852_v31 }
 0x14d   : > { %910 = vmatpush1.bf16.msra.mxu0 %v896_v39 }
 0x150   : > { %3951 = vmatmul.mubr.msk.bf16.vlgmr.msra.gmra.mrb[0].mxu0 %vm887_vm9, %v4249_v40 }
 0x151   : > { %943 = vmatprep.mubr.bf16.mxu0 %v4416_v52  ;;  %v860_v53 = vpop.permute.xlu0 %859 }
 0x153   : > { %v865_v42 = vpop.permute.xlu1 %864 }
 0x155   : > { %v875_v54 = vpop.permute.xlu0 %874 }
 0x157   : > { %v870_v43 = vpop.permute.xlu1 %869 }
 0x158   : > { %3952 = vmatmul.mubr.msk.bf16.gmra.mrb[4].mxu0 %vm887_vm9, %v4250_v41 }
 0x159   : > { %1752 = vmatprep.mubr.bf16.mxu0 %v4416_v52  ;;  %v1001_v57 = vpop.permute.xlu0 %1000 }
 0x15b   : > { %v999_v45 = vpop.permute.xlu1 %998 }
 0x15c   : > { %v1006_v47 = vmul.bf16 0, %v999_v45  ;;  %v1002_v9 = vsel %vm428_vm0, %v999_v45, %v1001_v57 }
 0x15d   : > { %v1075_v5 = vpop.permute.xlu0 %1074 }
 0x15e   : > { %1018 = vrot.lane.b32.xlu1 %v1006_v47, %s5674_s30  ;;  %1024 = vrot.lane.b32.xlu0 %v1006_v47, %s5674_s30 }
 0x15f   : > { %v1073_v46 = vpop.permute.xlu1 %1072 }
 0x160   : > { %v1080_v48 = vmul.bf16 0, %v1073_v46  ;;  %v1076_v16 = vsel %vm483_vm3, %v1073_v46, %v1075_v5 }
 0x161   : > { %v1147_v17 = vpop.permute.xlu0 %1146 }
 0x162   : > { %1092 = vrot.lane.b32.xlu1 %v1080_v48, %s5673_s24  ;;  %1098 = vrot.lane.b32.xlu0 %v1080_v48, %s5673_s24 }
 0x163   : > { %v1145_v49 = vpop.permute.xlu1 %1144 }
 0x164   : > { %v1152_v50 = vmul.bf16 0, %v1145_v49  ;;  %v1148_v24 = vsel %vm539_vm2, %v1145_v49, %v1147_v17 }
 0x165   : > { %v1221_v32 = vpop.permute.xlu0 %1220 }
 0x166   : > { %1164 = vrot.lane.b32.xlu1 %v1152_v50, %s5672_s15  ;;  %1170 = vrot.lane.b32.xlu0 %v1152_v50, %s5672_s15 }
 0x167   : > { %v1219_v52 = vpop.permute.xlu1 %1218 }
 0x168   : > { %v1226_v51 = vmul.bf16 0, %v1219_v52  ;;  %v1222_v35 = vsel %vm594_vm4, %v1219_v52, %v1221_v32 }
 0x169   : > { %v1303_v39 = vpop.permute.xlu0 %1302 }
 0x16a   : > { %1238 = vrot.lane.b32.xlu1 %v1226_v51, %s5671_s12  ;;  %1244 = vrot.lane.b32.xlu0 %v1226_v51, %s5671_s12  ;;  %v1310_v52 = vmul.bf16 0, %v1303_v39 }
 0x16b   : > { %v1301_v31 = vpop.permute.xlu1 %1300 }
 0x16f   : > { %v1373_v51 = vpop.permute.xlu1 %1372 }
 0x223   : > { %v935_v55 = vpop.f32.mrb[0].mxu0 }
 0x224   : > { %v4767_v58 = vadd.f32 %v935_v55, %v860_v53  ;;  %v937_v59 = vpop.f32.mrb[1].mxu0 }
 0x225   : > { %v4769_v60 = vadd.f32 %v937_v59, %v860_v53  ;;  %v939_v61 = vpop.f32.mrb[2].mxu0  ;;  %v1375_v53 = vpop.permute.xlu0 %1374 }
 0x226   : > { %v4771_v62 = vadd.f32 %v939_v61, %v865_v42  ;;  %v941_v63 = vpop.f32.mrb[3].mxu0  ;;  %v954_v1 = vmax.f32 %v4767_v58, 0.0  ;;  %v1382_v55 = vmul.bf16 0, %v1375_v53  ;;  %v1447_v59 = vpop.permute.xlu1 %1446 }
 0x227   : > { %v4773_v0 = vadd.f32 %v941_v63, %v865_v42  ;;  %v955_v3 = vmax.f32 %v4769_v60, 0.0  ;;  %v1304_v42 = vsel %vm614_vm5, %v1301_v31, %v1303_v39  ;;  %v1376_v63 = vsel %vm556_vm1, %v1373_v51, %v1375_v53  ;;  %v1795_v39 = vld [vmem:[%s5625_s1] sm:$0x11] }
 0x228   : > { %v956_v2 = vmax.f32 %v4771_v62, 0.0 }
 0x229   : > { %v957_v4 = vmax.f32 %v4773_v0, 0.0  ;;  %v1449_v61 = vpop.permute.xlu0 %1448 }
 0x22a   : > { %v4783_v6 = vpack.c.bf16 %v956_v2, %v954_v1 }
 0x22b   : > { %v4789_v7 = vpack.c.bf16 %v957_v4, %v955_v3  ;;  %v945_v8 = vpop.f32.mrb[4].mxu0 }
 0x22c   : > { %v947_v10 = vpop.f32.mrb[5].mxu0  ;;  %v1007_v11 = vmul.bf16 %v1002_v9, %v4783_v6  ;;  %v1081_v19 = vmul.bf16 %v1076_v16, %v4783_v6  ;;  %v4806_v23 = vadd.f32 %v945_v8, %v870_v43  ;;  %v1153_v26 = vmul.bf16 %v1148_v24, %v4783_v6 }
 0x22d   : > { %v949_v12 = vpop.f32.mrb[6].mxu0  ;;  %v1008_v13 = vmul.bf16 %v1001_v57, %v4789_v7  ;;  %v1082_v21 = vmul.bf16 %v1075_v5, %v4789_v7  ;;  %v4803_v22 = vadd.f32 %v947_v10, %v870_v43  ;;  %v1154_v29 = vmul.bf16 %v1147_v17, %v4789_v7  ;;  %v1519_v10 = vpop.permute.xlu1 %1518 }
 0x22e   : > { %v951_v15 = vpop.f32.mrb[7].mxu0  ;;  %1020 = vrot.lane.b32.xlu1 %v1007_v11, %s5674_s30  ;;  %v4800_v20 = vadd.f32 %v949_v12, %v875_v54  ;;  %v958_v34 = vmax.f32 %v4806_v23, 0.0  ;;  %v1227_v36 = vmul.bf16 %v1222_v35, %v4783_v6  ;;  %v1228_v38 = vmul.bf16 %v1221_v32, %v4789_v7  ;;  %v1521_v11 = vpop.permute.xlu0 %1520 }
 0x22f   : > { %1022 = vrot.lane.b32.xlu0 %v1008_v13, %s5674_s30  ;;  %v4797_v18 = vadd.f32 %v951_v15, %v875_v54  ;;  %v959_v33 = vmax.f32 %v4803_v22, 0.0  ;;  %v1309_v43 = vmul.bf16 %v1304_v42, %v4789_v7  ;;  %v1308_v48 = vmul.bf16 %v1301_v31, %v4783_v6 }
 0x230   : > { %v960_v28 = vmax.f32 %v4800_v20, 0.0  ;;  %v1380_v12 = vmul.bf16 %v1373_v51, %v4783_v6  ;;  %v1522_v13 = vsel %vm445_vm7, %v1519_v10, %v1521_v11 }
 0x231   : > { %v961_v25 = vmax.f32 %v4797_v18, 0.0  ;;  %v1527_v15 = vmul.bf16 %v1522_v13, %v4789_v7 }
 0x232   : > { %1094 = vrot.lane.b32.xlu1 %v1081_v19, %s5673_s24  ;;  %v4830_v37 = vpack.c.bf16 %v960_v28, %v958_v34 }
 0x233   : > { %1096 = vrot.lane.b32.xlu0 %v1082_v21, %s5673_s24  ;;  %v4823_v30 = vpack.c.bf16 %v961_v25, %v959_v33  ;;  %v1454_v21 = vmul.bf16 %v1447_v59, %v4783_v6 }
 0x234   : > { %v1010_v41 = vmul.bf16 %v1002_v9, %v4830_v37  ;;  %v1084_v45 = vmul.bf16 %v1076_v16, %v4830_v37  ;;  %v1156_v47 = vmul.bf16 %v1148_v24, %v4830_v37  ;;  %v1230_v49 = vmul.bf16 %v1222_v35, %v4830_v37 }
 0x235   : > { %v1011_v40 = vmul.bf16 %v1001_v57, %v4823_v30  ;;  %v1085_v46 = vmul.bf16 %v1075_v5, %v4823_v30  ;;  %v1157_v50 = vmul.bf16 %v1147_v17, %v4823_v30  ;;  %v1311_v54 = vmul.bf16 %v1301_v31, %v4830_v37  ;;  %v1867_v31 = vld [vmem:[%s5625_s1] sm:$0x11] }
 0x236   : > { %1166 = vrot.lane.b32.xlu1 %v1153_v26, %s5672_s15  ;;  %v1231_v57 = vmul.bf16 %v1221_v32, %v4823_v30  ;;  %v1381_v5 = vmul.bf16 %v1376_v63, %v4789_v7  ;;  %v1383_v8 = vmul.bf16 %v1373_v51, %v4830_v37  ;;  %v1459_v9 = vmul.bf16 0, %v1449_v61  ;;  %v4271_v32 = vld [vmem:[%s5676_s5 + $0x4] ss:$12 sps:$4 sm:$0xff]  }
 0x237   : > { %1168 = vrot.lane.b32.xlu0 %v1154_v29, %s5672_s15  ;;  %v1450_v16 = vsel %vm503_vm6, %v1447_v59, %v1449_v61  ;;  %v1312_v19 = vmul.bf16 %v1304_v42, %v4823_v30  ;;  %v1526_v24 = vmul.bf16 %v1519_v10, %v4783_v6  ;;  %v1528_v26 = vmul.bf16 0, %v1521_v11  ;;  %1699 = vmatprep.mubr.bf16.mxu1 %v4271_v32 }
 0x238   : > { %v1455_v17 = vmul.bf16 %v1450_v16, %v4789_v7  ;;  %v1384_v29 = vmul.bf16 %v1376_v63, %v4823_v30  ;;  %v1457_v35 = vmul.bf16 %v1447_v59, %v4830_v37  ;;  %v3977_v42 = vcombine.low %v1795_v39, %v1795_v39 }
 0x239   : > { %v3978_v51 = vcombine.high %v1795_v39, %v1795_v39  ;;  %v3980_v53 = vcombine.high %v1867_v31, %v1867_v31 }
 0x23a   : > { %1240 = vrot.lane.b32.xlu1 %v1227_v36, %s5671_s12  ;;  %v1458_v36 = vmul.bf16 %v1450_v16, %v4823_v30 }
 0x23b   : > { %1242 = vrot.lane.b32.xlu0 %v1228_v38, %s5671_s12  ;;  %v1530_v38 = vmul.bf16 %v1522_v13, %v4823_v30  ;;  %v1809_v63 = vpack.i.b16 %v3978_v51, %v3978_v51 }
 0x23e   : > { %1028 = vrot.lane.b32.xlu1 %v1011_v40, %s5674_s30  ;;  %v1529_v40 = vmul.bf16 %v1519_v10, %v4830_v37 }
 0x23f   : > { %1026 = vrot.lane.b32.xlu0 %v1010_v41, %s5674_s30  ;;  %v3979_v41 = vcombine.low %v1867_v31, %v1867_v31  ;;  %v2241_v31 = vld [vmem:[%s5625_s1] sm:$0x88] }
 0x240   : > { %v3990_v51 = vcombine.high %v2241_v31, %v2241_v31 }
 0x242   : > { %1322 = vrot.lane.b32.xlu1 %v1309_v43, %s5670_s29  ;;  %v1606_v43 = vld [vmem:[%s5677_s6] sm:$0xff] }
 0x243   : > { %1100 = vrot.lane.b32.xlu0 %v1084_v45, %s5673_s24  ;;  %v1607_v45 = vld [vmem:[%s5677_s6 + $0x8] sm:$0xff] }
 0x246   : > { %1102 = vrot.lane.b32.xlu1 %v1085_v46, %s5673_s24  ;;  %v1874_v46 = vshrl.u32 %v3979_v41, 16 }
 0x247   : > { %1172 = vrot.lane.b32.xlu0 %v1156_v47, %s5672_s15  ;;  %v1802_v47 = vpack.i.b16 %v3977_v42, %v3977_v42 }
 0x24a   : > { %1320 = vrot.lane.b32.xlu1 %v1308_v48, %s5670_s29  ;;  %v1608_v48 = vld [vmem:[%s5677_s6 + $0x10] sm:$0xff] }
 0x24b   : > { %1246 = vrot.lane.b32.xlu0 %v1230_v49, %s5671_s12  ;;  %v1609_v49 = vld [vmem:[%s5677_s6 + $0x18] sm:$0xff] }
 0x24e   : > { %1174 = vrot.lane.b32.xlu1 %v1157_v50, %s5672_s15  ;;  %v1875_v50 = vpack.i.b16 %v1874_v46, %v1874_v46 }
 0x24f   : > { %1324 = vrot.lane.b32.xlu0 %v1310_v52, %s5670_s29 }
 0x250   : > { %v1880_v10 = vrot.slane %v1875_v50, %v4543_v14 }
 0x252   : > { %1330 = vrot.lane.b32.xlu1 %v1310_v52, %s5670_s29  ;;  %v1807_v52 = vrot.slane %v1802_v47, %v4543_v14  ;;  %v3989_v47 = vcombine.low %v2241_v31, %v2241_v31 }
 0x253   : > { %1326 = vrot.lane.b32.xlu0 %v1311_v54, %s5670_s29  ;;  %v1941_v54 = vld [vmem:[%s5625_s1] sm:$0x22] }
 0x254   : > { %v3981_v59 = vcombine.low %v1941_v54, %v1941_v54 }
 0x256   : > { %1248 = vrot.lane.b32.xlu1 %v1231_v57, %s5671_s12  ;;  %v2095_v57 = vld [vmem:[%s5625_s1] sm:$0x44] }
 0x257   : > { %1396 = vrot.lane.b32.xlu0 %v1382_v55, %s5669_s22  ;;  %v3985_v11 = vcombine.low %v2095_v57, %v2095_v57 }
 0x25a   : > { %1394 = vrot.lane.b32.xlu1 %v1381_v5, %s5669_s22  ;;  %v1882_v5 = vshrl.u32 %v3980_v53, 16 }
 0x25b   : > { %1398 = vrot.lane.b32.xlu0 %v1383_v8, %s5669_s22  ;;  %v3982_v8 = vcombine.high %v1941_v54, %v1941_v54 }
 0x25c   : > { %v1883_v13 = vpack.i.b16 %v1882_v5, %v1882_v5 }
 0x25e   : > { %1392 = vrot.lane.b32.xlu1 %v1380_v12, %s5669_s22  ;;  %v1814_v12 = vrot.slane %v1809_v63, %v4543_v14  ;;  %v2256_v63 = vshrl.u32 %v3990_v51, 16 }
 0x25f   : > { %1470 = vrot.lane.b32.xlu0 %v1459_v9, %s5668_s16 }
 0x262   : > { %1402 = vrot.lane.b32.xlu1 %v1382_v55, %s5669_s22  ;;  %v2013_v55 = vld [vmem:[%s5625_s1] sm:$0x22] }
 0x263   : > { %1540 = vrot.lane.b32.xlu0 %v1527_v15, %s5667_s25  ;;  %v3983_v61 = vcombine.low %v2013_v55, %v2013_v55  ;;  %v1948_v15 = vpack.i.b16 %v3981_v59, %v3981_v59 }
 0x265   : > { %v2020_v16 = vshrl.u32 %v3983_v61, 16  ;;  %v1953_v32 = vrot.slane %v1948_v15, %v4561_v27 }
 0x266   : > { %1468 = vrot.lane.b32.xlu1 %v1455_v17, %s5668_s16  ;;  %v1019_v17 = vpop.permute.xlu1 %1018 }
 0x267   : > { %1328 = vrot.lane.b32.xlu0 %v1312_v19, %s5670_s29  ;;  %v1888_v19 = vrot.slane %v1883_v13, %v4543_v14 }
 0x26a   : > { %1466 = vrot.lane.b32.xlu1 %v1454_v21, %s5668_s16  ;;  %v1955_v21 = vpack.i.b16 %v3982_v8, %v3982_v8  ;;  %v1093_v42 = vpop.permute.xlu1 %1092 }
 0x26b   : > { %1538 = vrot.lane.b32.xlu0 %v1526_v24, %s5667_s25 }
 0x26c   : > { %v1960_v39 = vrot.slane %v1955_v21, %v4561_v27 }
 0x26e   : > { %1542 = vrot.lane.b32.xlu1 %v1528_v26, %s5667_s25 }
 0x26f   : > { %1400 = vrot.lane.b32.xlu0 %v1384_v29, %s5669_s22  ;;  %v1025_v29 = vpop.permute.xlu0 %1024 }
 0x272   : > { %1472 = vrot.lane.b32.xlu1 %v1457_v35, %s5668_s16  ;;  %v2021_v35 = vpack.i.b16 %v2020_v16, %v2020_v16 }
 0x273   : > { %1476 = vrot.lane.b32.xlu0 %v1459_v9, %s5668_s16  ;;  %v3984_v9 = vcombine.high %v2013_v55, %v2013_v55  ;;  %v2248_v55 = vshrl.u32 %v3989_v47, 16 }
 0x275   : > { %v2028_v24 = vshrl.u32 %v3984_v9, 16  ;;  %v2249_v9 = vpack.i.b16 %v2248_v55, %v2248_v55 }
 0x276   : > { %1474 = vrot.lane.b32.xlu1 %v1458_v36, %s5668_s16  ;;  %v2102_v36 = vshrl.u32 %v3985_v11, 16  ;;  %v2257_v11 = vpack.i.b16 %v2256_v63, %v2256_v63 }
 0x277   : > { %1546 = vrot.lane.b32.xlu0 %v1530_v38, %s5667_s25  ;;  %v2169_v38 = vld [vmem:[%s5625_s1] sm:$0x88]  ;;  %v2254_v13 = vrot.slane %v2249_v9, %v4593_v56 }
 0x278   : > { %v3987_v46 = vcombine.low %v2169_v38, %v2169_v38  ;;  %v2262_v16 = vrot.slane %v2257_v11, %v4593_v56 }
 0x27a   : > { %1548 = vrot.lane.b32.xlu1 %v1528_v26, %s5667_s25  ;;  %v3986_v26 = vcombine.high %v2095_v57, %v2095_v57  ;;  %v2176_v54 = vpack.i.b16 %v3987_v46, %v3987_v46  ;;  %v1165_v57 = vpop.permute.xlu1 %1164 }
 0x27b   : > { %1544 = vrot.lane.b32.xlu0 %v1529_v40, %s5667_s25  ;;  %v2029_v40 = vpack.i.b16 %v2028_v24, %v2028_v24 }
 0x27c   : > { %v2110_v41 = vshrl.u32 %v3986_v26, 16  ;;  %v2181_v8 = vrot.slane %v2176_v54, %v4593_v56 }
 0x27e   : > { %1612 = vperm.xlu1 %4230, %v1606_v43   ;;  %v2026_v43 = vrot.slane %v2021_v35, %v4561_v27  ;;  %v2111_v50 = vpack.i.b16 %v2110_v41, %v2110_v41 }
 0x27f   : > { %1617 = vperm.xlu0 %4229, %v1607_v45   ;;  %v2103_v45 = vpack.i.b16 %v2102_v36, %v2102_v36 }
 0x280   : > { %v2116_v59 = vrot.slane %v2111_v50, %v4574_v44 }
 0x281   : > { %v2108_v53 = vrot.slane %v2103_v45, %v4574_v44 }
 0x282   : > { %1622 = vperm.xlu1 %4230, %v1608_v48   ;;  %v1099_v48 = vpop.permute.xlu0 %1098 }
 0x283   : > { %1627 = vperm.xlu0 %4229, %v1609_v49   ;;  %v2034_v49 = vrot.slane %v2029_v40, %v4561_v27 }
 0x286   : > { %1817 = vrot.lane.b32.xlu1 %v1807_v52, %s5667_s25  ;;  %v3988_v52 = vcombine.high %v2169_v38, %v2169_v38  ;;  %v1171_v5 = vpop.permute.xlu0 %1170 }
 0x287   : > { %1819 = vrot.lane.b32.xlu0 %v1814_v12, %s5667_s25  ;;  %v1239_v12 = vpop.permute.xlu1 %1238 }
 0x288   : > { %v2183_v61 = vpack.i.b16 %v3988_v52, %v3988_v52 }
 0x28a   : > { %1891 = vrot.lane.b32.xlu1 %v1880_v10, %s5668_s16  ;;  %v2188_v10 = vrot.slane %v2183_v61, %v4593_v56  ;;  %v1245_v15 = vpop.permute.xlu0 %1244 }
 0x28b   : > { %1893 = vrot.lane.b32.xlu0 %v1888_v19, %s5668_s16 }
 0x28e   : > { %1963 = vrot.lane.b32.xlu1 %v1953_v32, %s5669_s22 }
 0x28f   : > { %1965 = vrot.lane.b32.xlu0 %v1960_v39, %s5669_s22 }
 0x292   : > { %2037 = vrot.lane.b32.xlu1 %v2026_v43, %s5670_s29 }
 0x293   : > { %2039 = vrot.lane.b32.xlu0 %v2034_v49, %s5670_s29 }
 0x296   : > { %2119 = vrot.lane.b32.xlu1 %v2108_v53, %s5671_s12 }
 0x297   : > { %2121 = vrot.lane.b32.xlu0 %v2116_v59, %s5671_s12 }
 0x29a   : > { %2191 = vrot.lane.b32.xlu1 %v2181_v8, %s5672_s15 }
 0x29b   : > { %2193 = vrot.lane.b32.xlu0 %v2188_v10, %s5672_s15 }
 0x29e   : > { %2265 = vrot.lane.b32.xlu1 %v2254_v13, %s5673_s24 }
 0x29f   : > { %2267 = vrot.lane.b32.xlu0 %v2262_v16, %s5673_s24 }
 0x2a0   : > { %v1021_v19 = vpop.permute.xlu1 %1020 }
 0x2a1   : > { %v1023_v21 = vpop.permute.xlu0 %1022  ;;  %v1030_v26 = vsel %vm445_vm7, %v1019_v17, %v1021_v19 }
 0x2a2   : > { %v1031_v24 = vsel %vm445_vm7, %v1021_v19, %v1023_v21 }
 0x2a3   : > { %1667 = vmatprep.subr.bf16.mxu1 %v1031_v24 }
 0x2a4   : > { %v1095_v32 = vpop.permute.xlu1 %1094  ;;  %1668 = vmatpush1.bf16.msra.mxu1 %v1030_v26 }
 0x2a5   : > { %v1097_v35 = vpop.permute.xlu0 %1096  ;;  %v1104_v49 = vsel %vm503_vm6, %v1093_v42, %v1095_v32 }
 0x2a6   : > { %v1105_v46 = vsel %vm503_vm6, %v1095_v32, %v1097_v35 }
 0x2a8   : > { %v1167_v36 = vpop.permute.xlu1 %1166 }
 0x2a9   : > { %v1169_v38 = vpop.permute.xlu0 %1168  ;;  %v1176_v59 = vsel %vm556_vm1, %v1165_v57, %v1167_v36 }
 0x2ac   : > { %v1241_v31 = vpop.permute.xlu1 %1240 }
 0x2ad   : > { %v1243_v39 = vpop.permute.xlu0 %1242  ;;  %v1250_v11 = vsel %vm614_vm5, %v1239_v12, %v1241_v31 }
 0x2ae   : > { %v1251_v9 = vsel %vm614_vm5, %v1241_v31, %v1243_v39 }
 0x2b0   : > { %v1029_v40 = vpop.permute.xlu1 %1028 }
 0x2b1   : > { %v1027_v41 = vpop.permute.xlu0 %1026 }
 0x2b2   : > { %v1032_v43 = vsel %vm445_vm7, %v1025_v29, %v1027_v41  ;;  %v1033_v45 = vsel %vm445_vm7, %v1027_v41, %v1029_v40  ;;  %v1177_v29 = vsel %vm556_vm1, %v1167_v36, %v1169_v38 }
 0x2b3   : > { %1669 = vmatprep.subr.bf16.mxu1 %v1033_v45 }
 0x2b4   : > { %v1323_v47 = vpop.permute.xlu1 %1322  ;;  %1670 = vmatpush1.bf16.msra.mxu1 %v1032_v43 }
 0x2b5   : > { %v1101_v17 = vpop.permute.xlu0 %1100  ;;  %1671 = vmatprep.subr.bf16.mxu1 %v1105_v46 }
 0x2b6   : > { %v1106_v53 = vsel %vm503_vm6, %v1099_v48, %v1101_v17 }
 0x2b8   : > { %v1103_v50 = vpop.permute.xlu1 %1102  ;;  %1672 = vmatpush1.bf16.msra.mxu1 %v1104_v49 }
 0x2b9   : > { %v1107_v52 = vsel %vm503_vm6, %v1101_v17, %v1103_v50  ;;  %v1173_v51 = vpop.permute.xlu0 %1172 }
 0x2ba   : > { %1673 = vmatprep.subr.bf16.mxu1 %v1107_v52  ;;  %v1178_v8 = vsel %vm556_vm1, %v1171_v5, %v1173_v51 }
 0x2bc   : > { %v1321_v54 = vpop.permute.xlu1 %1320  ;;  %1674 = vmatpush1.bf16.msra.mxu1 %v1106_v53 }
 0x2bd   : > { %v1247_v55 = vpop.permute.xlu0 %1246  ;;  %1675 = vmatprep.subr.bf16.mxu1 %v1177_v29 }
 0x2be   : > { %v1252_v19 = vsel %vm614_vm5, %v1245_v15, %v1247_v55  ;;  %v1332_v15 = vsel %vm594_vm4, %v1321_v54, %v1323_v47 }
 0x2c0   : > { %v1175_v61 = vpop.permute.xlu1 %1174  ;;  %1676 = vmatpush1.bf16.msra.mxu1 %v1176_v59 }
 0x2c1   : > { %v1179_v42 = vsel %vm556_vm1, %v1173_v51, %v1175_v61  ;;  %v1325_v63 = vpop.permute.xlu0 %1324  ;;  %v4273_v61 = vld [vmem:[%s5676_s5 + $0x1c] ss:$12 sps:$4 sm:$0xff]  }
 0x2c2   : > { %1677 = vmatprep.subr.bf16.mxu1 %v1179_v42  ;;  %v1333_v12 = vsel %vm594_vm4, %v1323_v47, %v1325_v63 }
 0x2c4   : > { %v1331_v10 = vpop.permute.xlu1 %1330  ;;  %1678 = vmatpush1.bf16.msra.mxu1 %v1178_v8 }
 0x2c5   : > { %v1327_v48 = vpop.permute.xlu0 %1326  ;;  %1679 = vmatprep.subr.bf16.mxu1 %v1251_v9  ;;  %v4272_v9 = vld [vmem:[%s5676_s5 + $0x8] ss:$12 sps:$4 sm:$0xff]  }
 0x2c8   : > { %v1249_v13 = vpop.permute.xlu1 %1248  ;;  %1680 = vmatpush1.bf16.msra.mxu1 %v1250_v11  ;;  %v4276_v11 = vld [vmem:[%s5676_s5 + $0x20] ss:$12 sps:$4 sm:$0xff]  }
 0x2c9   : > { %v1253_v57 = vsel %vm614_vm5, %v1247_v55, %v1249_v13  ;;  %v1397_v16 = vpop.permute.xlu0 %1396  ;;  %v4269_v55 = vld [vmem:[%s5676_s5] ss:$12 sps:$4 sm:$0xff]  }
 0x2ca   : > { %1681 = vmatprep.subr.bf16.mxu1 %v1253_v57  ;;  %v2315_v57 = vld [vmem:[%s5625_s1 + $0x8] sm:$0x11] }
 0x2cc   : > { %v1395_v21 = vpop.permute.xlu1 %1394  ;;  %1682 = vmatpush1.bf16.msra.mxu1 %v1252_v19 }
 0x2cd   : > { %v1399_v24 = vpop.permute.xlu0 %1398  ;;  %1683 = vmatprep.subr.bf16.mxu1 %v4789_v7 }
 0x2d0   : > { %v1393_v5 = vpop.permute.xlu1 %1392  ;;  %1684 = vmatpush1.bf16.msra.mxu1 %v4783_v6  ;;  %v1405_v6 = vsel %vm539_vm2, %v1395_v21, %v1397_v16  ;;  %v3991_v16 = vcombine.low %v2315_v57, %v2315_v57 }
 0x2d1   : > { %v1471_v26 = vpop.permute.xlu0 %1470  ;;  %1685 = vmatprep.subr.bf16.mxu1 %v4823_v30 }
 0x2d4   : > { %v1403_v32 = vpop.permute.xlu1 %1402  ;;  %1686 = vmatpush1.bf16.msra.mxu1 %v4830_v37  ;;  %v1404_v37 = vsel %vm539_vm2, %v1393_v5, %v1395_v21  ;;  %v3992_v21 = vcombine.high %v2315_v57, %v2315_v57 }
 0x2d5   : > { %v1541_v35 = vpop.permute.xlu0 %1540  ;;  %1687 = vmatprep.subr.bf16.mxu1 %v1333_v12 }
 0x2d6   : > { %v2329_v12 = vpack.i.b16 %v3992_v21, %v3992_v21 }
 0x2d8   : > { %v1469_v36 = vpop.permute.xlu1 %1468  ;;  %1688 = vmatpush1.bf16.msra.mxu1 %v1332_v15 }
 0x2d9   : > { %v1329_v38 = vpop.permute.xlu0 %1328  ;;  %v1479_v17 = vsel %vm483_vm3, %v1469_v36, %v1471_v26 }
 0x2da   : > { %v1334_v7 = vsel %vm594_vm4, %v1327_v48, %v1329_v38  ;;  %v1335_v31 = vsel %vm594_vm4, %v1329_v38, %v1331_v10  ;;  %v4275_v10 = vld [vmem:[%s5676_s5 + $0x18] ss:$12 sps:$4 sm:$0xff]  }
 0x2db   : > { %1689 = vmatprep.subr.bf16.mxu1 %v1335_v31  ;;  %v5008_v48 = vld [vmem:[#allocation2] sm:$0xff] }
 0x2dc   : > { %v1467_v30 = vpop.permute.xlu1 %1466  ;;  %1690 = vmatpush1.bf16.msra.mxu1 %v1334_v7 }
 0x2dd   : > { %v1539_v39 = vpop.permute.xlu0 %1538  ;;  %1691 = vmatprep.subr.bf16.mxu1 %v1405_v6  ;;  %v1478_v52 = vsel %vm483_vm3, %v1467_v30, %v1469_v36  ;;  %v2334_v36 = vrot.slane %v2329_v12, %v4543_v14 }
 0x2de   : > { %v1550_v45 = vsel %vm428_vm0, %v1539_v39, %v1541_v35 }
 0x2e0   : > { %v1543_v40 = vpop.permute.xlu1 %1542  ;;  %1692 = vmatpush1.bf16.msra.mxu1 %v1404_v37 }
 0x2e1   : > { %v1551_v41 = vsel %vm428_vm0, %v1541_v35, %v1543_v40  ;;  %v1401_v43 = vpop.permute.xlu0 %1400 }
 0x2e2   : > { %v1406_v46 = vsel %vm539_vm2, %v1399_v24, %v1401_v43  ;;  %v1407_v47 = vsel %vm539_vm2, %v1401_v43, %v1403_v32  ;;  %1720 = vmatprep.subr.bf16.mxu0 %v1551_v41  ;;  %v2322_v24 = vpack.i.b16 %v3991_v16, %v3991_v16 }
 0x2e3   : > { %1693 = vmatprep.subr.bf16.mxu1 %v1407_v47  ;;  %1721 = vmatpush1.bf16.msra.mxu0 %v1550_v45 }
 0x2e4   : > { %v1473_v49 = vpop.permute.xlu1 %1472  ;;  %1694 = vmatpush1.bf16.msra.mxu1 %v1406_v46  ;;  %v2327_v32 = vrot.slane %v2322_v24, %v4543_v14 }
 0x2e5   : > { %v1477_v50 = vpop.permute.xlu0 %1476  ;;  %1695 = vmatprep.subr.bf16.mxu1 %v1479_v17 }
 0x2e8   : > { %v1475_v51 = vpop.permute.xlu1 %1474  ;;  %1696 = vmatpush1.bf16.msra.mxu1 %v1478_v52 }
 0x2e9   : > { %v1481_v53 = vsel %vm483_vm3, %v1475_v51, %v1477_v50  ;;  %v1547_v29 = vpop.permute.xlu0 %1546  ;;  %v1480_v54 = vsel %vm483_vm3, %v1473_v49, %v1475_v51 }
 0x2ea   : > { %1697 = vmatprep.subr.bf16.mxu1 %v1481_v53 }
 0x2ec   : > { %v1549_v59 = vpop.permute.xlu1 %1548  ;;  %1698 = vmatpush1.bf16.msra.mxu1 %v1480_v54 }
 0x2ed   : > { %v1553_v42 = vsel %vm428_vm0, %v1547_v29, %v1549_v59  ;;  %v1545_v63 = vpop.permute.xlu0 %1544 }
 0x2ee   : > { %v1552_v8 = vsel %vm428_vm0, %v1545_v63, %v1547_v29  ;;  %1722 = vmatprep.subr.bf16.mxu0 %v1553_v42 }
 0x2ef   : > { %1700 = vmatmul.mubr.bf16.vlgmr.msra.gmra.mrb[0].mxu1 %v4269_v55  ;;  %1723 = vmatpush1.bf16.msra.mxu0 %v1552_v8 }
 0x2f0   : > { %1709 = vmatprep.mubr.bf16.mxu1 %v4273_v61 }
 0x2f2   : > { %3975 = vmatmul.mubr.msk.bf16.vlgmr.msra.gmra.mrb[8].mxu0 %vm1660_vm10, %v4272_v9 }
 0x2f3   : > { %1762 = vmatprep.mubr.bf16.mxu0 %v5008_v48 }
 0x2f7   : > { %1710 = vmatmul.mubr.bf16.gmra.mrb[4].mxu1 %v4275_v10 }
 0x2fa   : > { %3976 = vmatmul.mubr.msk.bf16.gmra.mrb[12].mxu0 %vm1660_vm10, %v4276_v11 }
 0x2fd   : > { %v1613_v13 = vpop.permute.xlu1 %1612 }
 0x2fe   : > { %v1618_v31 = vpop.permute.xlu0 %1617 }
 0x301   : > { %v1623_v19 = vpop.permute.xlu1 %1622 }
 0x302   : > { %v1628_v46 = vpop.permute.xlu0 %1627 }
 0x305   : > { %v1818_v5 = vpop.permute.xlu1 %1817 }
 0x306   : > { %v1825_v26 = vmul.bf16 %v5008_v48, %v1818_v5  ;;  %v1820_v54 = vpop.permute.xlu0 %1819 }
 0x308   : > { %1837 = vrot.lane.b32.xlu1 %v1825_v26, %s5674_s30  ;;  %1843 = vrot.lane.b32.xlu0 %v1825_v26, %s5674_s30 }
 0x309   : > { %v1892_v35 = vpop.permute.xlu1 %1891 }
 0x30a   : > { %v1899_v15 = vmul.bf16 %v5008_v48, %v1892_v35 }
 0x30c   : > { %1911 = vrot.lane.b32.xlu1 %v1899_v15, %s5673_s24  ;;  %2337 = vrot.lane.b32.xlu0 %v2327_v32, %s5674_s30 }
 0x30d   : > { %v1964_v38 = vpop.permute.xlu1 %1963 }
 0x30e   : > { %v5029_v7 = vmul.bf16 %v5008_v48, %v1964_v38 }
 0x310   : > { %2339 = vrot.lane.b32.xlu1 %v2334_v36, %s5674_s30  ;;  %1917 = vrot.lane.b32.xlu0 %v1899_v15, %s5673_s24  ;;  %v1821_v15 = vsel %vm428_vm0, %v1818_v5, %v1820_v54 }
 0x314   : > { %1983 = vrot.lane.b32.xlu1 %v5029_v7, %s5672_s15 }
 0x3c2   : > { %v1701_v6 = vpop.f32.mrb[0].mxu1 }
 0x3c3   : > { %v1702_v30 = vadd.f32 %v1701_v6, %v1613_v13  ;;  %v1703_v39 = vpop.f32.mrb[1].mxu1  ;;  %v1894_v6 = vpop.permute.xlu0 %1893 }
 0x3c4   : > { %v1704_v37 = vadd.f32 %v1703_v39, %v1613_v13  ;;  %v1705_v40 = vpop.f32.mrb[2].mxu1 }
 0x3c5   : > { %v1706_v41 = vadd.f32 %v1705_v40, %v1618_v31  ;;  %v1707_v43 = vpop.f32.mrb[3].mxu1  ;;  %v1754_v45 = vpop.f32.mrb[8].mxu0 }
 0x3c6   : > { %v1708_v47 = vadd.f32 %v1707_v43, %v1618_v31  ;;  %v1755_v17 = vadd.f32 %v1754_v45, %v1702_v30  ;;  %v1756_v49 = vpop.f32.mrb[9].mxu0  ;;  %v1895_v45 = vsel %vm483_vm3, %v1892_v35, %v1894_v6 }
 0x3c7   : > { %v1757_v50 = vadd.f32 %v1756_v49, %v1704_v37  ;;  %v1758_v52 = vpop.f32.mrb[10].mxu0 }
 0x3c8   : > { %v1759_v51 = vadd.f32 %v1758_v52, %v1706_v41  ;;  %v1760_v53 = vpop.f32.mrb[11].mxu0  ;;  %v1773_v55 = vmax.f32 %v1755_v17, 0.0 }
 0x3c9   : > { %v1761_v29 = vadd.f32 %v1760_v53, %v1708_v47  ;;  %v1774_v42 = vmax.f32 %v1757_v50, 0.0  ;;  %v1966_v47 = vpop.permute.xlu0 %1965 }
 0x3ca   : > { %v1775_v59 = vmax.f32 %v1759_v51, 0.0  ;;  %v1711_v61 = vpop.f32.mrb[4].mxu1  ;;  %v1967_v52 = vsel %vm539_vm2, %v1964_v38, %v1966_v47 }
 0x3cb   : > { %v1776_v63 = vmax.f32 %v1761_v29, 0.0  ;;  %v1712_v8 = vadd.f32 %v1711_v61, %v1623_v19  ;;  %v1713_v9 = vpop.f32.mrb[5].mxu1  ;;  %v2038_v29 = vpop.permute.xlu1 %2037 }
 0x3cc   : > { %v5033_v10 = vpack.c.bf16 %v1775_v59, %v1773_v55  ;;  %v1714_v11 = vadd.f32 %v1713_v9, %v1623_v19  ;;  %v1715_v13 = vpop.f32.mrb[6].mxu1 }
 0x3cd   : > { %v5035_v57 = vpack.c.bf16 %v1776_v63, %v1774_v42  ;;  %v1716_v16 = vadd.f32 %v1715_v13, %v1628_v46  ;;  %v1717_v21 = vpop.f32.mrb[7].mxu1  ;;  %v1764_v24 = vpop.f32.mrb[12].mxu0 }
 0x3ce   : > { %v1718_v26 = vadd.f32 %v1717_v21, %v1628_v46  ;;  %v1765_v12 = vadd.f32 %v1764_v24, %v1712_v8  ;;  %v1766_v32 = vpop.f32.mrb[13].mxu0  ;;  %v1826_v37 = vmul.bf16 %v1821_v15, %v5033_v10  ;;  %v1900_v49 = vmul.bf16 %v1895_v45, %v5033_v10  ;;  %v2040_v55 = vpop.permute.xlu0 %2039 }
 0x3cf   : > { %v1767_v36 = vadd.f32 %v1766_v32, %v1714_v11  ;;  %v1768_v31 = vpop.f32.mrb[14].mxu0  ;;  %v1827_v19 = vmul.bf16 %v1820_v54, %v5035_v57  ;;  %v1901_v50 = vmul.bf16 %v1894_v6, %v5035_v57  ;;  %v1972_v53 = vmul.bf16 %v1967_v52, %v5033_v10  ;;  %v2120_v11 = vpop.permute.xlu1 %2119 }
 0x3d0   : > { %v1769_v30 = vadd.f32 %v1768_v31, %v1716_v16  ;;  %v1770_v39 = vpop.f32.mrb[15].mxu0  ;;  %v1777_v41 = vmax.f32 %v1765_v12, 0.0  ;;  %1839 = vrot.lane.b32.xlu1 %v1826_v37, %s5674_s30  ;;  %v1973_v35 = vmul.bf16 %v1966_v47, %v5035_v57  ;;  %v2041_v61 = vsel %vm594_vm4, %v2038_v29, %v2040_v55 }
 0x3d1   : > { %v1771_v40 = vadd.f32 %v1770_v39, %v1718_v26  ;;  %1841 = vrot.lane.b32.xlu0 %v1827_v19, %s5674_s30  ;;  %v1778_v46 = vmax.f32 %v1767_v36, 0.0  ;;  %v2046_v42 = vmul.bf16 %v2041_v61, %v5033_v10  ;;  %v2047_v16 = vmul.bf16 %v2040_v55, %v5035_v57 }
 0x3d2   : > { %v1779_v43 = vmax.f32 %v1769_v30, 0.0  ;;  %v2122_v13 = vpop.permute.xlu0 %2121 }
 0x3d3   : > { %v1780_v5 = vmax.f32 %v1771_v40, 0.0  ;;  %v2123_v21 = vsel %vm614_vm5, %v2120_v11, %v2122_v13  ;;  %v2129_v32 = vmul.bf16 %v5008_v48, %v2122_v13  ;;  %v2192_v36 = vpop.permute.xlu1 %2191 }
 0x3d4   : > { %v5043_v17 = vpack.c.bf16 %v1779_v43, %v1777_v41  ;;  %1913 = vrot.lane.b32.xlu1 %v1900_v49, %s5673_s24  ;;  %v2128_v24 = vmul.bf16 %v2123_v21, %v5035_v57  ;;  %v2199_v40 = vmul.bf16 %v2192_v36, %v5033_v10 }
 0x3d5   : > { %v5048_v51 = vpack.c.bf16 %v1780_v5, %v1778_v46  ;;  %1915 = vrot.lane.b32.xlu0 %v1901_v50, %s5673_s24 }
 0x3d6   : > { %v1829_v38 = vmul.bf16 %v1821_v15, %v5043_v17  ;;  %v1903_v8 = vmul.bf16 %v1895_v45, %v5043_v17  ;;  %v1975_v9 = vmul.bf16 %v1967_v52, %v5043_v17  ;;  %v2049_v26 = vmul.bf16 %v2041_v61, %v5043_v17  ;;  %v2194_v31 = vpop.permute.xlu0 %2193 }
 0x3d7   : > { %v1830_v59 = vmul.bf16 %v1820_v54, %v5048_v51  ;;  %v1904_v63 = vmul.bf16 %v1894_v6, %v5048_v51  ;;  %v2045_v54 = vmul.bf16 %v5008_v48, %v2038_v29  ;;  %v2050_v12 = vmul.bf16 %v2040_v55, %v5048_v51  ;;  %v2266_v37 = vpop.permute.xlu1 %2265 }
 0x3d8   : > { %1985 = vrot.lane.b32.xlu1 %v1972_v53, %s5672_s15  ;;  %v2127_v15 = vmul.bf16 %v2120_v11, %v5033_v10  ;;  %v2130_v6 = vmul.bf16 %v2120_v11, %v5043_v17  ;;  %v2195_v30 = vsel %vm556_vm1, %v2192_v36, %v2194_v31  ;;  %v2201_v39 = vmul.bf16 %v5008_v48, %v2194_v31  ;;  %v2425_v11 = vld [vmem:[%s5632_s8] sm:$0xff] }
 0x3d9   : > { %1987 = vrot.lane.b32.xlu0 %v1973_v35, %s5672_s15  ;;  %v2200_v19 = vmul.bf16 %v2195_v30, %v5035_v57  ;;  %v2131_v41 = vmul.bf16 %v2123_v21, %v5048_v51  ;;  %v2202_v46 = vmul.bf16 %v2192_v36, %v5043_v17  ;;  %v2203_v52 = vmul.bf16 %v2195_v30, %v5048_v51  ;;  %v2428_v21 = vld [vmem:[%s5632_s8 + $0x18] sm:$0xff] }
 0x3da   : > { %v2268_v45 = vpop.permute.xlu0 %2267  ;;  %v2273_v53 = vmul.bf16 %v2266_v37, %v5033_v10 }
 0x3db   : > { %v5099_v43 = vpop.permute.xlu1 %1837  ;;  %v2269_v5 = vsel %vm503_vm6, %v2266_v37, %v2268_v45  ;;  %v2275_v35 = vmul.bf16 %v5008_v48, %v2268_v45 }
 0x3dc   : > { %1847 = vrot.lane.b32.xlu1 %v1830_v59, %s5674_s30  ;;  %v4293_v59 = vld [vmem:[%s5631_s7 + $0x4] ss:$12 sps:$4 sm:$0xff]  }
 0x3dd   : > { %1845 = vrot.lane.b32.xlu0 %v1829_v38, %s5674_s30  ;;  %v2277_v38 = vmul.bf16 %v2269_v5, %v5048_v51  ;;  %2517 = vmatprep.mubr.bf16.mxu0 %v4293_v59 }
 0x3de   : > { %v5110_v50 = vpop.permute.xlu0 %1843 }
 0x3df   : > { %v5108_v49 = vpop.permute.xlu1 %1911 }
 0x3e0   : > { %2059 = vrot.lane.b32.xlu1 %v2046_v42, %s5671_s12 }
 0x3e1   : > { %1989 = vrot.lane.b32.xlu0 %v5029_v7, %s5672_s15  ;;  %v1976_v7 = vmul.bf16 %v1966_v47, %v5048_v51  ;;  %v2274_v47 = vmul.bf16 %v2269_v5, %v5035_v57 }
 0x3e2   : > { %v2338_v55 = vpop.permute.xlu0 %2337 }
 0x3e3   : > { %v2340_v29 = vpop.permute.xlu1 %2339  ;;  %v2348_v13 = vmul.bf16 %v2338_v55, %v5043_v17 }
 0x3e4   : > { %1921 = vrot.lane.b32.xlu1 %v1904_v63, %s5673_s24  ;;  %v2341_v61 = vsel %vm445_vm7, %v2338_v55, %v2340_v29  ;;  %v2276_v63 = vmul.bf16 %v2266_v37, %v5043_v17 }
 0x3e5   : > { %1919 = vrot.lane.b32.xlu0 %v1903_v8, %s5673_s24  ;;  %v2346_v42 = vmul.bf16 %v2341_v61, %v5035_v57  ;;  %v2347_v8 = vmul.bf16 %v5008_v48, %v2340_v29 }
 0x3e8   : > { %2057 = vrot.lane.b32.xlu1 %v2045_v54, %s5671_s12 }
 0x3e9   : > { %1991 = vrot.lane.b32.xlu0 %v1975_v9, %s5672_s15  ;;  %v2349_v9 = vmul.bf16 %v2341_v61, %v5048_v51 }
 0x3ec   : > { %1993 = vrot.lane.b32.xlu1 %v1976_v7, %s5672_s15  ;;  %v2427_v7 = vld [vmem:[%s5632_s8 + $0x10] sm:$0xff] }
 0x3ed   : > { %2061 = vrot.lane.b32.xlu0 %v2047_v16, %s5671_s12  ;;  %v2426_v16 = vld [vmem:[%s5632_s8 + $0x8] sm:$0xff] }
 0x3f0   : > { %2141 = vrot.lane.b32.xlu1 %v2128_v24, %s5670_s29  ;;  %v2621_v24 = vld [vmem:[%s5625_s1] sm:$0x11] }
 0x3f1   : > { %2065 = vrot.lane.b32.xlu0 %v2049_v26, %s5671_s12  ;;  %v2693_v26 = vld [vmem:[%s5625_s1] sm:$0x11] }
 0x3f2   : > { %v4004_v36 = vcombine.high %v2693_v26, %v2693_v26  ;;  %v4003_v31 = vcombine.low %v2693_v26, %v2693_v26 }
 0x3f4   : > { %2067 = vrot.lane.b32.xlu1 %v2050_v12, %s5671_s12  ;;  %v2767_v12 = vld [vmem:[%s5625_s1] sm:$0x22]  ;;  %v2708_v45 = vshrl.u32 %v4004_v36, 16 }
 0x3f5   : > { %2063 = vrot.lane.b32.xlu0 %v2045_v54, %s5671_s12  ;;  %v2345_v54 = vmul.bf16 %v2338_v55, %v5033_v10  ;;  %v4006_v30 = vcombine.high %v2767_v12, %v2767_v12 }
 0x3f7   : > { %v2781_v55 = vpack.i.b16 %v4006_v30, %v4006_v30 }
 0x3f8   : > { %2139 = vrot.lane.b32.xlu1 %v2127_v15, %s5670_s29  ;;  %v4001_v15 = vcombine.low %v2621_v24, %v2621_v24 }
 0x3f9   : > { %2143 = vrot.lane.b32.xlu0 %v2129_v32, %s5670_s29 }
 0x3fc   : > { %2149 = vrot.lane.b32.xlu1 %v2129_v32, %s5670_s29  ;;  %v4002_v32 = vcombine.high %v2621_v24, %v2621_v24  ;;  %v3067_v24 = vld [vmem:[%s5625_s1] sm:$0x88] }
 0x3fd   : > { %2145 = vrot.lane.b32.xlu0 %v2130_v6, %s5670_s29  ;;  %v2839_v6 = vld [vmem:[%s5625_s1] sm:$0x22]  ;;  %v4014_v36 = vcombine.high %v3067_v24, %v3067_v24  ;;  %v4013_v30 = vcombine.low %v3067_v24, %v3067_v24 }
 0x3fe   : > { %v4008_v37 = vcombine.high %v2839_v6, %v2839_v6 }
 0x400   : > { %2213 = vrot.lane.b32.xlu1 %v2200_v19, %s5669_s22  ;;  %v4007_v19 = vcombine.low %v2839_v6, %v2839_v6  ;;  %v2854_v5 = vshrl.u32 %v4008_v37, 16 }
 0x401   : > { %2215 = vrot.lane.b32.xlu0 %v2201_v39, %s5669_s22 }
 0x404   : > { %2211 = vrot.lane.b32.xlu1 %v2199_v40, %s5669_s22  ;;  %v2635_v40 = vpack.i.b16 %v4002_v32, %v4002_v32 }
 0x405   : > { %2147 = vrot.lane.b32.xlu0 %v2131_v41, %s5670_s29  ;;  %v2628_v41 = vpack.i.b16 %v4001_v15, %v4001_v15 }
 0x408   : > { %2221 = vrot.lane.b32.xlu1 %v2201_v39, %s5669_s22  ;;  %v4005_v39 = vcombine.low %v2767_v12, %v2767_v12 }
 0x409   : > { %2217 = vrot.lane.b32.xlu0 %v2202_v46, %s5669_s22  ;;  %v2700_v46 = vshrl.u32 %v4003_v31, 16 }
 0x40a   : > { %v2774_v59 = vpack.i.b16 %v4005_v39, %v4005_v39  ;;  %v5186_v39 = vpop.permute.xlu1 %1983 }
 0x40b   : > { %v2701_v29 = vpack.i.b16 %v2700_v46, %v2700_v46  ;;  %v3082_v46 = vshrl.u32 %v4014_v36, 16 }
 0x40c   : > { %2287 = vrot.lane.b32.xlu1 %v2274_v47, %s5668_s16  ;;  %v2921_v47 = vld [vmem:[%s5625_s1] sm:$0x44] }
 0x40d   : > { %2219 = vrot.lane.b32.xlu0 %v2203_v52, %s5669_s22  ;;  %v2640_v52 = vrot.slane %v2635_v40, %v4543_v14  ;;  %v1918_v40 = vpop.permute.xlu0 %1917 }
 0x410   : > { %2285 = vrot.lane.b32.xlu1 %v2273_v53, %s5668_s16  ;;  %v2633_v53 = vrot.slane %v2628_v41, %v4543_v14 }
 0x411   : > { %2289 = vrot.lane.b32.xlu0 %v2275_v35, %s5668_s16 }
 0x414   : > { %2295 = vrot.lane.b32.xlu1 %v2275_v35, %s5668_s16  ;;  %v2709_v35 = vpack.i.b16 %v2708_v45, %v2708_v45 }
 0x415   : > { %2293 = vrot.lane.b32.xlu0 %v2277_v38, %s5668_s16  ;;  %v2846_v38 = vshrl.u32 %v4007_v19, 16 }
 0x416   : > { %v2714_v61 = vrot.slane %v2709_v35, %v4543_v14 }
 0x418   : > { %2359 = vrot.lane.b32.xlu1 %v2346_v42, %s5667_s25  ;;  %v2706_v42 = vrot.slane %v2701_v29, %v4543_v14 }
 0x419   : > { %2291 = vrot.lane.b32.xlu0 %v2276_v63, %s5668_s16  ;;  %v4010_v63 = vcombine.high %v2921_v47, %v2921_v47 }
 0x41c   : > { %2357 = vrot.lane.b32.xlu1 %v2345_v54, %s5667_s25  ;;  %v2855_v54 = vpack.i.b16 %v2854_v5, %v2854_v5  ;;  %v3074_v5 = vshrl.u32 %v4013_v30, 16 }
 0x41d   : > { %2361 = vrot.lane.b32.xlu0 %v2347_v8, %s5667_s25 }
 0x41e   : > { %v2860_v26 = vrot.slane %v2855_v54, %v4561_v27 }
 0x420   : > { %2367 = vrot.lane.b32.xlu1 %v2347_v8, %s5667_s25  ;;  %v4009_v8 = vcombine.low %v2921_v47, %v2921_v47  ;;  %v3141_v47 = vld [vmem:[%s5625_s1 + $0x8] sm:$0x11] }
 0x421   : > { %2365 = vrot.lane.b32.xlu0 %v2349_v9, %s5667_s25  ;;  %v2847_v9 = vpack.i.b16 %v2846_v38, %v2846_v38  ;;  %v4015_v35 = vcombine.low %v3141_v47, %v3141_v47  ;;  %v3083_v38 = vpack.i.b16 %v3082_v46, %v3082_v46 }
 0x423   : > { %v2852_v12 = vrot.slane %v2847_v9, %v4561_v27  ;;  %v3088_v9 = vrot.slane %v3083_v38, %v4593_v56 }
 0x424   : > { %2431 = vperm.xlu1 %4230, %v2425_v11   ;;  %v2786_v11 = vrot.slane %v2781_v55, %v4561_v27 }
 0x425   : > { %2363 = vrot.lane.b32.xlu0 %v2348_v13, %s5667_s25  ;;  %v2779_v13 = vrot.slane %v2774_v59, %v4561_v27 }
 0x428   : > { %2441 = vperm.xlu1 %4230, %v2427_v7   ;;  %v2936_v7 = vshrl.u32 %v4010_v63, 16 }
 0x429   : > { %2436 = vperm.xlu0 %4229, %v2426_v16   ;;  %v2928_v16 = vshrl.u32 %v4009_v8, 16 }
 0x42a   : > { %v2937_v31 = vpack.i.b16 %v2936_v7, %v2936_v7 }
 0x42b   : > { %v2929_v6 = vpack.i.b16 %v2928_v16, %v2928_v16 }
 0x42c   : > { %2643 = vrot.lane.b32.xlu1 %v2633_v53, %s5667_s25  ;;  %v2942_v41 = vrot.slane %v2937_v31, %v4574_v44  ;;  %v4016_v53 = vcombine.high %v3141_v47, %v3141_v47 }
 0x42d   : > { %2446 = vperm.xlu0 %4229, %v2428_v21   ;;  %v2995_v21 = vld [vmem:[%s5625_s1] sm:$0x88]  ;;  %v2934_v45 = vrot.slane %v2929_v6, %v4574_v44  ;;  %v3075_v44 = vpack.i.b16 %v3074_v5, %v3074_v5 }
 0x42e   : > { %v4012_v32 = vcombine.high %v2995_v21, %v2995_v21  ;;  %v4011_v15 = vcombine.low %v2995_v21, %v2995_v21  ;;  %v3155_v63 = vpack.i.b16 %v4016_v53, %v4016_v53 }
 0x430   : > { %2717 = vrot.lane.b32.xlu1 %v2706_v42, %s5668_s16  ;;  %v3009_v37 = vpack.i.b16 %v4012_v32, %v4012_v32  ;;  %v3002_v19 = vpack.i.b16 %v4011_v15, %v4011_v15 }
 0x431   : > { %2645 = vrot.lane.b32.xlu0 %v2640_v52, %s5667_s25 }
 0x432   : > { %v3014_v52 = vrot.slane %v3009_v37, %v4593_v56  ;;  %v3007_v59 = vrot.slane %v3002_v19, %v4593_v56 }
 0x434   : > { %2789 = vrot.lane.b32.xlu1 %v2779_v13, %s5669_s22  ;;  %v3148_v13 = vpack.i.b16 %v4015_v35, %v4015_v35 }
 0x435   : > { %2719 = vrot.lane.b32.xlu0 %v2714_v61, %s5668_s16 }
 0x436   : > { %v3153_v21 = vrot.slane %v3148_v13, %v4543_v14 }
 0x438   : > { %2863 = vrot.lane.b32.xlu1 %v2852_v12, %s5670_s29 }
 0x439   : > { %2791 = vrot.lane.b32.xlu0 %v2786_v11, %s5669_s22  ;;  %v3080_v11 = vrot.slane %v3075_v44, %v4593_v56 }
 0x43c   : > { %2945 = vrot.lane.b32.xlu1 %v2934_v45, %s5671_s12 }
 0x43d   : > { %2865 = vrot.lane.b32.xlu0 %v2860_v26, %s5670_s29 }
 0x440   : > { %3017 = vrot.lane.b32.xlu1 %v3007_v59, %s5672_s15 }
 0x441   : > { %2947 = vrot.lane.b32.xlu0 %v2942_v41, %s5671_s12 }
 0x442   : > { %v1840_v29 = vpop.permute.xlu1 %1839 }
 0x443   : > { %v1842_v55 = vpop.permute.xlu0 %1841  ;;  %v1849_v42 = vsel %vm445_vm7, %v5099_v43, %v1840_v29  ;;  %v3160_v43 = vrot.slane %v3155_v63, %v4543_v14 }
 0x444   : > { %v1850_v61 = vsel %vm445_vm7, %v1840_v29, %v1842_v55  ;;  %3091 = vrot.lane.b32.xlu1 %v3080_v11, %s5673_s24 }
 0x445   : > { %2485 = vmatprep.subr.bf16.mxu0 %v1850_v61  ;;  %3019 = vrot.lane.b32.xlu0 %v3014_v52, %s5672_s15 }
 0x446   : > { %2486 = vmatpush1.bf16.msra.mxu0 %v1849_v42  ;;  %v1914_v8 = vpop.permute.xlu1 %1913 }
 0x447   : > { %v1916_v54 = vpop.permute.xlu0 %1915  ;;  %v1923_v31 = vsel %vm503_vm6, %v5108_v49, %v1914_v8 }
 0x448   : > { %3163 = vrot.lane.b32.xlu1 %v3153_v21, %s5674_s30  ;;  %v1924_v32 = vsel %vm503_vm6, %v1914_v8, %v1916_v54 }
 0x449   : > { %3093 = vrot.lane.b32.xlu0 %v3088_v9, %s5673_s24 }
 0x44a   : > { %v1986_v7 = vpop.permute.xlu1 %1985 }
 0x44b   : > { %v1988_v16 = vpop.permute.xlu0 %1987  ;;  %v1995_v46 = vsel %vm556_vm1, %v5186_v39, %v1986_v7 }
 0x44d   : > { %3165 = vrot.lane.b32.xlu0 %v3160_v43, %s5674_s30 }
 0x44e   : > { %v1848_v24 = vpop.permute.xlu1 %1847 }
 0x44f   : > { %v1846_v26 = vpop.permute.xlu0 %1845 }
 0x450   : > { %v1851_v56 = vsel %vm445_vm7, %v5110_v50, %v1846_v26  ;;  %v1852_v12 = vsel %vm445_vm7, %v1846_v26, %v1848_v24  ;;  %v1996_v50 = vsel %vm556_vm1, %v1986_v7, %v1988_v16 }
 0x451   : > { %2487 = vmatprep.subr.bf16.mxu0 %v1852_v12 }
 0x452   : > { %2488 = vmatpush1.bf16.msra.mxu0 %v1851_v56  ;;  %v2060_v15 = vpop.permute.xlu1 %2059 }
 0x453   : > { %v1990_v36 = vpop.permute.xlu0 %1989  ;;  %2489 = vmatprep.subr.bf16.mxu0 %v1924_v32 }
 0x456   : > { %2490 = vmatpush1.bf16.msra.mxu0 %v1923_v31  ;;  %v1922_v6 = vpop.permute.xlu1 %1921 }
 0x457   : > { %v1920_v30 = vpop.permute.xlu0 %1919 }
 0x458   : > { %v1925_v37 = vsel %vm503_vm6, %v1918_v40, %v1920_v30  ;;  %v1926_v19 = vsel %vm503_vm6, %v1920_v30, %v1922_v6 }
 0x459   : > { %2491 = vmatprep.subr.bf16.mxu0 %v1926_v19 }
 0x45a   : > { %2492 = vmatpush1.bf16.msra.mxu0 %v1925_v37  ;;  %v2058_v41 = vpop.permute.xlu1 %2057 }
 0x45b   : > { %v1992_v45 = vpop.permute.xlu0 %1991  ;;  %2493 = vmatprep.subr.bf16.mxu0 %v1996_v50  ;;  %v2069_v29 = vsel %vm614_vm5, %v2058_v41, %v2060_v15  ;;  %v4291_v41 = vld [vmem:[%s5631_s7] ss:$12 sps:$4 sm:$0xff]  }
 0x45c   : > { %v1997_v52 = vsel %vm556_vm1, %v1990_v36, %v1992_v45 }
 0x45e   : > { %2494 = vmatpush1.bf16.msra.mxu0 %v1995_v46  ;;  %v1994_v5 = vpop.permute.xlu1 %1993 }
 0x45f   : > { %v2062_v49 = vpop.permute.xlu0 %2061  ;;  %v1998_v47 = vsel %vm556_vm1, %v1992_v45, %v1994_v5  ;;  %v4294_v45 = vld [vmem:[%s5631_s7 + $0x1c] ss:$12 sps:$4 sm:$0xff]  }
 0x460   : > { %2495 = vmatprep.subr.bf16.mxu0 %v1998_v47  ;;  %v2070_v40 = vsel %vm614_vm5, %v2060_v15, %v2062_v49 }
 0x462   : > { %2496 = vmatpush1.bf16.msra.mxu0 %v1997_v52  ;;  %v2142_v53 = vpop.permute.xlu1 %2141 }
 0x463   : > { %v2066_v35 = vpop.permute.xlu0 %2065  ;;  %2497 = vmatprep.subr.bf16.mxu0 %v2070_v40 }
 0x466   : > { %2498 = vmatpush1.bf16.msra.mxu0 %v2069_v29  ;;  %v2068_v55 = vpop.permute.xlu1 %2067 }
 0x467   : > { %v2064_v59 = vpop.permute.xlu0 %2063  ;;  %v2072_v39 = vsel %vm614_vm5, %v2066_v35, %v2068_v55 }
 0x468   : > { %v2071_v38 = vsel %vm614_vm5, %v2064_v59, %v2066_v35  ;;  %2499 = vmatprep.subr.bf16.mxu0 %v2072_v39  ;;  %v4296_v35 = vld [vmem:[%s5631_s7 + $0x18] ss:$12 sps:$4 sm:$0xff]   ;;  %v4297_v59 = vld [vmem:[%s5631_s7 + $0x8] ss:$12 sps:$4 sm:$0xff]  }
 0x46a   : > { %2500 = vmatpush1.bf16.msra.mxu0 %v2071_v38  ;;  %v2140_v44 = vpop.permute.xlu1 %2139  ;;  %v4298_v38 = vld [vmem:[%s5631_s7 + $0x20] ss:$12 sps:$4 sm:$0xff]  }
 0x46b   : > { %v2144_v61 = vpop.permute.xlu0 %2143  ;;  %2501 = vmatprep.subr.bf16.mxu0 %v5035_v57  ;;  %v2151_v11 = vsel %vm594_vm4, %v2140_v44, %v2142_v53 }
 0x46c   : > { %v2152_v8 = vsel %vm594_vm4, %v2142_v53, %v2144_v61 }
 0x46e   : > { %2502 = vmatpush1.bf16.msra.mxu0 %v5033_v10  ;;  %v2150_v42 = vpop.permute.xlu1 %2149 }
 0x46f   : > { %v2146_v63 = vpop.permute.xlu0 %2145  ;;  %2503 = vmatprep.subr.bf16.mxu0 %v5048_v51 }
 0x472   : > { %2504 = vmatpush1.bf16.msra.mxu0 %v5043_v17  ;;  %v2214_v54 = vpop.permute.xlu1 %2213 }
 0x473   : > { %v2216_v9 = vpop.permute.xlu0 %2215  ;;  %2505 = vmatprep.subr.bf16.mxu0 %v2152_v8 }
 0x474   : > { %v2224_v16 = vsel %vm539_vm2, %v2214_v54, %v2216_v9 }
 0x476   : > { %2506 = vmatpush1.bf16.msra.mxu0 %v2151_v11  ;;  %v2212_v13 = vpop.permute.xlu1 %2211 }
 0x477   : > { %v2148_v7 = vpop.permute.xlu0 %2147  ;;  %v2223_v17 = vsel %vm539_vm2, %v2212_v13, %v2214_v54 }
 0x478   : > { %v2153_v57 = vsel %vm594_vm4, %v2146_v63, %v2148_v7  ;;  %v2154_v10 = vsel %vm594_vm4, %v2148_v7, %v2150_v42 }
 0x479   : > { %2507 = vmatprep.subr.bf16.mxu0 %v2154_v10 }
 0x47a   : > { %2508 = vmatpush1.bf16.msra.mxu0 %v2153_v57  ;;  %v2222_v51 = vpop.permute.xlu1 %2221 }
 0x47b   : > { %v2218_v43 = vpop.permute.xlu0 %2217  ;;  %2509 = vmatprep.subr.bf16.mxu0 %v2224_v16 }
 0x47e   : > { %2510 = vmatpush1.bf16.msra.mxu0 %v2223_v17  ;;  %v2288_v21 = vpop.permute.xlu1 %2287 }
 0x47f   : > { %v2220_v24 = vpop.permute.xlu0 %2219 }
 0x480   : > { %v2225_v26 = vsel %vm539_vm2, %v2218_v43, %v2220_v24  ;;  %v2226_v56 = vsel %vm539_vm2, %v2220_v24, %v2222_v51 }
 0x481   : > { %2511 = vmatprep.subr.bf16.mxu0 %v2226_v56 }
 0x482   : > { %2512 = vmatpush1.bf16.msra.mxu0 %v2225_v26  ;;  %v2286_v12 = vpop.permute.xlu1 %2285 }
 0x483   : > { %v2290_v32 = vpop.permute.xlu0 %2289  ;;  %v2297_v36 = vsel %vm483_vm3, %v2286_v12, %v2288_v21 }
 0x484   : > { %v2298_v15 = vsel %vm483_vm3, %v2288_v21, %v2290_v32 }
 0x485   : > { %2513 = vmatprep.subr.bf16.mxu0 %v2298_v15 }
 0x486   : > { %2514 = vmatpush1.bf16.msra.mxu0 %v2297_v36  ;;  %v2296_v31 = vpop.permute.xlu1 %2295 }
 0x487   : > { %v2294_v6 = vpop.permute.xlu0 %2293 }
 0x488   : > { %v2300_v30 = vsel %vm483_vm3, %v2294_v6, %v2296_v31 }
 0x489   : > { %2515 = vmatprep.subr.bf16.mxu0 %v2300_v30 }
 0x48a   : > { %v2360_v37 = vpop.permute.xlu1 %2359 }
 0x48b   : > { %v2292_v19 = vpop.permute.xlu0 %2291 }
 0x48c   : > { %v2299_v50 = vsel %vm483_vm3, %v2292_v19, %v2294_v6 }
 0x48d   : > { %2516 = vmatpush1.bf16.msra.mxu0 %v2299_v50 }
 0x48e   : > { %v2358_v46 = vpop.permute.xlu1 %2357 }
 0x48f   : > { %v2362_v5 = vpop.permute.xlu0 %2361  ;;  %v2369_v47 = vsel %vm428_vm0, %v2358_v46, %v2360_v37 }
 0x490   : > { %v2370_v49 = vsel %vm428_vm0, %v2360_v37, %v2362_v5  ;;  %2518 = vmatmul.mubr.bf16.vlgmr.msra.gmra.mrb[16].mxu0 %v4291_v41 }
 0x491   : > { %2538 = vmatprep.subr.bf16.mxu0 %v2370_v49  ;;  %2527 = vmatprep.mubr.bf16.mxu0 %v4294_v45 }
 0x492   : > { %2539 = vmatpush1.bf16.msra.mxu0 %v2369_v47  ;;  %v2368_v52 = vpop.permute.xlu1 %2367 }
 0x493   : > { %v2366_v40 = vpop.permute.xlu0 %2365 }
 0x494   : > { %v2372_v53 = vsel %vm428_vm0, %v2366_v40, %v2368_v52 }
 0x495   : > { %2540 = vmatprep.subr.bf16.mxu0 %v2372_v53 }
 0x497   : > { %v2364_v29 = vpop.permute.xlu0 %2363 }
 0x498   : > { %v2371_v55 = vsel %vm428_vm0, %v2364_v29, %v2366_v40  ;;  %2528 = vmatmul.mubr.bf16.gmra.mrb[20].mxu0 %v4296_v35 }
 0x499   : > { %2541 = vmatpush1.bf16.msra.mxu0 %v2371_v55  ;;  %2570 = vmatprep.mubr.bf16.mxu0 %v5008_v48 }
 0x4a0   : > { %3999 = vmatmul.mubr.msk.bf16.vlgmr.msra.gmra.mrb[16].mxu0 %vm1660_vm10, %v4297_v59 }
 0x4a1   : > { %2580 = vmatprep.mubr.bf16.mxu0 %v5008_v48 }
 0x4a3   : > { %v2432_v39 = vpop.permute.xlu1 %2431 }
 0x4a7   : > { %v2442_v44 = vpop.permute.xlu1 %2441 }
 0x4a8   : > { %4000 = vmatmul.mubr.msk.bf16.gmra.mrb[20].mxu0 %vm1660_vm10, %v4298_v38  ;;  %v2437_v7 = vpop.permute.xlu0 %2436 }
 0x4a9   : > { %3660 = vmatprep.mubr.bf16.mxu0 %v5008_v48 }
 0x4ab   : > { %v2644_v61 = vpop.permute.xlu1 %2643 }
 0x4ac   : > { %v2651_v42 = vmul.bf16 %v5008_v48, %v2644_v61  ;;  %v2447_v17 = vpop.permute.xlu0 %2446 }
 0x4ae   : > { %2669 = vrot.lane.b32.xlu0 %v2651_v42, %s5674_s30  ;;  %2663 = vrot.lane.b32.xlu1 %v2651_v42, %s5674_s30 }
 0x4af   : > { %v2718_v63 = vpop.permute.xlu1 %2717 }
 0x4b0   : > { %v2725_v8 = vmul.bf16 %v5008_v48, %v2718_v63  ;;  %v2646_v36 = vpop.permute.xlu0 %2645 }
 0x4b1   : > { %v2647_v5 = vsel %vm428_vm0, %v2644_v61, %v2646_v36 }
 0x4b2   : > { %2743 = vrot.lane.b32.xlu0 %v2725_v8, %s5673_s24  ;;  %2737 = vrot.lane.b32.xlu1 %v2725_v8, %s5673_s24 }
 0x4b3   : > { %v2790_v54 = vpop.permute.xlu1 %2789 }
 0x4b4   : > { %v2797_v9 = vmul.bf16 %v5008_v48, %v2790_v54 }
 0x4b6   : > { %2815 = vrot.lane.b32.xlu0 %v2797_v9, %s5672_s15  ;;  %2809 = vrot.lane.b32.xlu1 %v2797_v9, %s5672_s15 }
 0x4b7   : > { %v5278_v11 = vpop.permute.xlu1 %2863 }
 0x4b8   : > { %v2871_v13 = vmul.bf16 %v5008_v48, %v5278_v11 }
 0x4ba   : > { %2889 = vrot.lane.b32.xlu0 %v2871_v13, %s5671_s12  ;;  %2883 = vrot.lane.b32.xlu1 %v2871_v13, %s5671_s12 }
 0x4bb   : > { %v2946_v42 = vpop.permute.xlu1 %2945 }
 0x573   : > { %v2572_v57 = vpop.f32.mrb[16].mxu0 }
 0x574   : > { %v4101_v10 = vadd.f32 %v2572_v57, %v2432_v39  ;;  %v2574_v16 = vpop.f32.mrb[17].mxu0 }
 0x575   : > { %v4102_v51 = vadd.f32 %v2574_v16, %v2432_v39  ;;  %v2576_v43 = vpop.f32.mrb[18].mxu0 }
 0x576   : > { %v2591_v21 = vadd.f32 %v4101_v10, %v954_v1  ;;  %v4103_v24 = vadd.f32 %v2576_v43, %v2437_v7  ;;  %v2578_v26 = vpop.f32.mrb[19].mxu0 }
 0x577   : > { %v2592_v56 = vadd.f32 %v4102_v51, %v955_v3  ;;  %v4104_v12 = vadd.f32 %v2578_v26, %v2437_v7 }
 0x578   : > { %v2593_v32 = vadd.f32 %v4103_v24, %v956_v2  ;;  %v2599_v31 = vmax.f32 %v2591_v21, 0.0 }
 0x579   : > { %v2594_v15 = vadd.f32 %v4104_v12, %v957_v4  ;;  %v2600_v30 = vmax.f32 %v2592_v56, 0.0  ;;  %v2720_v4 = vpop.permute.xlu0 %2719 }
 0x57a   : > { %v2601_v6 = vmax.f32 %v2593_v32, 0.0  ;;  %v2721_v22 = vsel %vm483_vm3, %v2718_v63, %v2720_v4 }
 0x57b   : > { %v2602_v37 = vmax.f32 %v2594_v15, 0.0  ;;  %v2582_v19 = vpop.f32.mrb[20].mxu0 }
 0x57c   : > { %v5292_v58 = vpack.c.bf16 %v2601_v6, %v2599_v31  ;;  %v4105_v1 = vadd.f32 %v2582_v19, %v2442_v44  ;;  %v2584_v50 = vpop.f32.mrb[21].mxu0  ;;  %v5362_v6 = vld [vmem:[#allocation2] sm:$0xff] }
 0x57d   : > { %v5294_v41 = vpack.c.bf16 %v2602_v37, %v2600_v30  ;;  %v4106_v60 = vadd.f32 %v2584_v50, %v2442_v44  ;;  %v2586_v3 = vpop.f32.mrb[22].mxu0  ;;  %v2792_v20 = vpop.permute.xlu0 %2791 }
 0x57e   : > { %2611 = vst [vmem:[#allocation2 + $0x8] sm:$0xff] %v5292_v58  ;;  %v2588_v62 = vpop.f32.mrb[23].mxu0  ;;  %v2595_v0 = vadd.f32 %v4105_v1, %v958_v34  ;;  %v4107_v2 = vadd.f32 %v2586_v3, %v2447_v17  ;;  %v2652_v52 = vmul.bf16 %v2647_v5, %v5292_v58  ;;  %v2726_v18 = vmul.bf16 %v2721_v22, %v5292_v58 }
 0x57f   : > { %2612 = vst [vmem:[#allocation2 + $0x10] sm:$0xff] %v5294_v41  ;;  %v2596_v45 = vadd.f32 %v4106_v60, %v959_v33  ;;  %v4108_v46 = vadd.f32 %v2588_v62, %v2447_v17  ;;  %v2653_v40 = vmul.bf16 %v2646_v36, %v5294_v41  ;;  %v2793_v29 = vsel %vm539_vm2, %v2790_v54, %v2792_v20  ;;  %v3018_v17 = vpop.permute.xlu1 %3017 }
 0x580   : > { %v2597_v49 = vadd.f32 %v4107_v2, %v960_v28  ;;  %v2603_v23 = vmax.f32 %v2595_v0, 0.0  ;;  %2665 = vrot.lane.b32.xlu1 %v2652_v52, %s5674_s30  ;;  %v2798_v55 = vmul.bf16 %v2793_v29, %v5292_v58  ;;  %v2799_v59 = vmul.bf16 %v2792_v20, %v5294_v41 }
 0x581   : > { %v2598_v47 = vadd.f32 %v4108_v46, %v961_v25  ;;  %v2604_v53 = vmax.f32 %v2596_v45, 0.0  ;;  %2667 = vrot.lane.b32.xlu0 %v2653_v40, %s5674_s30  ;;  %v2727_v25 = vmul.bf16 %v2720_v4, %v5294_v41  ;;  %v2866_v39 = vpop.permute.xlu0 %2865  ;;  %v2953_v10 = vmul.bf16 %v2946_v42, %v5292_v58  ;;  %v4317_v46 = vld [vmem:[%s5633_s9 + $0x4] ss:$12 sps:$4 sm:$0xff]  }
 0x582   : > { %v2605_v34 = vmax.f32 %v2597_v49, 0.0  ;;  %v2867_v38 = vsel %vm594_vm4, %v5278_v11, %v2866_v39  ;;  %v2873_v61 = vmul.bf16 %v2866_v39, %v5294_v41  ;;  %v3025_v19 = vmul.bf16 %v3018_v17, %v5292_v58  ;;  %3547 = vmatprep.mubr.bf16.mxu1 %v4317_v46  ;;  %v3275_v40 = vld [vmem:[%s5634_s10] sm:$0xff] }
 0x583   : > { %v2606_v35 = vmax.f32 %v2598_v47, 0.0  ;;  %v2872_v44 = vmul.bf16 %v2867_v38, %v5292_v58  ;;  %v3092_v56 = vpop.permute.xlu1 %3091 }
 0x584   : > { %v5312_v33 = vpack.c.bf16 %v2605_v34, %v2603_v23  ;;  %2739 = vrot.lane.b32.xlu1 %v2726_v18, %s5673_s24  ;;  %v3099_v0 = vmul.bf16 %v3092_v56, %v5292_v58  ;;  %v3276_v23 = vld [vmem:[%s5634_s10 + $0x8] sm:$0xff]  ;;  %v3277_v34 = vld [vmem:[%s5634_s10 + $0x10] sm:$0xff]  ;;  %v3282_v18 = vld [vmem:[%s5634_s10 + $0x38] sm:$0xff] }
 0x585   : > { %v5314_v28 = vpack.c.bf16 %v2606_v35, %v2604_v53  ;;  %2741 = vrot.lane.b32.xlu0 %v2727_v25, %s5673_s24  ;;  %v2948_v63 = vpop.permute.xlu0 %2947  ;;  %v3278_v53 = vld [vmem:[%s5634_s10 + $0x18] sm:$0xff]  ;;  %v3279_v35 = vld [vmem:[%s5634_s10 + $0x20] sm:$0xff] }
 0x586   : > { %v2655_v54 = vmul.bf16 %v2647_v5, %v5312_v33  ;;  %v2949_v9 = vsel %vm614_vm5, %v2946_v42, %v2948_v63  ;;  %v2729_v13 = vmul.bf16 %v2721_v22, %v5312_v33  ;;  %v2801_v57 = vmul.bf16 %v2793_v29, %v5312_v33  ;;  %v3280_v22 = vld [vmem:[%s5634_s10 + $0x28] sm:$0xff] }
 0x587   : > { %v2656_v8 = vmul.bf16 %v2646_v36, %v5314_v28  ;;  %v2954_v11 = vmul.bf16 %v2949_v9, %v5294_v41  ;;  %v2730_v7 = vmul.bf16 %v2720_v4, %v5314_v28  ;;  %v2875_v16 = vmul.bf16 %v2867_v38, %v5312_v33  ;;  %v3164_v30 = vpop.permute.xlu1 %3163 }
 0x588   : > { %2811 = vrot.lane.b32.xlu1 %v2798_v55, %s5672_s15  ;;  %v2955_v51 = vmul.bf16 %v5008_v48, %v2948_v63  ;;  %v2802_v43 = vmul.bf16 %v2792_v20, %v5314_v28  ;;  %v2956_v24 = vmul.bf16 %v2946_v42, %v5312_v33  ;;  %v2876_v32 = vmul.bf16 %v2866_v39, %v5314_v28  ;;  %v3281_v20 = vld [vmem:[%s5634_s10 + $0x30] sm:$0xff]  ;;  %v3283_v55 = vld [vmem:[%s5634_s10 + $0x40] sm:$0xff]  ;;  %v3288_v63 = vld [vmem:[%s5634_s10 + $0x68] sm:$0xff] }
 0x589   : > { %2813 = vrot.lane.b32.xlu0 %v2799_v59, %s5672_s15  ;;  %v3020_v21 = vpop.permute.xlu0 %3019  ;;  %v3028_v31 = vmul.bf16 %v3018_v17, %v5312_v33  ;;  %v2957_v62 = vmul.bf16 %v2949_v9, %v5314_v28  ;;  %v3171_v2 = vmul.bf16 %v3164_v30, %v5292_v58  ;;  %v3102_v5 = vmul.bf16 %v3092_v56, %v5312_v33  ;;  %v3284_v59 = vld [vmem:[%s5634_s10 + $0x48] sm:$0xff]  ;;  %v3287_v42 = vld [vmem:[%s5634_s10 + $0x60] sm:$0xff]  ;;  %v3289_v9 = vld [vmem:[%s5634_s10 + $0x70] sm:$0xff] }
 0x58a   : > { %v3027_v26 = vmul.bf16 %v5008_v48, %v3020_v21  ;;  %v3021_v15 = vsel %vm556_vm1, %v3018_v17, %v3020_v21  ;;  %v3174_v52 = vmul.bf16 %v3164_v30, %v5312_v33 }
 0x58b   : > { %v3026_v36 = vmul.bf16 %v3021_v15, %v5294_v41  ;;  %v3029_v45 = vmul.bf16 %v3021_v15, %v5314_v28  ;;  %v2664_v25 = vpop.permute.xlu1 %2663 }
 0x58c   : > { %2885 = vrot.lane.b32.xlu1 %v2872_v44, %s5671_s12  ;;  %v3285_v44 = vld [vmem:[%s5634_s10 + $0x50] sm:$0xff] }
 0x58d   : > { %2887 = vrot.lane.b32.xlu0 %v2873_v61, %s5671_s12  ;;  %v3094_v12 = vpop.permute.xlu0 %3093  ;;  %v3286_v61 = vld [vmem:[%s5634_s10 + $0x58] sm:$0xff] }
 0x58e   : > { %v3101_v48 = vmul.bf16 %v5362_v6, %v3094_v12  ;;  %v3095_v60 = vsel %vm503_vm6, %v3092_v56, %v3094_v12 }
 0x58f   : > { %v3100_v3 = vmul.bf16 %v3095_v60, %v5294_v41  ;;  %v3103_v49 = vmul.bf16 %v3095_v60, %v5314_v28  ;;  %v2738_v39 = vpop.permute.xlu1 %2737 }
 0x590   : > { %2673 = vrot.lane.b32.xlu1 %v2656_v8, %s5674_s30 }
 0x591   : > { %2671 = vrot.lane.b32.xlu0 %v2655_v54, %s5674_s30  ;;  %v3166_v37 = vpop.permute.xlu0 %3165 }
 0x592   : > { %v3167_v1 = vsel %vm445_vm7, %v3164_v30, %v3166_v37  ;;  %v3173_v4 = vmul.bf16 %v5362_v6, %v3166_v37 }
 0x593   : > { %v3172_v50 = vmul.bf16 %v3167_v1, %v5294_v41  ;;  %v3175_v47 = vmul.bf16 %v3167_v1, %v5314_v28  ;;  %v2810_v8 = vpop.permute.xlu1 %2809 }
 0x594   : > { %2967 = vrot.lane.b32.xlu1 %v2954_v11, %s5670_s29  ;;  %v3290_v11 = vld [vmem:[%s5634_s10 + $0x78] sm:$0xff] }
 0x595   : > { %2745 = vrot.lane.b32.xlu0 %v2729_v13, %s5673_s24  ;;  %v2670_v29 = vpop.permute.xlu0 %2669 }
 0x597   : > { %v2884_v13 = vpop.permute.xlu1 %2883 }
 0x598   : > { %2747 = vrot.lane.b32.xlu1 %v2730_v7, %s5673_s24 }
 0x599   : > { %2817 = vrot.lane.b32.xlu0 %v2801_v57, %s5672_s15  ;;  %v2744_v38 = vpop.permute.xlu0 %2743 }
 0x59c   : > { %2965 = vrot.lane.b32.xlu1 %v2953_v10, %s5670_s29 }
 0x59d   : > { %2891 = vrot.lane.b32.xlu0 %v2875_v16, %s5671_s12  ;;  %v2816_v54 = vpop.permute.xlu0 %2815 }
 0x5a0   : > { %2819 = vrot.lane.b32.xlu1 %v2802_v43, %s5672_s15  ;;  %s4353_s15 = sshll.u32 %s4422_s21, 4  ;;  %s4354_s15 = int_to_ptr.vmem [resolvable:$false] %s4353_s15 }
 0x5a1   : > { %2969 = vrot.lane.b32.xlu0 %v2955_v51, %s5670_s29  ;;  %v2890_v7 = vpop.permute.xlu0 %2889 }
 0x5a4   : > { %2975 = vrot.lane.b32.xlu1 %v2955_v51, %s5670_s29 }
 0x5a5   : > { %2971 = vrot.lane.b32.xlu0 %v2956_v24, %s5670_s29 }
 0x5a8   : > { %2893 = vrot.lane.b32.xlu1 %v2876_v32, %s5671_s12 }
 0x5a9   : > { %3041 = vrot.lane.b32.xlu0 %v3027_v26, %s5669_s22 }
 0x5ac   : > { %3039 = vrot.lane.b32.xlu1 %v3026_v36, %s5669_s22 }
 0x5ad   : > { %3043 = vrot.lane.b32.xlu0 %v3028_v31, %s5669_s22 }
 0x5b0   : > { %3037 = vrot.lane.b32.xlu1 %v3025_v19, %s5669_s22 }
 0x5b1   : > { %3115 = vrot.lane.b32.xlu0 %v3101_v48, %s5668_s16 }
 0x5b4   : > { %3047 = vrot.lane.b32.xlu1 %v3027_v26, %s5669_s22 }
 0x5b5   : > { %3185 = vrot.lane.b32.xlu0 %v3172_v50, %s5667_s25 }
 0x5b8   : > { %3113 = vrot.lane.b32.xlu1 %v3100_v3, %s5668_s16 }
 0x5b9   : > { %2973 = vrot.lane.b32.xlu0 %v2957_v62, %s5670_s29 }
 0x5bc   : > { %3111 = vrot.lane.b32.xlu1 %v3099_v0, %s5668_s16 }
 0x5bd   : > { %3183 = vrot.lane.b32.xlu0 %v3171_v2, %s5667_s25 }
 0x5c0   : > { %3187 = vrot.lane.b32.xlu1 %v3173_v4, %s5667_s25 }
 0x5c1   : > { %3045 = vrot.lane.b32.xlu0 %v3029_v45, %s5669_s22  ;;  %s4355_s22 = scalar_lea.vmem %s4354_s15, 32 }
 0x5c4   : > { %3117 = vrot.lane.b32.xlu1 %v3102_v5, %s5668_s16 }
 0x5c5   : > { %3121 = vrot.lane.b32.xlu0 %v3101_v48, %s5668_s16 }
 0x5c8   : > { %3119 = vrot.lane.b32.xlu1 %v3103_v49, %s5668_s16 }
 0x5c9   : > { %3191 = vrot.lane.b32.xlu0 %v3175_v47, %s5667_s25 }
 0x5cc   : > { %3193 = vrot.lane.b32.xlu1 %v3173_v4, %s5667_s25 }
 0x5cd   : > { %3189 = vrot.lane.b32.xlu0 %v3174_v52, %s5667_s25  ;;  %s377_s25 = sand.u32 1, %s4403_s18  }
 0x5ce   : > { %s378_s6 = scalar_lea.vmem [#allocation4], %s377_s25  ;;  %s3857_s14 = scalar_lea.sflag [#allocation5], %s377_s25 }
 0x5cf   : > { %s3869_s19 = sshll.u32 %s378_s6, 4  ;;  %s5579_s19 = int_to_ptr.vmem [resolvable:$true] %s3869_s19 }
 0x5d0   : > { %3293 = vperm.xlu1 %4230, %v3275_v40   ;;  %s4349_s12 = scalar_lea.vmem %s5579_s19, 16  ;;  %p4356_p0 = scmp.lt.s32.totalorder %s5579_s19, %s4354_s15 }
 0x5d1   : > { %3298 = vperm.xlu0 %4229, %v3276_v23   ;;  %p4350_p11 = scmp.ne.s32.totalorder %s5579_s19, %s4349_s12  ;;  %p4357_p1 = scmp.lt.s32.totalorder %s4355_s22, %s4349_s12 }
 0x5d3   : > { %p4351_p12 = pnand %p4350_p11, %p4521_p5  ;;  %p4358_p2 = por %p4357_p1, %p4356_p0 }
 0x5d4   : > { %3303 = vperm.xlu1 %4230, %v3277_v34  }
 0x5d5   : > { %3308 = vperm.xlu0 %4229, %v3278_v53   ;;  %p4352_p13 = pneg %p4351_p12 }
 0x5d7   : > { %p4359_p3 = pnand %p4358_p2, %p4352_p13 }
 0x5d8   : > { %3313 = vperm.xlu1 %4230, %v3279_v35  }
 0x5d9   : > { %3318 = vperm.xlu0 %4229, %v3280_v22  }
 0x5dc   : > { %3323 = vperm.xlu1 %4230, %v3281_v20  }
 0x5dd   : > { %3328 = vperm.xlu0 %4229, %v3282_v18  }
 0x5e0   : > { %3333 = vperm.xlu1 %4230, %v3283_v55  }
 0x5e1   : > { %3338 = vperm.xlu0 %4229, %v3284_v59  }
 0x5e4   : > { %3343 = vperm.xlu1 %4230, %v3285_v44  }
 0x5e5   : > { %3348 = vperm.xlu0 %4229, %v3286_v61  }
 0x5e8   : > { %3353 = vperm.xlu1 %4230, %v3287_v42  }
 0x5e9   : > { %3358 = vperm.xlu0 %4229, %v3288_v63  }
 0x5ec   : > { %3363 = vperm.xlu1 %4230, %v3289_v9  }
 0x5ed   : > { %3368 = vperm.xlu0 %4229, %v3290_v11  }
 0x5f2   : > { %v2666_v57 = vpop.permute.xlu1 %2665 }
 0x5f3   : > { %v2668_v10 = vpop.permute.xlu0 %2667  ;;  %v2675_v16 = vsel %vm445_vm7, %v2664_v25, %v2666_v57 }
 0x5f4   : > { %v2676_v51 = vsel %vm445_vm7, %v2666_v57, %v2668_v10  ;;  %2683 = vst [vmem:[#allocation3] sm:$0xff] %v2675_v16 }
 0x5f5   : > { %2684 = vst [vmem:[#allocation3 + $0x8] sm:$0xff] %v2676_v51  ;;  %3515 = vmatprep.subr.bf16.mxu1 %v2676_v51 }
 0x5f6   : > { %3516 = vmatpush1.bf16.msra.mxu1 %v2675_v16  ;;  %v2740_v43 = vpop.permute.xlu1 %2739 }
 0x5f7   : > { %v2742_v17 = vpop.permute.xlu0 %2741  ;;  %v2749_v21 = vsel %vm503_vm6, %v2738_v39, %v2740_v43 }
 0x5f8   : > { %v2750_v24 = vsel %vm503_vm6, %v2740_v43, %v2742_v17  ;;  %2757 = vst [vmem:[#allocation3 + $0x20] sm:$0xff] %v2749_v21 }
 0x5f9   : > { %2758 = vst [vmem:[#allocation3 + $0x28] sm:$0xff] %v2750_v24 }
 0x5fa   : > { %v2812_v26 = vpop.permute.xlu1 %2811 }
 0x5fb   : > { %v2814_v56 = vpop.permute.xlu0 %2813  ;;  %v2821_v12 = vsel %vm556_vm1, %v2810_v8, %v2812_v26 }
 0x5fc   : > { %v2822_v32 = vsel %vm556_vm1, %v2812_v26, %v2814_v56  ;;  %2829 = vst [vmem:[#allocation3 + $0x40] sm:$0xff] %v2821_v12  ;;  %v4319_v26 = vld [vmem:[%s5633_s9 + $0x1c] ss:$12 sps:$4 sm:$0xff]  }
 0x5fd   : > { %2830 = vst [vmem:[#allocation3 + $0x48] sm:$0xff] %v2822_v32 }
 0x5fe   : > { %v2886_v15 = vpop.permute.xlu1 %2885 }
 0x5ff   : > { %v2888_v36 = vpop.permute.xlu0 %2887  ;;  %v2895_v31 = vsel %vm614_vm5, %v2884_v13, %v2886_v15 }
 0x600   : > { %v2896_v48 = vsel %vm614_vm5, %v2886_v15, %v2888_v36  ;;  %v4318_v36 = vld [vmem:[%s5633_s9 + $0x8] ss:$12 sps:$4 sm:$0xff]  }
 0x602   : > { %v2674_v30 = vpop.permute.xlu1 %2673 }
 0x603   : > { %v2672_v37 = vpop.permute.xlu0 %2671 }
 0x604   : > { %v2677_v19 = vsel %vm445_vm7, %v2670_v29, %v2672_v37  ;;  %v2678_v1 = vsel %vm445_vm7, %v2672_v37, %v2674_v30  ;;  %v4322_v30 = vld [vmem:[%s5633_s9 + $0x20] ss:$12 sps:$4 sm:$0xff]   ;;  %v4325_v37 = vld [vmem:[%s5633_s9 + $0x30] ss:$12 sps:$4 sm:$0xff]  }
 0x605   : > { %2685 = vst [vmem:[#allocation3 + $0x10] sm:$0xff] %v2677_v19  ;;  %2686 = vst [vmem:[#allocation3 + $0x18] sm:$0xff] %v2678_v1  ;;  %3517 = vmatprep.subr.bf16.mxu1 %v2678_v1  ;;  %v4326_v1 = vld [vmem:[%s5633_s9 + $0x38] ss:$12 sps:$4 sm:$0xff]  }
 0x606   : > { %3518 = vmatpush1.bf16.msra.mxu1 %v2677_v19  ;;  %v2968_v50 = vpop.permute.xlu1 %2967  ;;  %v4327_v19 = vld [vmem:[%s5633_s9 + $0x4c] ss:$12 sps:$4 sm:$0xff]  }
 0x607   : > { %v2746_v60 = vpop.permute.xlu0 %2745  ;;  %3519 = vmatprep.subr.bf16.mxu1 %v2750_v24  ;;  %v4315_v24 = vld [vmem:[%s5633_s9] ss:$12 sps:$4 sm:$0xff]  }
 0x608   : > { %v2751_v3 = vsel %vm503_vm6, %v2744_v38, %v2746_v60 }
 0x609   : > { %2759 = vst [vmem:[#allocation3 + $0x30] sm:$0xff] %v2751_v3 }
 0x60a   : > { %3520 = vmatpush1.bf16.msra.mxu1 %v2749_v21  ;;  %v2748_v62 = vpop.permute.xlu1 %2747 }
 0x60b   : > { %v2818_v0 = vpop.permute.xlu0 %2817  ;;  %v2752_v2 = vsel %vm503_vm6, %v2746_v60, %v2748_v62  ;;  %v4331_v60 = vld [vmem:[%s5633_s9 + $0x64] ss:$12 sps:$4 sm:$0xff]   ;;  %v4333_v62 = vld [vmem:[%s5633_s9 + $0x60] ss:$12 sps:$4 sm:$0xff]  }
 0x60c   : > { %v2823_v4 = vsel %vm556_vm1, %v2816_v54, %v2818_v0  ;;  %2760 = vst [vmem:[#allocation3 + $0x38] sm:$0xff] %v2752_v2  ;;  %3521 = vmatprep.subr.bf16.mxu1 %v2752_v2  ;;  %v4334_v2 = vld [vmem:[%s5633_s9 + $0x68] ss:$12 sps:$4 sm:$0xff]  }
 0x60e   : > { %3522 = vmatpush1.bf16.msra.mxu1 %v2751_v3  ;;  %v2966_v45 = vpop.permute.xlu1 %2965  ;;  %v4330_v3 = vld [vmem:[%s5633_s9 + $0x50] ss:$12 sps:$4 sm:$0xff]  }
 0x60f   : > { %v2892_v46 = vpop.permute.xlu0 %2891  ;;  %3523 = vmatprep.subr.bf16.mxu1 %v2822_v32  ;;  %v2977_v5 = vsel %vm594_vm4, %v2966_v45, %v2968_v50  ;;  %v4339_v45 = vld [vmem:[%s5633_s9 + $0x94] ss:$12 sps:$4 sm:$0xff]  }
 0x610   : > { %v2897_v49 = vsel %vm614_vm5, %v2890_v7, %v2892_v46 }
 0x612   : > { %3524 = vmatpush1.bf16.msra.mxu1 %v2821_v12  ;;  %v2820_v47 = vpop.permute.xlu1 %2819 }
 0x613   : > { %v2970_v52 = vpop.permute.xlu0 %2969  ;;  %v2824_v40 = vsel %vm556_vm1, %v2818_v0, %v2820_v47  ;;  %v4335_v0 = vld [vmem:[%s5633_s9 + $0x7c] ss:$12 sps:$4 sm:$0xff]   ;;  %v4342_v47 = vld [vmem:[%s5633_s9 + $0x98] ss:$12 sps:$4 sm:$0xff]  }
 0x614   : > { %v2978_v23 = vsel %vm594_vm4, %v2968_v50, %v2970_v52  ;;  %3525 = vmatprep.subr.bf16.mxu1 %v2824_v40  ;;  %v4329_v50 = vld [vmem:[%s5633_s9 + $0x48] ss:$12 sps:$4 sm:$0xff]   ;;  %v4346_v40 = vld [vmem:[%s5633_s9 + $0xb0] ss:$12 sps:$4 sm:$0xff]  }
 0x615   : > { %v4345_v52 = vld [vmem:[%s5633_s9 + $0xa8] ss:$12 sps:$4 sm:$0xff]  }
 0x616   : > { %3526 = vmatpush1.bf16.msra.mxu1 %v2823_v4  ;;  %v2976_v34 = vpop.permute.xlu1 %2975  ;;  %v4337_v4 = vld [vmem:[%s5633_s9 + $0x78] ss:$12 sps:$4 sm:$0xff]  }
 0x617   : > { %v2972_v53 = vpop.permute.xlu0 %2971  ;;  %3527 = vmatprep.subr.bf16.mxu1 %v2896_v48  ;;  %v4323_v48 = vld [vmem:[%s5633_s9 + $0x34] ss:$12 sps:$4 sm:$0xff]  }
 0x61a   : > { %3528 = vmatpush1.bf16.msra.mxu1 %v2895_v31  ;;  %v2894_v35 = vpop.permute.xlu1 %2893  ;;  %v4321_v31 = vld [vmem:[%s5633_s9 + $0x18] ss:$12 sps:$4 sm:$0xff]  }
 0x61b   : > { %v3042_v22 = vpop.permute.xlu0 %3041  ;;  %v2898_v20 = vsel %vm614_vm5, %v2892_v46, %v2894_v35  ;;  %v4338_v46 = vld [vmem:[%s5633_s9 + $0x80] ss:$12 sps:$4 sm:$0xff]  }
 0x61c   : > { %3529 = vmatprep.subr.bf16.mxu1 %v2898_v20 }
 0x61e   : > { %3530 = vmatpush1.bf16.msra.mxu1 %v2897_v49  ;;  %v3040_v18 = vpop.permute.xlu1 %3039  ;;  %v4343_v49 = vld [vmem:[%s5633_s9 + $0xac] ss:$12 sps:$4 sm:$0xff]  }
 0x61f   : > { %v3044_v25 = vpop.permute.xlu0 %3043  ;;  %3531 = vmatprep.subr.bf16.mxu1 %v5294_v41  ;;  %v3050_v29 = vsel %vm539_vm2, %v3040_v18, %v3042_v22 }
 0x622   : > { %3532 = vmatpush1.bf16.msra.mxu1 %v5292_v58  ;;  %v3038_v55 = vpop.permute.xlu1 %3037 }
 0x623   : > { %v3116_v59 = vpop.permute.xlu0 %3115  ;;  %3533 = vmatprep.subr.bf16.mxu1 %v5314_v28  ;;  %v3049_v39 = vsel %vm539_vm2, %v3038_v55, %v3040_v18 }
 0x626   : > { %3534 = vmatpush1.bf16.msra.mxu1 %v5312_v33  ;;  %v3048_v38 = vpop.permute.xlu1 %3047 }
 0x627   : > { %v3186_v44 = vpop.permute.xlu0 %3185  ;;  %3535 = vmatprep.subr.bf16.mxu1 %v2978_v23  ;;  %v5571_v23 = vld [vmem:[%s5626_s2] sm:$0x3] }
 0x62a   : > { %3536 = vmatpush1.bf16.msra.mxu1 %v2977_v5  ;;  %v3114_v61 = vpop.permute.xlu1 %3113  ;;  %v4341_v5 = vld [vmem:[%s5633_s9 + $0x90] ss:$12 sps:$4 sm:$0xff]  }
 0x62b   : > { %v2974_v42 = vpop.permute.xlu0 %2973  ;;  %v3124_v41 = vsel %vm483_vm3, %v3114_v61, %v3116_v59 }
 0x62c   : > { %v2979_v63 = vsel %vm594_vm4, %v2972_v53, %v2974_v42  ;;  %v2980_v58 = vsel %vm594_vm4, %v2974_v42, %v2976_v34  ;;  %v3782_v34 = vrot.slane %v5571_v23, %v4561_v27 }
 0x62d   : > { %3537 = vmatprep.subr.bf16.mxu1 %v2980_v58 }
 0x62e   : > { %3538 = vmatpush1.bf16.msra.mxu1 %v2979_v63  ;;  %v3112_v8 = vpop.permute.xlu1 %3111 }
 0x62f   : > { %v3184_v28 = vpop.permute.xlu0 %3183  ;;  %3539 = vmatprep.subr.bf16.mxu1 %v3050_v29  ;;  %v3123_v54 = vsel %vm483_vm3, %v3112_v8, %v3114_v61 }
 0x630   : > { %v3195_v33 = vsel %vm428_vm0, %v3184_v28, %v3186_v44 }
 0x632   : > { %3540 = vmatpush1.bf16.msra.mxu1 %v3049_v39  ;;  %v3188_v9 = vpop.permute.xlu1 %3187 }
 0x633   : > { %v3046_v11 = vpop.permute.xlu0 %3045  ;;  %v3196_v13 = vsel %vm428_vm0, %v3186_v44, %v3188_v9 }
 0x634   : > { %v3051_v7 = vsel %vm539_vm2, %v3044_v25, %v3046_v11  ;;  %v3052_v57 = vsel %vm539_vm2, %v3046_v11, %v3048_v38  ;;  %3628 = vmatprep.subr.bf16.mxu0 %v3196_v13 }
 0x635   : > { %3541 = vmatprep.subr.bf16.mxu1 %v3052_v57  ;;  %3629 = vmatpush1.bf16.msra.mxu0 %v3195_v33 }
 0x636   : > { %3542 = vmatpush1.bf16.msra.mxu1 %v3051_v7  ;;  %v3118_v10 = vpop.permute.xlu1 %3117 }
 0x637   : > { %v3122_v16 = vpop.permute.xlu0 %3121  ;;  %3543 = vmatprep.subr.bf16.mxu1 %v3124_v41 }
 0x63a   : > { %3544 = vmatpush1.bf16.msra.mxu1 %v3123_v54  ;;  %v3120_v51 = vpop.permute.xlu1 %3119 }
 0x63b   : > { %v3192_v43 = vpop.permute.xlu0 %3191  ;;  %v3125_v17 = vsel %vm483_vm3, %v3118_v10, %v3120_v51  ;;  %v3126_v21 = vsel %vm483_vm3, %v3120_v51, %v3122_v16 }
 0x63c   : > { %3545 = vmatprep.subr.bf16.mxu1 %v3126_v21 }
 0x63e   : > { %3546 = vmatpush1.bf16.msra.mxu1 %v3125_v17  ;;  %v3194_v56 = vpop.permute.xlu1 %3193 }
 0x63f   : > { %v3190_v12 = vpop.permute.xlu0 %3189  ;;  %v3198_v32 = vsel %vm428_vm0, %v3192_v43, %v3194_v56 }
 0x640   : > { %v3197_v15 = vsel %vm428_vm0, %v3190_v12, %v3192_v43  ;;  %3630 = vmatprep.subr.bf16.mxu0 %v3198_v32 }
 0x641   : > { %3548 = vmatmul.mubr.bf16.vlgmr.msra.gmra.mrb[8].mxu1 %v4315_v24  ;;  %3631 = vmatpush1.bf16.msra.mxu0 %v3197_v15 }
 0x642   : > { %3557 = vmatprep.mubr.bf16.mxu1 %v4319_v26 }
 0x644   : > { %4041 = vmatmul.mubr.msk.bf16.vlgmr.msra.gmra.mrb[24].mxu0 %vm1660_vm10, %v4318_v36 }
 0x645   : > { %3670 = vmatprep.mubr.bf16.mxu0 %v5362_v6 }
 0x649   : > { %3558 = vmatmul.mubr.bf16.gmra.mrb[12].mxu1 %v4321_v31 }
 0x64a   : > { %3567 = vmatprep.mubr.bf16.mxu1 %v4323_v48 }
 0x64c   : > { %4042 = vmatmul.mubr.msk.bf16.gmra.mrb[28].mxu0 %vm1660_vm10, %v4322_v30 }
 0x64d   : > { %3680 = vmatprep.mubr.bf16.mxu0 %v5362_v6 }
 0x64f   : > { %v3294_v53 = vpop.permute.xlu1 %3293 }
 0x650   : > { %v3299_v20 = vpop.permute.xlu0 %3298 }
 0x651   : > { %3568 = vmatmul.mubr.bf16.gmra.mrb[16].mxu1 %v4325_v37 }
 0x652   : > { %3577 = vmatprep.mubr.bf16.mxu1 %v4327_v19 }
 0x653   : > { %v3304_v58 = vpop.permute.xlu1 %3303 }
 0x654   : > { %4043 = vmatmul.mubr.msk.bf16.gmra.mrb[32].mxu0 %vm1660_vm10, %v4326_v1  ;;  %v3309_v11 = vpop.permute.xlu0 %3308 }
 0x655   : > { %3690 = vmatprep.mubr.bf16.mxu0 %v5362_v6 }
 0x657   : > { %v3314_v31 = vpop.permute.xlu1 %3313 }
 0x659   : > { %3578 = vmatmul.mubr.bf16.gmra.mrb[20].mxu1 %v4329_v50 }
 0x65a   : > { %3587 = vmatprep.mubr.bf16.mxu1 %v4331_v60  ;;  %v3319_v60 = vpop.permute.xlu0 %3318 }
 0x65c   : > { %4044 = vmatmul.mubr.msk.bf16.gmra.mrb[36].mxu0 %vm1660_vm10, %v4330_v3 }
 0x65d   : > { %3700 = vmatprep.mubr.bf16.mxu0 %v5362_v6 }
 0x661   : > { %3588 = vmatmul.mubr.bf16.gmra.mrb[24].mxu1 %v4333_v62 }
 0x662   : > { %3597 = vmatprep.mubr.bf16.mxu1 %v4335_v0 }
 0x664   : > { %4045 = vmatmul.mubr.msk.bf16.gmra.mrb[40].mxu0 %vm1660_vm10, %v4334_v2 }
 0x665   : > { %3710 = vmatprep.mubr.bf16.mxu0 %v5362_v6 }
 0x669   : > { %3598 = vmatmul.mubr.bf16.gmra.mrb[28].mxu1 %v4337_v4 }
 0x66a   : > { %3607 = vmatprep.mubr.bf16.mxu1 %v4339_v45 }
 0x66c   : > { %4046 = vmatmul.mubr.msk.bf16.gmra.mrb[44].mxu0 %vm1660_vm10, %v4338_v46 }
 0x66d   : > { %3720 = vmatprep.mubr.bf16.mxu0 %v5362_v6 }
 0x671   : > { %3608 = vmatmul.mubr.bf16.gmra.mrb[32].mxu1 %v4341_v5 }
 0x672   : > { %3617 = vmatprep.mubr.bf16.mxu1 %v4343_v49 }
 0x674   : > { %4047 = vmatmul.mubr.msk.bf16.gmra.mrb[48].mxu0 %vm1660_vm10, %v4342_v47 }
 0x675   : > { %3730 = vmatprep.mubr.bf16.mxu0 %v5362_v6 }
 0x679   : > { %3618 = vmatmul.mubr.bf16.gmra.mrb[36].mxu1 %v4345_v52 }
 0x67a   : > { %3849 = vmatprep.mubr.f32.mxu1 %v3782_v34 }
 0x67c   : > { %4048 = vmatmul.mubr.msk.bf16.gmra.mrb[52].mxu0 %vm1660_vm10, %v4346_v40 }
 0x714   : > { %v3549_v35 = vpop.f32.mrb[8].mxu1 }
 0x715   : > { %v3550_v22 = vadd.f32 %v3549_v35, %v3294_v53  ;;  %v3551_v6 = vpop.f32.mrb[9].mxu1 }
 0x716   : > { %v3552_v18 = vadd.f32 %v3551_v6, %v3294_v53  ;;  %v3553_v25 = vpop.f32.mrb[10].mxu1  ;;  %v3324_v6 = vpop.permute.xlu1 %3323 }
 0x717   : > { %v3554_v29 = vadd.f32 %v3553_v25, %v3299_v20  ;;  %v3555_v55 = vpop.f32.mrb[11].mxu1  ;;  %v3662_v39 = vpop.f32.mrb[24].mxu0 }
 0x718   : > { %v3556_v59 = vadd.f32 %v3555_v55, %v3299_v20  ;;  %v3663_v38 = vadd.f32 %v3662_v39, %v3550_v22  ;;  %v3664_v44 = vpop.f32.mrb[25].mxu0  ;;  %v3329_v39 = vpop.permute.xlu0 %3328 }
 0x719   : > { %v3665_v61 = vadd.f32 %v3664_v44, %v3552_v18  ;;  %v3666_v42 = vpop.f32.mrb[26].mxu0 }
 0x71a   : > { %v3667_v41 = vadd.f32 %v3666_v42, %v3554_v29  ;;  %v3668_v63 = vpop.f32.mrb[27].mxu0  ;;  %v3741_v28 = vmax.f32 %v3663_v38, 0.0 }
 0x71b   : > { %v3669_v27 = vadd.f32 %v3668_v63, %v3556_v59  ;;  %v3742_v13 = vmax.f32 %v3665_v61, 0.0 }
 0x71c   : > { %v3559_v8 = vpop.f32.mrb[12].mxu1  ;;  %v3743_v54 = vmax.f32 %v3667_v41, 0.0 }
 0x71d   : > { %v3560_v33 = vadd.f32 %v3559_v8, %v3304_v58  ;;  %v3561_v9 = vpop.f32.mrb[13].mxu1  ;;  %v3744_v7 = vmax.f32 %v3669_v27, 0.0 }
 0x71e   : > { %v3562_v57 = vadd.f32 %v3561_v9, %v3304_v58  ;;  %v3563_v10 = vpop.f32.mrb[14].mxu1  ;;  %v4055_v16 = vpack.c.bf16 %v3743_v54, %v3741_v28 }
 0x71f   : > { %v3564_v51 = vadd.f32 %v3563_v10, %v3309_v11  ;;  %v3565_v43 = vpop.f32.mrb[15].mxu1  ;;  %v4053_v17 = vpack.c.bf16 %v3744_v7, %v3742_v13  ;;  %v3672_v24 = vpop.f32.mrb[28].mxu0 }
 0x720   : > { %v3566_v21 = vadd.f32 %v3565_v43, %v3309_v11  ;;  %v3673_v26 = vadd.f32 %v3672_v24, %v3560_v33  ;;  %v3674_v56 = vpop.f32.mrb[29].mxu0  ;;  %v3339_v24 = vpop.permute.xlu0 %3338 }
 0x721   : > { %v3675_v12 = vadd.f32 %v3674_v56, %v3562_v57  ;;  %v3676_v32 = vpop.f32.mrb[30].mxu0  ;;  %4054 = vmatprep.subr.bf16.mxu1 %v4053_v17  ;;  %v3334_v57 = vpop.permute.xlu1 %3333 }
 0x722   : > { %v3677_v15 = vadd.f32 %v3676_v32, %v3564_v51  ;;  %v3678_v36 = vpop.f32.mrb[31].mxu0  ;;  %4056 = vmatpush1.bf16.xpose.msra.mxu1 %v4055_v16  ;;  %v3745_v37 = vmax.f32 %v3673_v26, 0.0 }
 0x723   : > { %v3679_v48 = vadd.f32 %v3678_v36, %v3566_v21  ;;  %v3746_v3 = vmax.f32 %v3675_v12, 0.0 }
 0x724   : > { %v3569_v30 = vpop.f32.mrb[16].mxu1  ;;  %v3747_v19 = vmax.f32 %v3677_v15, 0.0 }
 0x725   : > { %v3570_v1 = vadd.f32 %v3569_v30, %v3314_v31  ;;  %v3571_v50 = vpop.f32.mrb[17].mxu1  ;;  %v3748_v62 = vmax.f32 %v3679_v48, 0.0 }
 0x726   : > { %v3572_v0 = vadd.f32 %v3571_v50, %v3314_v31  ;;  %v3573_v2 = vpop.f32.mrb[18].mxu1  ;;  %v4059_v4 = vpack.c.bf16 %v3747_v19, %v3745_v37 }
 0x727   : > { %v3574_v45 = vadd.f32 %v3573_v2, %v3319_v60  ;;  %v3575_v46 = vpop.f32.mrb[19].mxu1  ;;  %v4057_v5 = vpack.c.bf16 %v3748_v62, %v3746_v3  ;;  %v3682_v47 = vpop.f32.mrb[32].mxu0 }
 0x728   : > { %v3576_v49 = vadd.f32 %v3575_v46, %v3319_v60  ;;  %v3683_v52 = vadd.f32 %v3682_v47, %v3570_v1  ;;  %v3684_v40 = vpop.f32.mrb[33].mxu0  ;;  %v3349_v47 = vpop.permute.xlu0 %3348 }
 0x729   : > { %v3685_v34 = vadd.f32 %v3684_v40, %v3572_v0  ;;  %v3686_v53 = vpop.f32.mrb[34].mxu0  ;;  %4058 = vmatprep.subr.bf16.mxu1 %v4057_v5  ;;  %v3344_v0 = vpop.permute.xlu1 %3343 }
 0x72a   : > { %v3687_v35 = vadd.f32 %v3686_v53, %v3574_v45  ;;  %v3688_v22 = vpop.f32.mrb[35].mxu0  ;;  %4060 = vmatpush1.bf16.xpose.msra.mxu1 %v4059_v4  ;;  %v3749_v25 = vmax.f32 %v3683_v52, 0.0 }
 0x72b   : > { %v3689_v20 = vadd.f32 %v3688_v22, %v3576_v49  ;;  %v3750_v38 = vmax.f32 %v3685_v34, 0.0 }
 0x72c   : > { %v3579_v18 = vpop.f32.mrb[20].mxu1  ;;  %v3751_v29 = vmax.f32 %v3687_v35, 0.0 }
 0x72d   : > { %v3580_v55 = vadd.f32 %v3579_v18, %v3324_v6  ;;  %v3581_v59 = vpop.f32.mrb[21].mxu1  ;;  %v3752_v44 = vmax.f32 %v3689_v20, 0.0 }
 0x72e   : > { %v3582_v61 = vadd.f32 %v3581_v59, %v3324_v6  ;;  %v3583_v42 = vpop.f32.mrb[22].mxu1  ;;  %v4063_v41 = vpack.c.bf16 %v3751_v29, %v3749_v25 }
 0x72f   : > { %v3584_v63 = vadd.f32 %v3583_v42, %v3329_v39  ;;  %v3585_v58 = vpop.f32.mrb[23].mxu1  ;;  %v4061_v27 = vpack.c.bf16 %v3752_v44, %v3750_v38  ;;  %v3692_v28 = vpop.f32.mrb[36].mxu0 }
 0x730   : > { %v3586_v8 = vadd.f32 %v3585_v58, %v3329_v39  ;;  %v3693_v54 = vadd.f32 %v3692_v28, %v3580_v55  ;;  %v3694_v33 = vpop.f32.mrb[37].mxu0  ;;  %v3359_v28 = vpop.permute.xlu0 %3358 }
 0x731   : > { %v3695_v9 = vadd.f32 %v3694_v33, %v3582_v61  ;;  %v3696_v11 = vpop.f32.mrb[38].mxu0  ;;  %4062 = vmatprep.subr.bf16.mxu1 %v4061_v27  ;;  %v3354_v61 = vpop.permute.xlu1 %3353 }
 0x732   : > { %v3697_v13 = vadd.f32 %v3696_v11, %v3584_v63  ;;  %v3698_v7 = vpop.f32.mrb[39].mxu0  ;;  %4064 = vmatpush1.bf16.xpose.msra.mxu1 %v4063_v41  ;;  %v3753_v51 = vmax.f32 %v3693_v54, 0.0 }
 0x733   : > { %v3699_v10 = vadd.f32 %v3698_v7, %v3586_v8  ;;  %v3754_v26 = vmax.f32 %v3695_v9, 0.0 }
 0x734   : > { %v3589_v16 = vpop.f32.mrb[24].mxu1  ;;  %v3755_v43 = vmax.f32 %v3697_v13, 0.0 }
 0x735   : > { %v3590_v17 = vadd.f32 %v3589_v16, %v3334_v57  ;;  %v3591_v21 = vpop.f32.mrb[25].mxu1  ;;  %v3756_v56 = vmax.f32 %v3699_v10, 0.0 }
 0x736   : > { %v3592_v12 = vadd.f32 %v3591_v21, %v3334_v57  ;;  %v3593_v32 = vpop.f32.mrb[26].mxu1  ;;  %v4067_v15 = vpack.c.bf16 %v3755_v43, %v3753_v51 }
 0x737   : > { %v3594_v36 = vadd.f32 %v3593_v32, %v3339_v24  ;;  %v3595_v31 = vpop.f32.mrb[27].mxu1  ;;  %v4065_v48 = vpack.c.bf16 %v3756_v56, %v3754_v26  ;;  %v3702_v37 = vpop.f32.mrb[40].mxu0 }
 0x738   : > { %v3596_v30 = vadd.f32 %v3595_v31, %v3339_v24  ;;  %v3703_v19 = vadd.f32 %v3702_v37, %v3590_v17  ;;  %v3704_v1 = vpop.f32.mrb[41].mxu0  ;;  %v3369_v37 = vpop.permute.xlu0 %3368 }
 0x739   : > { %v3705_v50 = vadd.f32 %v3704_v1, %v3592_v12  ;;  %v3706_v60 = vpop.f32.mrb[42].mxu0  ;;  %4066 = vmatprep.subr.bf16.mxu1 %v4065_v48  ;;  %v3364_v12 = vpop.permute.xlu1 %3363 }
 0x73a   : > { %v3707_v3 = vadd.f32 %v3706_v60, %v3594_v36  ;;  %v3708_v62 = vpop.f32.mrb[43].mxu0  ;;  %4068 = vmatpush1.bf16.xpose.msra.mxu1 %v4067_v15  ;;  %v3757_v45 = vmax.f32 %v3703_v19, 0.0 }
 0x73b   : > { %v3709_v2 = vadd.f32 %v3708_v62, %v3596_v30  ;;  %v3758_v52 = vmax.f32 %v3705_v50, 0.0 }
 0x73c   : > { %v3599_v4 = vpop.f32.mrb[28].mxu1  ;;  %v3759_v46 = vmax.f32 %v3707_v3, 0.0 }
 0x73d   : > { %v3600_v5 = vadd.f32 %v3599_v4, %v3344_v0  ;;  %v3601_v49 = vpop.f32.mrb[29].mxu1  ;;  %v3760_v40 = vmax.f32 %v3709_v2, 0.0 }
 0x73e   : > { %v3602_v34 = vadd.f32 %v3601_v49, %v3344_v0  ;;  %v3603_v53 = vpop.f32.mrb[30].mxu1  ;;  %v4071_v35 = vpack.c.bf16 %v3759_v46, %v3757_v45 }
 0x73f   : > { %v3604_v22 = vadd.f32 %v3603_v53, %v3349_v47  ;;  %v3605_v6 = vpop.f32.mrb[31].mxu1  ;;  %v4069_v20 = vpack.c.bf16 %v3760_v40, %v3758_v52  ;;  %v3712_v25 = vpop.f32.mrb[44].mxu0 }
 0x740   : > { %v3606_v18 = vadd.f32 %v3605_v6, %v3349_v47  ;;  %v3713_v29 = vadd.f32 %v3712_v25, %v3600_v5  ;;  %v3714_v55 = vpop.f32.mrb[45].mxu0  ;;  %v3778_v25 = vrot.slane %v5571_v23, %v4543_v14 }
 0x741   : > { %v3715_v59 = vadd.f32 %v3714_v55, %v3602_v34  ;;  %v3716_v39 = vpop.f32.mrb[46].mxu0  ;;  %4070 = vmatprep.subr.bf16.mxu1 %v4069_v20 }
 0x742   : > { %v3717_v38 = vadd.f32 %v3716_v39, %v3604_v22  ;;  %v3718_v44 = vpop.f32.mrb[47].mxu0  ;;  %4072 = vmatpush1.bf16.xpose.msra.mxu1 %v4071_v35  ;;  %v3761_v63 = vmax.f32 %v3713_v29, 0.0 }
 0x743   : > { %v3719_v42 = vadd.f32 %v3718_v44, %v3606_v18  ;;  %v3762_v54 = vmax.f32 %v3715_v59, 0.0 }
 0x744   : > { %v3609_v41 = vpop.f32.mrb[32].mxu1  ;;  %v3763_v58 = vmax.f32 %v3717_v38, 0.0 }
 0x745   : > { %v3610_v27 = vadd.f32 %v3609_v41, %v3354_v61  ;;  %v3611_v8 = vpop.f32.mrb[33].mxu1  ;;  %v3764_v33 = vmax.f32 %v3719_v42, 0.0 }
 0x746   : > { %v3612_v9 = vadd.f32 %v3611_v8, %v3354_v61  ;;  %v3613_v11 = vpop.f32.mrb[34].mxu1  ;;  %v4075_v13 = vpack.c.bf16 %v3763_v58, %v3761_v63 }
 0x747   : > { %v3614_v7 = vadd.f32 %v3613_v11, %v3359_v28  ;;  %v3615_v57 = vpop.f32.mrb[35].mxu1  ;;  %v4073_v10 = vpack.c.bf16 %v3764_v33, %v3762_v54  ;;  %v3722_v51 = vpop.f32.mrb[48].mxu0 }
 0x748   : > { %v3616_v16 = vadd.f32 %v3615_v57, %v3359_v28  ;;  %v3723_v43 = vadd.f32 %v3722_v51, %v3610_v27  ;;  %v3724_v17 = vpop.f32.mrb[49].mxu0 }
 0x749   : > { %v3725_v21 = vadd.f32 %v3724_v17, %v3612_v9  ;;  %v3726_v24 = vpop.f32.mrb[50].mxu0  ;;  %4074 = vmatprep.subr.bf16.mxu1 %v4073_v10 }
 0x74a   : > { %v3727_v26 = vadd.f32 %v3726_v24, %v3614_v7  ;;  %v3728_v56 = vpop.f32.mrb[51].mxu0  ;;  %4076 = vmatpush1.bf16.xpose.msra.mxu1 %v4075_v13  ;;  %v3765_v36 = vmax.f32 %v3723_v43, 0.0 }
 0x74b   : > { %v3729_v32 = vadd.f32 %v3728_v56, %v3616_v16  ;;  %v3766_v19 = vmax.f32 %v3725_v21, 0.0 }
 0x74c   : > { %v3619_v15 = vpop.f32.mrb[36].mxu1  ;;  %v3767_v31 = vmax.f32 %v3727_v26, 0.0 }
 0x74d   : > { %v3620_v48 = vadd.f32 %v3619_v15, %v3364_v12  ;;  %v3621_v30 = vpop.f32.mrb[37].mxu1  ;;  %v3768_v1 = vmax.f32 %v3729_v32, 0.0 }
 0x74e   : > { %v3622_v50 = vadd.f32 %v3621_v30, %v3364_v12  ;;  %v3623_v60 = vpop.f32.mrb[38].mxu1  ;;  %v4079_v3 = vpack.c.bf16 %v3767_v31, %v3765_v36 }
 0x74f   : > { %v3624_v62 = vadd.f32 %v3623_v60, %v3369_v37  ;;  %v3625_v0 = vpop.f32.mrb[39].mxu1  ;;  %v4077_v2 = vpack.c.bf16 %v3768_v1, %v3766_v19  ;;  %v3732_v45 = vpop.f32.mrb[52].mxu0 }
 0x750   : > { %v3626_v4 = vadd.f32 %v3625_v0, %v3369_v37  ;;  %v3733_v46 = vadd.f32 %v3732_v45, %v3620_v48  ;;  %v3734_v5 = vpop.f32.mrb[53].mxu0 }
 0x751   : > { %v3735_v49 = vadd.f32 %v3734_v5, %v3622_v50  ;;  %v3736_v47 = vpop.f32.mrb[54].mxu0  ;;  %4078 = vmatprep.subr.bf16.mxu1 %v4077_v2 }
 0x752   : > { %v3737_v52 = vadd.f32 %v3736_v47, %v3624_v62  ;;  %v3738_v40 = vpop.f32.mrb[55].mxu0  ;;  %4080 = vmatpush1.bf16.xpose.msra.mxu1 %v4079_v3  ;;  %v3769_v53 = vmax.f32 %v3733_v46, 0.0 }
 0x753   : > { %v3739_v34 = vadd.f32 %v3738_v40, %v3626_v4  ;;  %v3770_v22 = vmax.f32 %v3735_v49, 0.0 }
 0x754   : > { %v3771_v35 = vmax.f32 %v3737_v52, 0.0 }
 0x755   : > { %v3772_v6 = vmax.f32 %v3739_v34, 0.0 }
 0x756   : > { %v4083_v20 = vpack.c.bf16 %v3771_v35, %v3769_v53 }
 0x757   : > { %v4081_v18 = vpack.c.bf16 %v3772_v6, %v3770_v22 }
 0x759   : > { %4082 = vmatprep.subr.bf16.mxu1 %v4081_v18 }
 0x75a   : > { %4084 = vmatpush1.bf16.xpose.msra.mxu1 %v4083_v20 }
 0x761   : > { %3850 = vmatmul.mubr.f32.vlgmr.msra.gmra.mrb[40].mxu1 %v3778_v25 }
 0x834   : > { %v3851_v29 = vpop.f32.mrb[40].mxu1 }
 0x835   : > { %3855 = vst [vmem:[%s378_s6] sm:$0x1] %v3851_v29  ;;  %v3853_v55 = vpop.f32.mrb[41].mxu1 }
 0x836   : > { %4362 = shalt.err (!%p4359_p3)
}
 0x837   : > { %s4363_s29 = scalar_lea.hbm %s5584_s13, 16  ;;  %s4367_s0 = scalar_lea.hbm %s5635_s11, 32 }
 0x838   : > { %p4364_p4 = scmp.ne.s32.totalorder %s5584_s13, %s4363_s29  ;;  %p4368_p9 = scmp.lt.u32.totalorder %s5584_s13, %s5635_s11 }
 0x839   : > { %p4369_p10 = scmp.lt.u32.totalorder %s4367_s0, %s4363_s29  ;;  %p4371_p12 = scmp.lt.u32.totalorder %s4363_s29, %s5584_s13 }
 0x83a   : > { %p4365_p7 = pnand %p4364_p4, %p4521_p5 }
 0x83b   : > { %p4370_p11 = por %p4369_p10, %p4368_p9 }
 0x83c   : > { %p4366_p8 = pneg %p4365_p7 }
 0x83d   : > { %p4372_p13 = por %p4371_p12, %p4370_p11 }
 0x83f   : > { %p4373_p0 = pnand %p4372_p13, %p4366_p8 }
 0x841   : > { %4376 = shalt.err (!%p4373_p0)
}
 0x842   : > { %4181 = dma.vmem_to_hbm [thread:$0]  (%p4521_p5), %s5579_s19, 16, %s5584_s13, %s3857_s14  }
 0x843 PF: > { %p4187_p1 = scmp.ge.s32.totalorder %s4411_s20, 2  ;;  %s3881_s5 = sand.u32 1, %s4399_s17  }
 0x844   : > { %s3882_s25 = scalar_lea.sflag [#allocation5], %s3881_s5 }
 0x845   : > { %p4184_p2 = pnand %p4187_p1, %p4525_p6 }
 0x847   : > { %4394 = dma.done.wait (!%p4184_p2), %s3882_s25, 16  }
 0x848   : > { %4396 = vsyncadd (!%p4184_p2), %s3882_s25, 4294967280  ;;  %s5678_s20 = sld [smem:[#allocation8_spill]]  ;;  %s5679_s6 = sld [smem:[#allocation7_spill]] }
 0x849   : > { %s5680_s19 = sld [smem:[#allocation9_spill]]  ;;  %s5681_s17 = smov %s4403_s18 }
 0x84e   : > { %p21_p3 = scmp.ge.s32.totalorder %s5678_s20, 4   ;;  %s5682_s18 = smov %s5679_s6 }
 0x850   :  { %23 = sbr.rel (!%p21_p3) target bundleno = 9 (0x9), region = 99 }
 0x857   :  { %3886 = vsyncpa [#allocation5], 1 }
 0x858   :  { %3888 = vsyncpa [#allocation5 + $0x1], 1 }

</bundles_post_ra>
